<compile_context>
chip_gen: v7x
topology: tpu7x:2x2x1
jax: 0.10.0
libtpu: 0.0.40
codegen_flags: <defaults>
</compile_context>

<pallas_src>
import jax
import jax.numpy as jnp
import numpy as np
from jax.experimental import pallas as pl
from jax.experimental.pallas import tpu as pltpu

BN_EPS = 1e-5
LANE = 128           # one lane group per branch / per (padded) conv channel set


# ----------------------------- fused Pallas kernel -----------------------------

def _inception_a_kernel(x_ref, w1_ref, b1_ref,
                        wb2_ref, bb2_ref,
                        wc2_ref, bc2_ref,
                        wc3_ref, bc3_ref,
                        wd_ref, bd_ref,
                        o_ref):
    """One (NB*64, 384) slab of flattened 8x8 images per grid step."""
    M = x_ref.shape[0]                                    # NB * 64 pixels

    x2d = x_ref[...]                                      # (M, 384) f32, pre-relu (residual)
    xr = jnp.maximum(x2d, 0.0).astype(jnp.bfloat16)       # relu1, bf16 for the MXU

    # fused a1 | b1 | c1 1x1 conv (+ folded BN + ReLU); each branch lives in its
    # own 128-lane group of the 384-wide output (padded lanes are exactly zero).
    y1 = jnp.dot(xr, w1_ref[...], preferred_element_type=jnp.float32)
    y1 = jnp.maximum(y1 + b1_ref[...], 0.0)               # (M, 384) f32

    # per-row validity masks for the 3x3 taps (8x8 images stacked along M)
    ri = jax.lax.broadcasted_iota(jnp.int32, (M, LANE), 0)
    q = ri & 63                                           # pixel index within its image
    cx = ri & 7                                           # column within its row
    row_ok = (q >= 8, None, q < 56)                       # ky = 0, 1, 2
    col_ok = (cx >= 1, None, cx <= 6)                     # kx = 0, 1, 2

    def conv3x3(xin, w_ref, b_ref):
        """3x3 conv (padding=1) + folded BN + ReLU on a (M, 128) lane group."""
        taps = []
        for ky in range(3):
            for kx in range(3):
                s = (ky - 1) * 8 + (kx - 1)               # flattened spatial shift
                t = pltpu.roll(xin, (-s) % M, 0) if s else xin
                m = row_ok[ky]
                if col_ok[kx] is not None:
                    m = col_ok[kx] if m is None else (m & col_ok[kx])
                if m is not None:
                    t = jnp.where(m, t, 0.0)              # zero out-of-image taps
                taps.append(t.astype(jnp.bfloat16))
        patch = jnp.concatenate(taps, axis=1)             # (M, 9*128) bf16 im2col
        y = jnp.dot(patch, w_ref[...], preferred_element_type=jnp.float32)
        return jnp.maximum(y + b_ref[...], 0.0)           # (M, 128) f32

    xb = conv3x3(y1[:, 128:256], wb2_ref, bb2_ref)        # branch1_b 3x3
    xc = conv3x3(y1[:, 256:384], wc2_ref, bc2_ref)        # branch1_c 3x3 #1
    xc = conv3x3(xc, wc3_ref, bc3_ref)                    # branch1_c 3x3 #2

    # branch2: 1x1 (128->384) on cat(xa, xb, xc); lane-aligned concat and ONE
    # (M,384)@(384,384) matmul (zero-padded wd rows make the pad lanes inert).
    cat = jnp.concatenate([y1[:, 0:128], xb, xc], axis=1).astype(jnp.bfloat16)
    yd = jnp.dot(cat, wd_ref[...], preferred_element_type=jnp.float32)
    yd = jnp.maximum(yd + bd_ref[...], 0.0)               # BasicConv2d ReLU
    o_ref[...] = jnp.maximum(yd + x2d, 0.0)               # residual + relu2


# ----------------------------- parameter prep -----------------------------

def _fold_bn(p):
    """Inference-mode BN fold: conv bias + BN -> per-channel (scale, bias)."""
    scale = p["gamma"] / jnp.sqrt(p["var"] + BN_EPS)
    bias = p["beta"] + (p["b"] - p["mean"]) * scale
    return scale, bias


def _prep_params(P):
    # fused a1|b1|c1 1x1: (384, 384) with each branch in its own 128-lane group
    w1 = jnp.zeros((384, 384), jnp.float32)
    b1 = jnp.zeros((384,), jnp.float32)
    for g, name in enumerate(("a1", "b1", "c1")):
        s, b = _fold_bn(P[name])
        w = P[name]["w"].reshape(32, 384).T * s[None, :]       # (384, 32)
        w1 = w1.at[:, g * LANE:g * LANE + 32].set(w)
        b1 = b1.at[g * LANE:g * LANE + 32].set(b)
    w1 = w1.astype(jnp.bfloat16)
    b1 = b1.reshape(1, 384)

    def conv3x3_w(p):
        s, b = _fold_bn(p)
        co, ci = p["w"].shape[0], p["w"].shape[1]
        w = jnp.transpose(p["w"], (2, 3, 1, 0)) * s            # (3, 3, ci, co)
        wp = jnp.zeros((9, LANE, LANE), jnp.float32)
        wp = wp.at[:, :ci, :co].set(w.reshape(9, ci, co))
        bp = jnp.zeros((LANE,), jnp.float32).at[:co].set(b)
        return wp.reshape(9 * LANE, LANE).astype(jnp.bfloat16), bp.reshape(1, LANE)

    wb2, bb2 = conv3x3_w(P["b2"])
    wc2, bc2 = conv3x3_w(P["c2"])
    wc3, bc3 = conv3x3_w(P["c3"])

    # final 1x1 (128 -> 384), K zero-padded to the three 128-lane groups
    sd, bd = _fold_bn(P["d1"])
    wd_real = P["d1"]["w"].reshape(384, 128).T * sd[None, :]   # (128, 384)
    wd = jnp.zeros((384, 384), jnp.float32)
    wd = wd.at[0:32, :].set(wd_real[0:32])                     # xa channels
    wd = wd.at[128:160, :].set(wd_real[32:64])                 # xb channels
    wd = wd.at[256:320, :].set(wd_real[64:128])                # xc channels
    wd = wd.astype(jnp.bfloat16)
    bd = bd.reshape(1, 384)

    return w1, b1, wb2, bb2, wc2, bc2, wc3, bc3, wd, bd


def _pick_nb(n):
    """Images per grid step: maximize matmul M while keeping >=2 grid steps
    (v7x has two TensorCores) whenever the batch size allows it."""
    for nb in (4, 2):
        if n % nb == 0 and n // nb >= 2:
            return nb
    return 1


# ----------------------------- public forward (NHWC) -----------------------------

@jax.jit
def inception_block_a(x_nhwc, P):
    N, H, W, C = x_nhwc.shape
    assert C == 384 and H == 8 and W == 8
    prep = _prep_params(P)                                  # constant-ish, fused under jit

    x2 = x_nhwc.reshape(N * 64, 384).astype(jnp.float32)    # free, contiguous reshape
    nb = _pick_nb(N)
    mb = nb * 64
    grid = (N * 64 // mb,)

    def full(shp):
        return pl.BlockSpec(shp, lambda i, _z=(0,) * len(shp): _z)

    out2 = pl.pallas_call(
        _inception_a_kernel,
        out_shape=jax.ShapeDtypeStruct((N * 64, 384), jnp.float32),
        grid=grid,
        in_specs=[
            pl.BlockSpec((mb, 384), lambda i: (i, 0)),
            full((384, 384)), full((1, 384)),
            full((9 * LANE, LANE)), full((1, LANE)),
            full((9 * LANE, LANE)), full((1, LANE)),
            full((9 * LANE, LANE)), full((1, LANE)),
            full((384, 384)), full((1, 384)),
        ],
        out_specs=pl.BlockSpec((mb, 384), lambda i: (i, 0)),
        compiler_params=pltpu.CompilerParams(
            dimension_semantics=("parallel",)),
    )(x2, *prep)

    return out2.reshape(N, 8, 8, 384)


@jax.jit
def inception_block_a_nchw(x_nchw, P):
    # Drop-in NCHW adapter (parity with the PyTorch module). Prefer the NHWC
    # entry point: keeping activations NHWC end-to-end avoids these transposes.
    x_nhwc = jnp.transpose(x_nchw, (0, 2, 3, 1))
    return jnp.transpose(inception_block_a(x_nhwc, P), (0, 3, 1, 2))


# ----------------------------- parameters -----------------------------

def init_basic_conv(key, cin, cout, ksize):
    kw, kb, kg, kbe, km, kv = jax.random.split(key, 6)
    fan_in = cin * ksize * ksize
    return dict(
        w=jax.random.normal(kw, (cout, cin, ksize, ksize), jnp.float32)
          * (1.0 / np.sqrt(fan_in)),
        b=0.01 * jax.random.normal(kb, (cout,), jnp.float32),
        gamma=1.0 + 0.1 * jax.random.normal(kg, (cout,), jnp.float32),
        beta=0.1 * jax.random.normal(kbe, (cout,), jnp.float32),
        mean=0.1 * jax.random.normal(km, (cout,), jnp.float32),
        var=jax.random.uniform(kv, (cout,), jnp.float32, 0.5, 1.5),
    )


def init_params(key):
    keys = jax.random.split(key, 7)
    return dict(
        a1=init_basic_conv(keys[0], 384, 32, 1),
        b1=init_basic_conv(keys[1], 384, 32, 1),
        b2=init_basic_conv(keys[2], 32, 32, 3),
        c1=init_basic_conv(keys[3], 384, 32, 1),
        c2=init_basic_conv(keys[4], 32, 48, 3),
        c3=init_basic_conv(keys[5], 48, 64, 3),
        d1=init_basic_conv(keys[6], 128, 384, 1),
    )


# ----------------------------- pure-JAX reference (NHWC) -----------------------------

def _basic_conv_ref(x, p, padding):
    y = jax.lax.conv_general_dilated(
        x, p["w"], window_strides=(1, 1),
        padding=[(padding, padding), (padding, padding)],
        dimension_numbers=("NHWC", "OIHW", "NHWC"))
    y = y + p["b"][None, None, None, :]
    s = p["gamma"] / jnp.sqrt(p["var"] + BN_EPS)
    y = (y - p["mean"]) * s + p["beta"]
    return jnp.maximum(y, 0.0)


def inception_block_a_ref(x, P):
    xr = jnp.maximum(x, 0.0)
    xa = _basic_conv_ref(xr, P["a1"], 0)
    xb = _basic_conv_ref(_basic_conv_ref(xr, P["b1"], 0), P["b2"], 1)
    xc = _basic_conv_ref(
        _basic_conv_ref(_basic_conv_ref(xr, P["c1"], 0), P["c2"], 1),
        P["c3"], 1)
    cat = jnp.concatenate([xa, xb, xc], axis=-1)
    y = _basic_conv_ref(cat, P["d1"], 0)
    return jnp.maximum(y + x, 0.0)


# ----------------------------- main -----------------------------

if __name__ == "__main__":
    key = jax.random.PRNGKey(0)
    kp, kx = jax.random.split(key)
    P = init_params(kp)

    # NHWC activations end-to-end (per perf review); N=4 -> 2 "parallel" grid
    # steps of M = 128 flattened pixels each.
    x = jax.random.normal(kx, (4, 8, 8, 384), jnp.float32)

    out = jax.block_until_ready(inception_block_a(x, P))
    ref = jax.block_until_ready(inception_block_a_ref(x, P))

    err = float(jnp.max(jnp.abs(out - ref)))
    scale = float(jnp.max(jnp.abs(ref))) + 1e-6
    assert out.shape == x.shape and out.dtype == jnp.float32
    assert err <= 0.05 * scale + 1e-2, f"max abs err {err} vs scale {scale}"

    # NCHW adapter (module-native layout) gives the same result.
    out_nchw = jax.block_until_ready(
        inception_block_a_nchw(jnp.transpose(x, (0, 3, 1, 2)), P))
    assert out_nchw.shape == (4, 384, 8, 8)

    print("KERNEL_OK")
</pallas_src>

<mosaic_0001>
module attributes {stable_mosaic.version = 11 : i64} {
  func.func @_inception_a_kernel(%arg0: i32, %arg1: memref<128x384xf32, #tpu.memory_space<vmem>>, %arg2: memref<384x384xbf16, #tpu.memory_space<vmem>>, %arg3: memref<1x384xf32, #tpu.memory_space<vmem>>, %arg4: memref<1152x128xbf16, #tpu.memory_space<vmem>>, %arg5: memref<1x128xf32, #tpu.memory_space<vmem>>, %arg6: memref<1152x128xbf16, #tpu.memory_space<vmem>>, %arg7: memref<1x128xf32, #tpu.memory_space<vmem>>, %arg8: memref<1152x128xbf16, #tpu.memory_space<vmem>>, %arg9: memref<1x128xf32, #tpu.memory_space<vmem>>, %arg10: memref<384x384xbf16, #tpu.memory_space<vmem>>, %arg11: memref<1x384xf32, #tpu.memory_space<vmem>>, %arg12: memref<128x384xf32, #tpu.memory_space<vmem>>) attributes {dimension_semantics = [#tpu.dimension_semantics<parallel>], iteration_bounds = array<i64: 2>, scalar_prefetch = 0 : i64, scratch_operands = 0 : i64, tpu.core_type = #tpu.core_type<tc>, window_params = [{transform_indices = @transform_0, window_bounds = array<i64: 128, 384>}, {pipeline_mode = #tpu.pipeline_mode<synchronous>, transform_indices = @transform_1, window_bounds = array<i64: 384, 384>}, {pipeline_mode = #tpu.pipeline_mode<synchronous>, transform_indices = @transform_2, window_bounds = array<i64: 1, 384>}, {pipeline_mode = #tpu.pipeline_mode<synchronous>, transform_indices = @transform_3, window_bounds = array<i64: 1152, 128>}, {pipeline_mode = #tpu.pipeline_mode<synchronous>, transform_indices = @transform_4, window_bounds = array<i64: 1, 128>}, {pipeline_mode = #tpu.pipeline_mode<synchronous>, transform_indices = @transform_5, window_bounds = array<i64: 1152, 128>}, {pipeline_mode = #tpu.pipeline_mode<synchronous>, transform_indices = @transform_6, window_bounds = array<i64: 1, 128>}, {pipeline_mode = #tpu.pipeline_mode<synchronous>, transform_indices = @transform_7, window_bounds = array<i64: 1152, 128>}, {pipeline_mode = #tpu.pipeline_mode<synchronous>, transform_indices = @transform_8, window_bounds = array<i64: 1, 128>}, {pipeline_mode = #tpu.pipeline_mode<synchronous>, transform_indices = @transform_9, window_bounds = array<i64: 384, 384>}, {pipeline_mode = #tpu.pipeline_mode<synchronous>, transform_indices = @transform_10, window_bounds = array<i64: 1, 384>}, {transform_indices = @transform_11, window_bounds = array<i64: 128, 384>}]} {
    %c0 = arith.constant 0 : index
    %c0_0 = arith.constant 0 : index
    %0 = vector.load %arg1[%c0, %c0_0] : memref<128x384xf32, #tpu.memory_space<vmem>>, vector<128x384xf32>
    %cst = arith.constant 0.000000e+00 : f32
    %1 = vector.broadcast %cst : f32 to vector<128x384xf32>
    %2 = arith.maximumf %0, %1 : vector<128x384xf32>
    %3 = arith.truncf %2 : vector<128x384xf32> to vector<128x384xbf16>
    %c0_1 = arith.constant 0 : index
    %c0_2 = arith.constant 0 : index
    %4 = vector.load %arg2[%c0_1, %c0_2] : memref<384x384xbf16, #tpu.memory_space<vmem>>, vector<384x384xbf16>
    %cst_3 = arith.constant dense<0.000000e+00> : vector<128x384xf32>
    %5 = tpu.matmul %3, %4, %cst_3 {dimension_numbers = #tpu.dot_dimension_numbers<[1], [0], [0], [1], [0, 0, 1, 1], [], []>} : vector<128x384xbf16>, vector<384x384xbf16>, vector<128x384xf32> -> vector<128x384xf32>
    %c0_4 = arith.constant 0 : index
    %c0_5 = arith.constant 0 : index
    %6 = vector.load %arg3[%c0_4, %c0_5] : memref<1x384xf32, #tpu.memory_space<vmem>>, vector<1x384xf32>
    %7 = vector.broadcast %6 : vector<1x384xf32> to vector<128x384xf32>
    %8 = arith.addf %5, %7 : vector<128x384xf32>
    %cst_6 = arith.constant 0.000000e+00 : f32
    %9 = vector.broadcast %cst_6 : f32 to vector<128x384xf32>
    %10 = arith.maximumf %8, %9 : vector<128x384xf32>
    %11 = tpu.iota {dimensions = array<i32: 0>} : vector<128x128xi32>
    %c63_i32 = arith.constant 63 : i32
    %12 = vector.broadcast %c63_i32 : i32 to vector<128x128xi32>
    %13 = arith.andi %11, %12 : vector<128x128xi32>
    %c7_i32 = arith.constant 7 : i32
    %14 = vector.broadcast %c7_i32 : i32 to vector<128x128xi32>
    %15 = arith.andi %11, %14 : vector<128x128xi32>
    %c8_i32 = arith.constant 8 : i32
    %16 = vector.broadcast %c8_i32 : i32 to vector<128x128xi32>
    %17 = arith.cmpi sge, %13, %16 : vector<128x128xi32>
    %c56_i32 = arith.constant 56 : i32
    %18 = vector.broadcast %c56_i32 : i32 to vector<128x128xi32>
    %19 = arith.cmpi slt, %13, %18 : vector<128x128xi32>
    %c1_i32 = arith.constant 1 : i32
    %20 = vector.broadcast %c1_i32 : i32 to vector<128x128xi32>
    %21 = arith.cmpi sge, %15, %20 : vector<128x128xi32>
    %c6_i32 = arith.constant 6 : i32
    %22 = vector.broadcast %c6_i32 : i32 to vector<128x128xi32>
    %23 = arith.cmpi sle, %15, %22 : vector<128x128xi32>
    %24 = vector.extract_strided_slice %10 {offsets = [0, 128], sizes = [128, 128], strides = [1, 1]} : vector<128x384xf32> to vector<128x128xf32>
    %c9_i32 = arith.constant 9 : i32
    %25 = tpu.dynamic_rotate %24 by %c9_i32 dim 0 : vector<128x128xf32>, i32 -> vector<128x128xf32>
    %26 = arith.andi %17, %21 : vector<128x128xi1>
    %cst_7 = arith.constant 0.000000e+00 : f32
    %27 = vector.broadcast %cst_7 : f32 to vector<128x128xf32>
    %28 = arith.select %26, %25, %27 : vector<128x128xi1>, vector<128x128xf32>
    %29 = arith.truncf %28 : vector<128x128xf32> to vector<128x128xbf16>
    %c8_i32_8 = arith.constant 8 : i32
    %30 = tpu.dynamic_rotate %24 by %c8_i32_8 dim 0 : vector<128x128xf32>, i32 -> vector<128x128xf32>
    %cst_9 = arith.constant 0.000000e+00 : f32
    %31 = vector.broadcast %cst_9 : f32 to vector<128x128xf32>
    %32 = arith.select %17, %30, %31 : vector<128x128xi1>, vector<128x128xf32>
    %33 = arith.truncf %32 : vector<128x128xf32> to vector<128x128xbf16>
    %c7_i32_10 = arith.constant 7 : i32
    %34 = tpu.dynamic_rotate %24 by %c7_i32_10 dim 0 : vector<128x128xf32>, i32 -> vector<128x128xf32>
    %35 = arith.andi %17, %23 : vector<128x128xi1>
    %cst_11 = arith.constant 0.000000e+00 : f32
    %36 = vector.broadcast %cst_11 : f32 to vector<128x128xf32>
    %37 = arith.select %35, %34, %36 : vector<128x128xi1>, vector<128x128xf32>
    %38 = arith.truncf %37 : vector<128x128xf32> to vector<128x128xbf16>
    %c1_i32_12 = arith.constant 1 : i32
    %39 = tpu.dynamic_rotate %24 by %c1_i32_12 dim 0 : vector<128x128xf32>, i32 -> vector<128x128xf32>
    %cst_13 = arith.constant 0.000000e+00 : f32
    %40 = vector.broadcast %cst_13 : f32 to vector<128x128xf32>
    %41 = arith.select %21, %39, %40 : vector<128x128xi1>, vector<128x128xf32>
    %42 = arith.truncf %41 : vector<128x128xf32> to vector<128x128xbf16>
    %43 = arith.truncf %24 : vector<128x128xf32> to vector<128x128xbf16>
    %c127_i32 = arith.constant 127 : i32
    %44 = tpu.dynamic_rotate %24 by %c127_i32 dim 0 : vector<128x128xf32>, i32 -> vector<128x128xf32>
    %cst_14 = arith.constant 0.000000e+00 : f32
    %45 = vector.broadcast %cst_14 : f32 to vector<128x128xf32>
    %46 = arith.select %23, %44, %45 : vector<128x128xi1>, vector<128x128xf32>
    %47 = arith.truncf %46 : vector<128x128xf32> to vector<128x128xbf16>
    %c121_i32 = arith.constant 121 : i32
    %48 = tpu.dynamic_rotate %24 by %c121_i32 dim 0 : vector<128x128xf32>, i32 -> vector<128x128xf32>
    %49 = arith.andi %19, %21 : vector<128x128xi1>
    %cst_15 = arith.constant 0.000000e+00 : f32
    %50 = vector.broadcast %cst_15 : f32 to vector<128x128xf32>
    %51 = arith.select %49, %48, %50 : vector<128x128xi1>, vector<128x128xf32>
    %52 = arith.truncf %51 : vector<128x128xf32> to vector<128x128xbf16>
    %c120_i32 = arith.constant 120 : i32
    %53 = tpu.dynamic_rotate %24 by %c120_i32 dim 0 : vector<128x128xf32>, i32 -> vector<128x128xf32>
    %cst_16 = arith.constant 0.000000e+00 : f32
    %54 = vector.broadcast %cst_16 : f32 to vector<128x128xf32>
    %55 = arith.select %19, %53, %54 : vector<128x128xi1>, vector<128x128xf32>
    %56 = arith.truncf %55 : vector<128x128xf32> to vector<128x128xbf16>
    %c119_i32 = arith.constant 119 : i32
    %57 = tpu.dynamic_rotate %24 by %c119_i32 dim 0 : vector<128x128xf32>, i32 -> vector<128x128xf32>
    %58 = arith.andi %19, %23 : vector<128x128xi1>
    %cst_17 = arith.constant 0.000000e+00 : f32
    %59 = vector.broadcast %cst_17 : f32 to vector<128x128xf32>
    %60 = arith.select %58, %57, %59 : vector<128x128xi1>, vector<128x128xf32>
    %61 = arith.truncf %60 : vector<128x128xf32> to vector<128x128xbf16>
    %62 = tpu.concatenate %29, %33, %38, %42, %43, %47, %52, %56, %61 in 1 : vector<128x128xbf16>, vector<128x128xbf16>, vector<128x128xbf16>, vector<128x128xbf16>, vector<128x128xbf16>, vector<128x128xbf16>, vector<128x128xbf16>, vector<128x128xbf16>, vector<128x128xbf16> -> vector<128x1152xbf16>
    %c0_18 = arith.constant 0 : index
    %c0_19 = arith.constant 0 : index
    %63 = vector.load %arg4[%c0_18, %c0_19] : memref<1152x128xbf16, #tpu.memory_space<vmem>>, vector<1152x128xbf16>
    %cst_20 = arith.constant dense<0.000000e+00> : vector<128x128xf32>
    %64 = tpu.matmul %62, %63, %cst_20 {dimension_numbers = #tpu.dot_dimension_numbers<[1], [0], [0], [1], [0, 0, 1, 1], [], []>} : vector<128x1152xbf16>, vector<1152x128xbf16>, vector<128x128xf32> -> vector<128x128xf32>
    %c0_21 = arith.constant 0 : index
    %c0_22 = arith.constant 0 : index
    %65 = vector.load %arg5[%c0_21, %c0_22] : memref<1x128xf32, #tpu.memory_space<vmem>>, vector<1x128xf32>
    %66 = vector.broadcast %65 : vector<1x128xf32> to vector<128x128xf32>
    %67 = arith.addf %64, %66 : vector<128x128xf32>
    %cst_23 = arith.constant 0.000000e+00 : f32
    %68 = vector.broadcast %cst_23 : f32 to vector<128x128xf32>
    %69 = arith.maximumf %67, %68 : vector<128x128xf32>
    %70 = vector.extract_strided_slice %10 {offsets = [0, 256], sizes = [128, 128], strides = [1, 1]} : vector<128x384xf32> to vector<128x128xf32>
    %c9_i32_24 = arith.constant 9 : i32
    %71 = tpu.dynamic_rotate %70 by %c9_i32_24 dim 0 : vector<128x128xf32>, i32 -> vector<128x128xf32>
    %72 = arith.andi %17, %21 : vector<128x128xi1>
    %cst_25 = arith.constant 0.000000e+00 : f32
    %73 = vector.broadcast %cst_25 : f32 to vector<128x128xf32>
    %74 = arith.select %72, %71, %73 : vector<128x128xi1>, vector<128x128xf32>
    %75 = arith.truncf %74 : vector<128x128xf32> to vector<128x128xbf16>
    %c8_i32_26 = arith.constant 8 : i32
    %76 = tpu.dynamic_rotate %70 by %c8_i32_26 dim 0 : vector<128x128xf32>, i32 -> vector<128x128xf32>
    %cst_27 = arith.constant 0.000000e+00 : f32
    %77 = vector.broadcast %cst_27 : f32 to vector<128x128xf32>
    %78 = arith.select %17, %76, %77 : vector<128x128xi1>, vector<128x128xf32>
    %79 = arith.truncf %78 : vector<128x128xf32> to vector<128x128xbf16>
    %c7_i32_28 = arith.constant 7 : i32
    %80 = tpu.dynamic_rotate %70 by %c7_i32_28 dim 0 : vector<128x128xf32>, i32 -> vector<128x128xf32>
    %81 = arith.andi %17, %23 : vector<128x128xi1>
    %cst_29 = arith.constant 0.000000e+00 : f32
    %82 = vector.broadcast %cst_29 : f32 to vector<128x128xf32>
    %83 = arith.select %81, %80, %82 : vector<128x128xi1>, vector<128x128xf32>
    %84 = arith.truncf %83 : vector<128x128xf32> to vector<128x128xbf16>
    %c1_i32_30 = arith.constant 1 : i32
    %85 = tpu.dynamic_rotate %70 by %c1_i32_30 dim 0 : vector<128x128xf32>, i32 -> vector<128x128xf32>
    %cst_31 = arith.constant 0.000000e+00 : f32
    %86 = vector.broadcast %cst_31 : f32 to vector<128x128xf32>
    %87 = arith.select %21, %85, %86 : vector<128x128xi1>, vector<128x128xf32>
    %88 = arith.truncf %87 : vector<128x128xf32> to vector<128x128xbf16>
    %89 = arith.truncf %70 : vector<128x128xf32> to vector<128x128xbf16>
    %c127_i32_32 = arith.constant 127 : i32
    %90 = tpu.dynamic_rotate %70 by %c127_i32_32 dim 0 : vector<128x128xf32>, i32 -> vector<128x128xf32>
    %cst_33 = arith.constant 0.000000e+00 : f32
    %91 = vector.broadcast %cst_33 : f32 to vector<128x128xf32>
    %92 = arith.select %23, %90, %91 : vector<128x128xi1>, vector<128x128xf32>
    %93 = arith.truncf %92 : vector<128x128xf32> to vector<128x128xbf16>
    %c121_i32_34 = arith.constant 121 : i32
    %94 = tpu.dynamic_rotate %70 by %c121_i32_34 dim 0 : vector<128x128xf32>, i32 -> vector<128x128xf32>
    %95 = arith.andi %19, %21 : vector<128x128xi1>
    %cst_35 = arith.constant 0.000000e+00 : f32
    %96 = vector.broadcast %cst_35 : f32 to vector<128x128xf32>
    %97 = arith.select %95, %94, %96 : vector<128x128xi1>, vector<128x128xf32>
    %98 = arith.truncf %97 : vector<128x128xf32> to vector<128x128xbf16>
    %c120_i32_36 = arith.constant 120 : i32
    %99 = tpu.dynamic_rotate %70 by %c120_i32_36 dim 0 : vector<128x128xf32>, i32 -> vector<128x128xf32>
    %cst_37 = arith.constant 0.000000e+00 : f32
    %100 = vector.broadcast %cst_37 : f32 to vector<128x128xf32>
    %101 = arith.select %19, %99, %100 : vector<128x128xi1>, vector<128x128xf32>
    %102 = arith.truncf %101 : vector<128x128xf32> to vector<128x128xbf16>
    %c119_i32_38 = arith.constant 119 : i32
    %103 = tpu.dynamic_rotate %70 by %c119_i32_38 dim 0 : vector<128x128xf32>, i32 -> vector<128x128xf32>
    %104 = arith.andi %19, %23 : vector<128x128xi1>
    %cst_39 = arith.constant 0.000000e+00 : f32
    %105 = vector.broadcast %cst_39 : f32 to vector<128x128xf32>
    %106 = arith.select %104, %103, %105 : vector<128x128xi1>, vector<128x128xf32>
    %107 = arith.truncf %106 : vector<128x128xf32> to vector<128x128xbf16>
    %108 = tpu.concatenate %75, %79, %84, %88, %89, %93, %98, %102, %107 in 1 : vector<128x128xbf16>, vector<128x128xbf16>, vector<128x128xbf16>, vector<128x128xbf16>, vector<128x128xbf16>, vector<128x128xbf16>, vector<128x128xbf16>, vector<128x128xbf16>, vector<128x128xbf16> -> vector<128x1152xbf16>
    %c0_40 = arith.constant 0 : index
    %c0_41 = arith.constant 0 : index
    %109 = vector.load %arg6[%c0_40, %c0_41] : memref<1152x128xbf16, #tpu.memory_space<vmem>>, vector<1152x128xbf16>
    %cst_42 = arith.constant dense<0.000000e+00> : vector<128x128xf32>
    %110 = tpu.matmul %108, %109, %cst_42 {dimension_numbers = #tpu.dot_dimension_numbers<[1], [0], [0], [1], [0, 0, 1, 1], [], []>} : vector<128x1152xbf16>, vector<1152x128xbf16>, vector<128x128xf32> -> vector<128x128xf32>
    %c0_43 = arith.constant 0 : index
    %c0_44 = arith.constant 0 : index
    %111 = vector.load %arg7[%c0_43, %c0_44] : memref<1x128xf32, #tpu.memory_space<vmem>>, vector<1x128xf32>
    %112 = vector.broadcast %111 : vector<1x128xf32> to vector<128x128xf32>
    %113 = arith.addf %110, %112 : vector<128x128xf32>
    %cst_45 = arith.constant 0.000000e+00 : f32
    %114 = vector.broadcast %cst_45 : f32 to vector<128x128xf32>
    %115 = arith.maximumf %113, %114 : vector<128x128xf32>
    %c9_i32_46 = arith.constant 9 : i32
    %116 = tpu.dynamic_rotate %115 by %c9_i32_46 dim 0 : vector<128x128xf32>, i32 -> vector<128x128xf32>
    %117 = arith.andi %17, %21 : vector<128x128xi1>
    %cst_47 = arith.constant 0.000000e+00 : f32
    %118 = vector.broadcast %cst_47 : f32 to vector<128x128xf32>
    %119 = arith.select %117, %116, %118 : vector<128x128xi1>, vector<128x128xf32>
    %120 = arith.truncf %119 : vector<128x128xf32> to vector<128x128xbf16>
    %c8_i32_48 = arith.constant 8 : i32
    %121 = tpu.dynamic_rotate %115 by %c8_i32_48 dim 0 : vector<128x128xf32>, i32 -> vector<128x128xf32>
    %cst_49 = arith.constant 0.000000e+00 : f32
    %122 = vector.broadcast %cst_49 : f32 to vector<128x128xf32>
    %123 = arith.select %17, %121, %122 : vector<128x128xi1>, vector<128x128xf32>
    %124 = arith.truncf %123 : vector<128x128xf32> to vector<128x128xbf16>
    %c7_i32_50 = arith.constant 7 : i32
    %125 = tpu.dynamic_rotate %115 by %c7_i32_50 dim 0 : vector<128x128xf32>, i32 -> vector<128x128xf32>
    %126 = arith.andi %17, %23 : vector<128x128xi1>
    %cst_51 = arith.constant 0.000000e+00 : f32
    %127 = vector.broadcast %cst_51 : f32 to vector<128x128xf32>
    %128 = arith.select %126, %125, %127 : vector<128x128xi1>, vector<128x128xf32>
    %129 = arith.truncf %128 : vector<128x128xf32> to vector<128x128xbf16>
    %c1_i32_52 = arith.constant 1 : i32
    %130 = tpu.dynamic_rotate %115 by %c1_i32_52 dim 0 : vector<128x128xf32>, i32 -> vector<128x128xf32>
    %cst_53 = arith.constant 0.000000e+00 : f32
    %131 = vector.broadcast %cst_53 : f32 to vector<128x128xf32>
    %132 = arith.select %21, %130, %131 : vector<128x128xi1>, vector<128x128xf32>
    %133 = arith.truncf %132 : vector<128x128xf32> to vector<128x128xbf16>
    %134 = arith.truncf %115 : vector<128x128xf32> to vector<128x128xbf16>
    %c127_i32_54 = arith.constant 127 : i32
    %135 = tpu.dynamic_rotate %115 by %c127_i32_54 dim 0 : vector<128x128xf32>, i32 -> vector<128x128xf32>
    %cst_55 = arith.constant 0.000000e+00 : f32
    %136 = vector.broadcast %cst_55 : f32 to vector<128x128xf32>
    %137 = arith.select %23, %135, %136 : vector<128x128xi1>, vector<128x128xf32>
    %138 = arith.truncf %137 : vector<128x128xf32> to vector<128x128xbf16>
    %c121_i32_56 = arith.constant 121 : i32
    %139 = tpu.dynamic_rotate %115 by %c121_i32_56 dim 0 : vector<128x128xf32>, i32 -> vector<128x128xf32>
    %140 = arith.andi %19, %21 : vector<128x128xi1>
    %cst_57 = arith.constant 0.000000e+00 : f32
    %141 = vector.broadcast %cst_57 : f32 to vector<128x128xf32>
    %142 = arith.select %140, %139, %141 : vector<128x128xi1>, vector<128x128xf32>
    %143 = arith.truncf %142 : vector<128x128xf32> to vector<128x128xbf16>
    %c120_i32_58 = arith.constant 120 : i32
    %144 = tpu.dynamic_rotate %115 by %c120_i32_58 dim 0 : vector<128x128xf32>, i32 -> vector<128x128xf32>
    %cst_59 = arith.constant 0.000000e+00 : f32
    %145 = vector.broadcast %cst_59 : f32 to vector<128x128xf32>
    %146 = arith.select %19, %144, %145 : vector<128x128xi1>, vector<128x128xf32>
    %147 = arith.truncf %146 : vector<128x128xf32> to vector<128x128xbf16>
    %c119_i32_60 = arith.constant 119 : i32
    %148 = tpu.dynamic_rotate %115 by %c119_i32_60 dim 0 : vector<128x128xf32>, i32 -> vector<128x128xf32>
    %149 = arith.andi %19, %23 : vector<128x128xi1>
    %cst_61 = arith.constant 0.000000e+00 : f32
    %150 = vector.broadcast %cst_61 : f32 to vector<128x128xf32>
    %151 = arith.select %149, %148, %150 : vector<128x128xi1>, vector<128x128xf32>
    %152 = arith.truncf %151 : vector<128x128xf32> to vector<128x128xbf16>
    %153 = tpu.concatenate %120, %124, %129, %133, %134, %138, %143, %147, %152 in 1 : vector<128x128xbf16>, vector<128x128xbf16>, vector<128x128xbf16>, vector<128x128xbf16>, vector<128x128xbf16>, vector<128x128xbf16>, vector<128x128xbf16>, vector<128x128xbf16>, vector<128x128xbf16> -> vector<128x1152xbf16>
    %c0_62 = arith.constant 0 : index
    %c0_63 = arith.constant 0 : index
    %154 = vector.load %arg8[%c0_62, %c0_63] : memref<1152x128xbf16, #tpu.memory_space<vmem>>, vector<1152x128xbf16>
    %cst_64 = arith.constant dense<0.000000e+00> : vector<128x128xf32>
    %155 = tpu.matmul %153, %154, %cst_64 {dimension_numbers = #tpu.dot_dimension_numbers<[1], [0], [0], [1], [0, 0, 1, 1], [], []>} : vector<128x1152xbf16>, vector<1152x128xbf16>, vector<128x128xf32> -> vector<128x128xf32>
    %c0_65 = arith.constant 0 : index
    %c0_66 = arith.constant 0 : index
    %156 = vector.load %arg9[%c0_65, %c0_66] : memref<1x128xf32, #tpu.memory_space<vmem>>, vector<1x128xf32>
    %157 = vector.broadcast %156 : vector<1x128xf32> to vector<128x128xf32>
    %158 = arith.addf %155, %157 : vector<128x128xf32>
    %cst_67 = arith.constant 0.000000e+00 : f32
    %159 = vector.broadcast %cst_67 : f32 to vector<128x128xf32>
    %160 = arith.maximumf %158, %159 : vector<128x128xf32>
    %161 = vector.extract_strided_slice %10 {offsets = [0, 0], sizes = [128, 128], strides = [1, 1]} : vector<128x384xf32> to vector<128x128xf32>
    %162 = tpu.concatenate %161, %69, %160 in 1 : vector<128x128xf32>, vector<128x128xf32>, vector<128x128xf32> -> vector<128x384xf32>
    %163 = arith.truncf %162 : vector<128x384xf32> to vector<128x384xbf16>
    %c0_68 = arith.constant 0 : index
    %c0_69 = arith.constant 0 : index
    %164 = vector.load %arg10[%c0_68, %c0_69] : memref<384x384xbf16, #tpu.memory_space<vmem>>, vector<384x384xbf16>
    %cst_70 = arith.constant dense<0.000000e+00> : vector<128x384xf32>
    %165 = tpu.matmul %163, %164, %cst_70 {dimension_numbers = #tpu.dot_dimension_numbers<[1], [0], [0], [1], [0, 0, 1, 1], [], []>} : vector<128x384xbf16>, vector<384x384xbf16>, vector<128x384xf32> -> vector<128x384xf32>
    %c0_71 = arith.constant 0 : index
    %c0_72 = arith.constant 0 : index
    %166 = vector.load %arg11[%c0_71, %c0_72] : memref<1x384xf32, #tpu.memory_space<vmem>>, vector<1x384xf32>
    %167 = vector.broadcast %166 : vector<1x384xf32> to vector<128x384xf32>
    %168 = arith.addf %165, %167 : vector<128x384xf32>
    %cst_73 = arith.constant 0.000000e+00 : f32
    %169 = vector.broadcast %cst_73 : f32 to vector<128x384xf32>
    %170 = arith.maximumf %168, %169 : vector<128x384xf32>
    %171 = arith.addf %170, %0 : vector<128x384xf32>
    %cst_74 = arith.constant 0.000000e+00 : f32
    %172 = vector.broadcast %cst_74 : f32 to vector<128x384xf32>
    %173 = arith.maximumf %171, %172 : vector<128x384xf32>
    %c0_75 = arith.constant 0 : index
    %c0_76 = arith.constant 0 : index
    %174 = vector.load %arg12[%c0_75, %c0_76] : memref<128x384xf32, #tpu.memory_space<vmem>>, vector<128x384xf32>
    tpu.vector_store %arg12[%c0_75, %c0_76], %173 {strides = array<i32>} : memref<128x384xf32, #tpu.memory_space<vmem>>, vector<128x384xf32>,
    return
  }
  func.func @transform_0(%arg0: i32) -> (i32, i32) {
    %c0_i32 = arith.constant 0 : i32
    %c0_i32_0 = arith.constant 0 : i32
    return %arg0, %c0_i32 : i32, i32
  }
  func.func @transform_1(%arg0: i32) -> (i32, i32) {
    %c0_i32 = arith.constant 0 : i32
    %c0_i32_0 = arith.constant 0 : i32
    %c0_i32_1 = arith.constant 0 : i32
    return %c0_i32, %c0_i32_0 : i32, i32
  }
  func.func @transform_2(%arg0: i32) -> (i32, i32) {
    %c0_i32 = arith.constant 0 : i32
    %c0_i32_0 = arith.constant 0 : i32
    %c0_i32_1 = arith.constant 0 : i32
    return %c0_i32, %c0_i32_0 : i32, i32
  }
  func.func @transform_3(%arg0: i32) -> (i32, i32) {
    %c0_i32 = arith.constant 0 : i32
    %c0_i32_0 = arith.constant 0 : i32
    %c0_i32_1 = arith.constant 0 : i32
    return %c0_i32, %c0_i32_0 : i32, i32
  }
  func.func @transform_4(%arg0: i32) -> (i32, i32) {
    %c0_i32 = arith.constant 0 : i32
    %c0_i32_0 = arith.constant 0 : i32
    %c0_i32_1 = arith.constant 0 : i32
    return %c0_i32, %c0_i32_0 : i32, i32
  }
  func.func @transform_5(%arg0: i32) -> (i32, i32) {
    %c0_i32 = arith.constant 0 : i32
    %c0_i32_0 = arith.constant 0 : i32
    %c0_i32_1 = arith.constant 0 : i32
    return %c0_i32, %c0_i32_0 : i32, i32
  }
  func.func @transform_6(%arg0: i32) -> (i32, i32) {
    %c0_i32 = arith.constant 0 : i32
    %c0_i32_0 = arith.constant 0 : i32
    %c0_i32_1 = arith.constant 0 : i32
    return %c0_i32, %c0_i32_0 : i32, i32
  }
  func.func @transform_7(%arg0: i32) -> (i32, i32) {
    %c0_i32 = arith.constant 0 : i32
    %c0_i32_0 = arith.constant 0 : i32
    %c0_i32_1 = arith.constant 0 : i32
    return %c0_i32, %c0_i32_0 : i32, i32
  }
  func.func @transform_8(%arg0: i32) -> (i32, i32) {
    %c0_i32 = arith.constant 0 : i32
    %c0_i32_0 = arith.constant 0 : i32
    %c0_i32_1 = arith.constant 0 : i32
    return %c0_i32, %c0_i32_0 : i32, i32
  }
  func.func @transform_9(%arg0: i32) -> (i32, i32) {
    %c0_i32 = arith.constant 0 : i32
    %c0_i32_0 = arith.constant 0 : i32
    %c0_i32_1 = arith.constant 0 : i32
    return %c0_i32, %c0_i32_0 : i32, i32
  }
  func.func @transform_10(%arg0: i32) -> (i32, i32) {
    %c0_i32 = arith.constant 0 : i32
    %c0_i32_0 = arith.constant 0 : i32
    %c0_i32_1 = arith.constant 0 : i32
    return %c0_i32, %c0_i32_0 : i32, i32
  }
  func.func @transform_11(%arg0: i32) -> (i32, i32) {
    %c0_i32 = arith.constant 0 : i32
    %c0_i32_0 = arith.constant 0 : i32
    return %arg0, %c0_i32 : i32, i32
  }
}

</mosaic_0001>

<bundles_post_ra>
// kernel: inception_block_a.1
= control target key start
LH: loop header
LB: loop body
LE: loop exit
PB: predicated region body
PF: predicated region fallthrough
CT: control target
= control target key end

     0   :  { %16 = vsyncpa [#allocation3], 0  ;;  %s13915_s0 = inlined_call_operand.vmem [shape: f32[256,384], index: 0, kind: input, shape index: {}]   ;;  %s13916_s1 = inlined_call_operand.vmem [shape: bf16[384,384], index: 1, kind: input, shape index: {}]   ;;  %s13917_s2 = inlined_call_operand.vmem [shape: f32[1,384], index: 2, kind: input, shape index: {}]   ;;  %s13918_s3 = inlined_call_operand.vmem [shape: bf16[1152,128], index: 3, kind: input, shape index: {}]   ;;  %s13919_s4 = inlined_call_operand.vmem [shape: f32[1,128], index: 4, kind: input, shape index: {}]   ;;  %s13920_s5 = inlined_call_operand.vmem [shape: bf16[1152,128], index: 5, kind: input, shape index: {}]   ;;  %s13921_s6 = inlined_call_operand.vmem [shape: f32[1,128], index: 6, kind: input, shape index: {}]   ;;  %s13922_s7 = inlined_call_operand.vmem [shape: bf16[1152,128], index: 7, kind: input, shape index: {}]   ;;  %s13923_s8 = inlined_call_operand.vmem [shape: f32[1,128], index: 8, kind: input, shape index: {}]   ;;  %s13924_s9 = inlined_call_operand.vmem [shape: bf16[384,384], index: 9, kind: input, shape index: {}]   ;;  %s13925_s10 = inlined_call_operand.vmem [shape: f32[1,384], index: 10, kind: input, shape index: {}]   ;;  %s13926_s11 = inlined_call_operand.hbm [shape: f32[256,384], index: 11, kind: output, shape index: {}]  }
   0x1   :  { %18 = vsyncpa [#allocation3 + $0x1], 0  ;;  %s9613_s17 = smov 0   ;;  %s9615_s18 = smov 0  }
   0x2   :  { %s9617_s19 = smov 0   ;;  %s9619_s20 = smov 0  }
   0x3 LB: > { %14185 = sst [smem:[#allocation5_spill]] %s9541_s19  ;;  %s9634_s21 = sadd.s32 4294967295, %s9545_s20   ;;  %s9545_s20 = sphi %s9619_s20, %s14820_s20   ;;  %s9541_s19 = sphi %s9617_s19, %s14819_s19   ;;  %s9537_s18 = sphi %s9615_s18, %s14818_s18   ;;  %s9533_s17 = sphi %s9613_s17, %s14817_s17  }
   0x4   : > { %s6910_s22 = sadd.s32 4294967294, %s9545_s20   ;;  %s9638_s23 = sadd.s32 1, %s9545_s20  }
   0x5   : > { %s267_s24 = sadd.s32 1, %s9541_s19  ;;  %s264_s25 = ssub.s32 %s9545_s20, %s9638_s23 }
   0x6   : > { %p277_p0 = scmp.ne.s32.totalorder %s9541_s19, %s9537_s18  ;;  %p265_p1 = scmp.eq.s32.totalorder %s264_s25, 0 }
   0x7   : > { %p278_p2 = scmp.eq.s32.totalorder %s9634_s21, 1  ;;  %p283_p3 = scmp.ne.s32.totalorder %s9537_s18, %s9533_s17 }
   0x8   : > { %p284_p4 = scmp.eq.s32.totalorder %s6910_s22, 1  ;;  %p6913_p7 = scmp.ge.s32.totalorder %s9545_s20, 1 }
   0x9   : > { %s9649_s26 = scalar_select %p265_p1, %s9541_s19, %s267_s24  }
   0xa   : > { %p9651_p5 = por %p278_p2, %p277_p0  ;;  %p9655_p6 = por %p284_p4, %p283_p3 }
   0xb   : > { %14186 = sst [smem:[#allocation6_spill]] %s9649_s26  ;;  %p342_p8 = scmp.lt.s32.totalorder %s9545_s20, 3 }
   0xd   : > { %p343_p9 = pnand %p6913_p7, %p342_p8 }
   0xf   : > { %346 = sbr.rel (%p343_p9) target bundleno = 1620 (0x654), region = 64 }
  0x16   : > { %v9027_v0 = vld [vmem:[%s13916_s1 + $0x4] ss:$12 sps:$4 sm:$0xff]   ;;  %v9029_v1 = vld [vmem:[%s13916_s1] ss:$12 sps:$4 sm:$0xff]   ;;  %v9030_v2 = vld [vmem:[%s13916_s1 + $0x1c] ss:$12 sps:$4 sm:$0xff]  }
  0x17   : > { %1009 = vmatprep.subr.bf16.mxu0 %v9027_v0  ;;  %v9032_v3 = vld [vmem:[%s13916_s1 + $0x18] ss:$12 sps:$4 sm:$0xff]   ;;  %s6914_s24 = sshll.u32 %s9634_s21, 4  ;;  %v9033_v4 = vld [vmem:[%s13916_s1 + $0x34] ss:$12 sps:$4 sm:$0xff]   ;;  %vm14021_vm9 = vmmov 1  }
  0x18   : > { %1010 = vmatpush1.bf16.msra.mxu0 %v9029_v1  ;;  %p384_p10 = scmp.lt.s32.totalorder %s6914_s24, 31  ;;  %v9035_v5 = vld [vmem:[%s13916_s1 + $0x30] ss:$12 sps:$4 sm:$0xff]   ;;  %v9036_v6 = vld [vmem:[%s13916_s1 + $0x4c] ss:$12 sps:$4 sm:$0xff]   ;;  %s380_s19 = sand.u32 1, %s9537_s18  }
  0x19   : > { %1011 = vmatprep.subr.bf16.mxu0 %v9030_v2  ;;  %v9038_v7 = vld [vmem:[%s13916_s1 + $0x48] ss:$12 sps:$4 sm:$0xff]   ;;  %v9039_v8 = vld [vmem:[%s13916_s1 + $0x64] ss:$12 sps:$4 sm:$0xff]   ;;  %v9041_v9 = vld [vmem:[%s13916_s1 + $0x60] ss:$12 sps:$4 sm:$0xff]  }
  0x1a   : > { %s14822_s24 = smov (!%p384_p10, %s6914_s24), 31  ;;  %v9042_v10 = vld [vmem:[%s13916_s1 + $0x7c] ss:$12 sps:$4 sm:$0xff]   ;;  %v9044_v11 = vld [vmem:[%s13916_s1 + $0x78] ss:$12 sps:$4 sm:$0xff]   ;;  %s13713_s26 = smul.u32 384, %s380_s19 }
  0x1b   : > { %s8981_s29 = smul.u32 24, %s14822_s24  ;;  %v9045_v12 = vld [vmem:[%s13916_s1 + $0x94] ss:$12 sps:$4 sm:$0xff]   ;;  %v9047_v17 = vld [vmem:[%s13916_s1 + $0x90] ss:$12 sps:$4 sm:$0xff]   ;;  %s13874_s16 = scalar_lea.sflag [#allocation3], %s380_s19 }
  0x1c   : > { %1012 = vmatpush1.bf16.msra.mxu0 %v9032_v3  ;;  %v9048_v18 = vld [vmem:[%s13916_s1 + $0xac] ss:$12 sps:$4 sm:$0xff]   ;;  %v9050_v20 = vld [vmem:[%s13916_s1 + $0xa8] ss:$12 sps:$4 sm:$0xff]   ;;  %v9051_v21 = vld [vmem:[%s13916_s1 + $0xc4] ss:$12 sps:$4 sm:$0xff]  }
  0x1d   : > { %1013 = vmatprep.subr.bf16.mxu0 %v9033_v4  ;;  %s9698_s15 = scalar_lea.vmem %s13915_s0, %s8981_s29  ;;  %v9053_v22 = vld [vmem:[%s13916_s1 + $0xc0] ss:$12 sps:$4 sm:$0xff]   ;;  %v9054_v23 = vld [vmem:[%s13916_s1 + $0xdc] ss:$12 sps:$4 sm:$0xff]   ;;  %v9056_v24 = vld [vmem:[%s13916_s1 + $0xd8] ss:$12 sps:$4 sm:$0xff]  }
  0x1e   : > { %v393_v13 = vld [vmem:[%s9698_s15 + $0x8] sm:$0xff]  ;;  %v396_v14 = vld [vmem:[%s9698_s15 + $0x20] sm:$0xff]  ;;  %v9736_v27 = vld [vmem:[%s9698_s15 + $0x18] sm:$0xff]  ;;  %s13732_s29 = scalar_lea.vmem [#allocation2], %s13713_s26  ;;  %s8982_s30 = smul.u32 6144, %s9634_s21 }
  0x1f   : > { %v441_v15 = vmax.f32 %v393_v13, 0.0  ;;  %v444_v16 = vmax.f32 %v396_v14, 0.0  ;;  %v9730_v25 = vld [vmem:[%s9698_s15] sm:$0xff]  ;;  %v9739_v28 = vld [vmem:[%s9698_s15 + $0x38] sm:$0xff]  ;;  %v9742_v29 = vld [vmem:[%s9698_s15 + $0x50] sm:$0xff]  ;;  %v443_v44 = vmax.f32 %v9736_v27, 0.0 }
  0x20   : > { %1014 = vmatpush1.bf16.msra.mxu0 %v9035_v5  ;;  %v9057_v26 = vld [vmem:[%s13916_s1 + $0xf4] ss:$12 sps:$4 sm:$0xff]   ;;  %v9748_v31 = vld [vmem:[%s9698_s15 + $0x48] sm:$0xff]  ;;  %v9760_v35 = vld [vmem:[%s9698_s15 + $0x78] sm:$0xff]  ;;  %v440_v41 = vmax.f32 %v9730_v25, 0.0  ;;  %v447_v45 = vmax.f32 %v9739_v28, 0.0  ;;  %s13865_s21 = scalar_lea.hbm %s13926_s11, %s8982_s30 }
  0x21   : > { %1015 = vmatprep.subr.bf16.mxu0 %v9036_v6  ;;  %v489_v19 = vpack.c.bf16 %v444_v16, %v441_v15  ;;  %v9745_v30 = vld [vmem:[%s9698_s15 + $0x30] sm:$0xff]  ;;  %v9751_v32 = vld [vmem:[%s9698_s15 + $0x68] sm:$0xff]  ;;  %v9754_v33 = vld [vmem:[%s9698_s15 + $0x80] sm:$0xff]  ;;  %v450_v46 = vmax.f32 %v9742_v29, 0.0  ;;  %v449_v50 = vmax.f32 %v9748_v31, 0.0  ;;  %v455_v58 = vmax.f32 %v9760_v35, 0.0 }
  0x22   : > { %v9757_v34 = vld [vmem:[%s9698_s15 + $0x60] sm:$0xff]  ;;  %v9059_v36 = vld [vmem:[%s13916_s1 + $0xf0] ss:$12 sps:$4 sm:$0xff]   ;;  %v9060_v40 = vld [vmem:[%s13916_s1 + $0x10c] ss:$12 sps:$4 sm:$0xff]   ;;  %v446_v49 = vmax.f32 %v9745_v30, 0.0 }
  0x23   : > { %1041 = vmatprep.mubr.bf16.mxu0 %v489_v19  ;;  %1267 = vmatprep.mubr.bf16.mxu1 %v489_v19  ;;  %v9766_v37 = vld [vmem:[%s9698_s15 + $0x98] sm:$0xff]  ;;  %v9769_v38 = vld [vmem:[%s9698_s15 + $0xb0] sm:$0xff]  ;;  %v9779_v42 = vld [vmem:[%s9698_s15 + $0xa8] sm:$0xff]  ;;  %v453_v51 = vmax.f32 %v9751_v32, 0.0  ;;  %v456_v56 = vmax.f32 %v9754_v33, 0.0  ;;  %v452_v57 = vmax.f32 %v9757_v34, 0.0 }
  0x24   : > { %1016 = vmatpush1.bf16.msra.mxu0 %v9038_v7  ;;  %v9772_v39 = vld [vmem:[%s9698_s15 + $0x90] sm:$0xff]  ;;  %v9782_v43 = vld [vmem:[%s9698_s15 + $0xc8] sm:$0xff]  ;;  %v9788_v47 = vld [vmem:[%s9698_s15 + $0xe0] sm:$0xff]  ;;  %v459_v61 = vmax.f32 %v9766_v37, 0.0  ;;  %v462_v62 = vmax.f32 %v9769_v38, 0.0  ;;  %v491_v0 = vpack.c.bf16 %v449_v50, %v446_v49  ;;  %s6848_s12 = sshll.u32 %s13732_s29, 4  ;;  %s13868_s12 = int_to_ptr.vmem [resolvable:$true] %s6848_s12 }
  0x25   : > { %1017 = vmatprep.subr.bf16.mxu0 %v9039_v8  ;;  %v9791_v48 = vld [vmem:[%s9698_s15 + $0xc0] sm:$0xff]  ;;  %v9797_v52 = vld [vmem:[%s9698_s15 + $0xd8] sm:$0xff]  ;;  %v9803_v54 = vld [vmem:[%s9698_s15 + $0x110] sm:$0xff]  ;;  %v458_v63 = vmax.f32 %v9772_v39, 0.0  ;;  %s9550_s24 = smov [#allocation2]  }
  0x26   : > { %v9800_v53 = vld [vmem:[%s9698_s15 + $0xf8] sm:$0xff]  ;;  %v9062_v55 = vld [vmem:[%s13916_s1 + $0x108] ss:$12 sps:$4 sm:$0xff]   ;;  %v9063_v60 = vld [vmem:[%s13916_s1 + $0x124] ss:$12 sps:$4 sm:$0xff]   ;;  %s9487_s22 = sshll.u32 %s9550_s24, 4  ;;  %s9488_s22 = int_to_ptr.vmem [resolvable:$false] %s9487_s22 }
  0x27   : > { %v9812_v59 = vld [vmem:[%s9698_s15 + $0xf0] sm:$0xff]  ;;  %v9826_v5 = vld [vmem:[%s9698_s15 + $0x108] sm:$0xff]  ;;  %v9845_v14 = vld [vmem:[%s9698_s15 + $0x140] sm:$0xff]  ;;  %s9489_s25 = scalar_lea.vmem %s9488_s22, 12288  ;;  %p9490_p0 = scmp.lt.s32.totalorder %s13868_s12, %s9488_s22 }
  0x28   : > { %1018 = vmatpush1.bf16.msra.mxu0 %v9041_v9  ;;  %v9832_v9 = vld [vmem:[%s9698_s15 + $0x128] sm:$0xff]  ;;  %v9848_v15 = vld [vmem:[%s9698_s15 + $0x120] sm:$0xff]  ;;  %v9928_v8 = vld [vmem:[%s9698_s15 + $0x70] sm:$0xff] }
  0x29   : > { %1019 = vmatprep.subr.bf16.mxu0 %v9042_v10  ;;  %v9065_v10 = vld [vmem:[%s13916_s1 + $0x120] ss:$12 sps:$4 sm:$0xff]   ;;  %v9100_v16 = vld [vmem:[%s13916_s1 + $0x8] ss:$12 sps:$4 sm:$0xff]   ;;  %v9958_v4 = vld [vmem:[%s9698_s15 + $0xb8] sm:$0xff] }
  0x2a   : > { %v9101_v19 = vld [vmem:[%s13916_s1 + $0xe0] ss:$12 sps:$4 sm:$0xff]   ;;  %v9113_v27 = vld [vmem:[%s13916_s1 + $0x170] ss:$12 sps:$4 sm:$0xff]   ;;  %v9084_v50 = vld [vmem:[%s13916_s1 + $0x1c8] ss:$12 sps:$4 sm:$0xff]  }
  0x2b   : > { %v9915_v13 = vld [vmem:[%s9698_s15 + $0x40] sm:$0xff]  ;;  %v9932_v7 = vld [vmem:[%s9698_s15 + $0x88] sm:$0xff]  ;;  %v9081_v1 = vld [vmem:[%s13916_s1 + $0x1b0] ss:$12 sps:$4 sm:$0xff]  }
  0x2c   : > { %1020 = vmatpush1.bf16.msra.mxu0 %v9044_v11  ;;  %v9099_v11 = vld [vmem:[%s13916_s1 + $0xc8] ss:$12 sps:$4 sm:$0xff]   ;;  %v9936_v6 = vld [vmem:[%s9698_s15 + $0xa0] sm:$0xff]  ;;  %v9118_v38 = vld [vmem:[%s13916_s1 + $0x1d0] ss:$12 sps:$4 sm:$0xff]  }
  0x2d   : > { %1021 = vmatprep.subr.bf16.mxu0 %v9045_v12  ;;  %v9066_v12 = vld [vmem:[%s13916_s1 + $0x13c] ss:$12 sps:$4 sm:$0xff]   ;;  %7716 = vmatprep.subr.bf16.mxu1 %v9099_v11  ;;  %v9110_v29 = vld [vmem:[%s13916_s1 + $0x80] ss:$12 sps:$4 sm:$0xff]   ;;  %v9089_v33 = vld [vmem:[%s13916_s1 + $0x1e4] ss:$12 sps:$4 sm:$0xff]  }
  0x2e   : > { %7717 = vmatpush3.bf16.msra.mxu1 %v9100_v16  ;;  %v9071_v11 = vld [vmem:[%s13916_s1 + $0x150] ss:$12 sps:$4 sm:$0xff]   ;;  %v9891_v16 = vld [vmem:[%s9698_s15 + $0x168] sm:$0xff]  ;;  %v10010_v2 = vld [vmem:[%s9698_s15 + $0x160] sm:$0xff] }
  0x2f   : > { %7718 = vmatprep.subr.bf16.mxu1 %v9101_v19  ;;  %v9072_v19 = vld [vmem:[%s13916_s1 + $0x16c] ss:$12 sps:$4 sm:$0xff]   ;;  %v484_v31 = vmax.f32 %v10010_v2, 0.0  ;;  %v9115_v32 = vld [vmem:[%s13916_s1 + $0x188] ss:$12 sps:$4 sm:$0xff]   ;;  %v9125_v2 = vld [vmem:[%s13918_s3 + $0xc0] sm:$0xff]  }
  0x30   : > { %1022 = vmatpush1.bf16.msra.mxu0 %v9047_v17  ;;  %v9971_v3 = vld [vmem:[%s9698_s15 + $0xe8] sm:$0xff]  ;;  %v9974_v17 = vld [vmem:[%s9698_s15 + $0x100] sm:$0xff] }
  0x31   : > { %1023 = vmatprep.subr.bf16.mxu0 %v9048_v18  ;;  %v9855_v18 = vld [vmem:[%s9698_s15 + $0x138] sm:$0xff]  ;;  %v10006_v25 = vld [vmem:[%s9698_s15 + $0x148] sm:$0xff]  ;;  %v472_v28 = vmax.f32 %v9974_v17, 0.0  ;;  %v9095_v37 = vld [vmem:[%s13916_s1 + $0x214] ss:$12 sps:$4 sm:$0xff]  }
  0x32   : > { %v481_v30 = vmax.f32 %v10006_v25, 0.0  ;;  %v9117_v34 = vld [vmem:[%s13916_s1 + $0x1b8] ss:$12 sps:$4 sm:$0xff]   ;;  %v9119_v39 = vld [vmem:[%s13916_s1 + $0x1e8] ss:$12 sps:$4 sm:$0xff]  }
  0x33   : > { %v9090_v35 = vld [vmem:[%s13916_s1 + $0x1f8] ss:$12 sps:$4 sm:$0xff]  }
  0x34   : > { %1024 = vmatpush1.bf16.msra.mxu0 %v9050_v20  ;;  %v9068_v20 = vld [vmem:[%s13916_s1 + $0x138] ss:$12 sps:$4 sm:$0xff]  }
  0x35   : > { %1025 = vmatprep.subr.bf16.mxu0 %v9051_v21  ;;  %v9102_v21 = vld [vmem:[%s13916_s1 + $0x20] ss:$12 sps:$4 sm:$0xff]  }
  0x36   : > { %7719 = vmatpush3.bf16.msra.mxu1 %v9102_v21  ;;  %v9074_v21 = vld [vmem:[%s13916_s1 + $0x168] ss:$12 sps:$4 sm:$0xff]   ;;  %v9124_v17 = vld [vmem:[%s13918_s3] sm:$0xff]  }
  0x37   : > { %v9126_v25 = vld [vmem:[%s13918_s3 + $0x80] sm:$0xff]  }
  0x38   : > { %1026 = vmatpush1.bf16.msra.mxu0 %v9053_v22  ;;  %v9069_v22 = vld [vmem:[%s13916_s1 + $0x154] ss:$12 sps:$4 sm:$0xff]  }
  0x39   : > { %1027 = vmatprep.subr.bf16.mxu0 %v9054_v23  ;;  %v9103_v23 = vld [vmem:[%s13916_s1 + $0xf8] ss:$12 sps:$4 sm:$0xff]  }
  0x3a   : > { %7720 = vmatprep.subr.bf16.mxu1 %v9103_v23  ;;  %v9106_v23 = vld [vmem:[%s13916_s1 + $0x50] ss:$12 sps:$4 sm:$0xff]  }
  0x3c   : > { %1028 = vmatpush1.bf16.msra.mxu0 %v9056_v24  ;;  %v9905_v24 = vld [vmem:[%s9698_s15 + $0x28] sm:$0xff] }
  0x3d   : > { %1029 = vmatprep.subr.bf16.mxu0 %v9057_v26  ;;  %v9925_v26 = vld [vmem:[%s9698_s15 + $0x58] sm:$0xff] }
  0x40   : > { %1030 = vmatpush1.bf16.msra.mxu0 %v9059_v36  ;;  %v9875_v36 = vld [vmem:[%s9698_s15 + $0x158] sm:$0xff] }
  0x41   : > { %1031 = vmatprep.subr.bf16.mxu0 %v9060_v40  ;;  %v9878_v40 = vld [vmem:[%s9698_s15 + $0x170] sm:$0xff] }
  0x44   : > { %1032 = vmatpush1.bf16.msra.mxu0 %v9062_v55  ;;  %v9901_v55 = vld [vmem:[%s9698_s15 + $0x10] sm:$0xff] }
  0x45   : > { %1033 = vmatprep.subr.bf16.mxu0 %v9063_v60  ;;  %v9882_v60 = vld [vmem:[%s9698_s15 + $0x150] sm:$0xff] }
  0x48   : > { %1034 = vmatpush1.bf16.msra.mxu0 %v9065_v10  ;;  %v9104_v10 = vld [vmem:[%s13916_s1 + $0x38] ss:$12 sps:$4 sm:$0xff]  }
  0x49   : > { %1035 = vmatprep.subr.bf16.mxu0 %v9066_v12  ;;  %v9105_v12 = vld [vmem:[%s13916_s1 + $0x110] ss:$12 sps:$4 sm:$0xff]   ;;  %7721 = vmatpush3.bf16.msra.mxu1 %v9104_v10  ;;  %v9108_v10 = vld [vmem:[%s13916_s1 + $0x68] ss:$12 sps:$4 sm:$0xff]  }
  0x4a   : > { %7722 = vmatprep.subr.bf16.mxu1 %v9105_v12  ;;  %v9951_v12 = vpack.c.bf16 %v443_v44, %v440_v41  ;;  %v9968_v44 = vld [vmem:[%s9698_s15 + $0xd0] sm:$0xff]  ;;  %v10017_v41 = vld [vmem:[%s9698_s15 + $0x178] sm:$0xff] }
  0x4b   : > { %v487_v49 = vmax.f32 %v10017_v41, 0.0  ;;  %v9127_v41 = vld [vmem:[%s13918_s3 + $0x48] sm:$0xff]  }
  0x4c   : > { %1036 = vmatpush1.bf16.msra.mxu0 %v9068_v20  ;;  %v9107_v20 = vld [vmem:[%s13916_s1 + $0x128] ss:$12 sps:$4 sm:$0xff]  }
  0x4d   : > { %1037 = vmatprep.subr.bf16.mxu0 %v9069_v22  ;;  %v9077_v22 = vld [vmem:[%s13916_s1 + $0x184] ss:$12 sps:$4 sm:$0xff]   ;;  %7723 = vmatpush3.bf16.msra.mxu1 %v9106_v23  ;;  %v9080_v23 = vld [vmem:[%s13916_s1 + $0x19c] ss:$12 sps:$4 sm:$0xff]  }
  0x4e   : > { %7724 = vmatprep.subr.bf16.mxu1 %v9107_v20  ;;  %v492_v20 = vpack.c.bf16 %v450_v46, %v447_v45  ;;  %v9078_v45 = vld [vmem:[%s13916_s1 + $0x198] ss:$12 sps:$4 sm:$0xff]   ;;  %v9999_v46 = vld [vmem:[%s9698_s15 + $0x130] sm:$0xff] }
  0x50   : > { %1038 = vmatpush1.bf16.msra.mxu0 %v9071_v11  ;;  %v9075_v11 = vld [vmem:[%s13916_s1 + $0x180] ss:$12 sps:$4 sm:$0xff]  }
  0x51   : > { %1039 = vmatprep.subr.bf16.mxu0 %v9072_v19  ;;  %v9109_v19 = vld [vmem:[%s13916_s1 + $0x140] ss:$12 sps:$4 sm:$0xff]   ;;  %7725 = vmatpush3.bf16.msra.mxu1 %v9108_v10 }
  0x52   : > { %7726 = vmatprep.subr.bf16.mxu1 %v9109_v19  ;;  %v9083_v10 = vld [vmem:[%s13916_s1 + $0x1b4] ss:$12 sps:$4 sm:$0xff]   ;;  %v9112_v19 = vld [vmem:[%s13916_s1 + $0x98] ss:$12 sps:$4 sm:$0xff]  }
  0x54   : > { %1040 = vmatpush1.bf16.msra.mxu0 %v9074_v21  ;;  %v9111_v21 = vld [vmem:[%s13916_s1 + $0x158] ss:$12 sps:$4 sm:$0xff]  }
  0x55   : > { %1122 = vmatprep.subr.bf16.mxu0 %v9077_v22  ;;  %v9988_v22 = vld [vmem:[%s9698_s15 + $0x118] sm:$0xff]  ;;  %7727 = vmatpush3.bf16.msra.mxu1 %v9110_v29 }
  0x56   : > { %7728 = vmatprep.subr.bf16.mxu1 %v9111_v21  ;;  %v9114_v29 = vld [vmem:[%s13916_s1 + $0xb0] ss:$12 sps:$4 sm:$0xff]   ;;  %v495_v21 = vpack.c.bf16 %v456_v56, %v453_v51  ;;  %v9116_v51 = vld [vmem:[%s13916_s1 + $0x1a0] ss:$12 sps:$4 sm:$0xff]  }
  0x57   : > { %1042 = vmatmul.mubr.bf16.vlgmr.msra.gmra.mrb[0].mxu0 %v9951_v12  ;;  %v9087_v56 = vld [vmem:[%s13916_s1 + $0x1e0] ss:$12 sps:$4 sm:$0xff]  }
  0x58   : > { %1123 = vmatpush1.bf16.msra.mxu0 %v9075_v11  ;;  %1051 = vmatprep.mubr.bf16.mxu0 %v492_v20  ;;  %v478_v11 = vmax.f32 %v9999_v46, 0.0  ;;  %v9130_v46 = vld [vmem:[%s13918_s3 + $0x88] sm:$0xff]  }
  0x59   : > { %1124 = vmatprep.subr.bf16.mxu0 %v9080_v23  ;;  %v9086_v23 = vld [vmem:[%s13916_s1 + $0x1cc] ss:$12 sps:$4 sm:$0xff]   ;;  %7729 = vmatpush3.bf16.msra.mxu1 %v9112_v19  ;;  %v14194_v19 = vmax.f32 %v9800_v53, 0.0  ;;  %v14197_v53 = vmax.f32 %v9826_v5, 0.0  ;;  %v14202_v5 = vmax.f32 %v9875_v36, 0.0  ;;  %v14207_v36 = vmax.f32 %v9905_v24, 0.0 }
  0x5a   : > { %7730 = vmatprep.subr.bf16.mxu1 %v9113_v27  ;;  %v494_v27 = vpack.c.bf16 %v455_v58, %v452_v57  ;;  %v9093_v57 = vld [vmem:[%s13916_s1 + $0x210] ss:$12 sps:$4 sm:$0xff]   ;;  %v14189_v58 = vmax.f32 %v9779_v42, 0.0  ;;  %v9096_v42 = vld [vmem:[%s13916_s1 + $0x228] ss:$12 sps:$4 sm:$0xff]   ;;  %v14211_v24 = vmax.f32 %v9932_v7, 0.0 }
  0x5b   : > { %v14216_v7 = vmax.f32 %v9988_v22, 0.0  ;;  %v9131_v22 = vld [vmem:[%s13918_s3 + $0x50] sm:$0xff]  }
  0x5c   : > { %1125 = vmatpush1.bf16.msra.mxu0 %v9078_v45  ;;  %v498_v45 = vpack.c.bf16 %v462_v62, %v459_v61  ;;  %v497_v61 = vpack.c.bf16 %v14189_v58, %v458_v63  ;;  %v9098_v62 = vld [vmem:[%s13916_s1 + $0x22c] ss:$12 sps:$4 sm:$0xff]   ;;  %v14193_v63 = vmax.f32 %v9797_v52, 0.0  ;;  %v14196_v52 = vmax.f32 %v9812_v59, 0.0 }
  0x5d   : > { %1126 = vmatprep.subr.bf16.mxu0 %v9083_v10  ;;  %7731 = vmatpush3.bf16.msra.mxu1 %v9114_v29  ;;  %v14201_v59 = vmax.f32 %v9855_v18, 0.0  ;;  %v14206_v18 = vmax.f32 %v9901_v55, 0.0  ;;  %v14210_v55 = vmax.f32 %v9928_v8, 0.0  ;;  %v505_v8 = vpack.c.bf16 %v14216_v7, %v472_v28  ;;  %v9129_v28 = vld [vmem:[%s13918_s3 + $0xc8] sm:$0xff]  }
  0x5e   : > { %8692 = vmatprep.subr.bf16.mxu1 %v9115_v32 }
  0x5f   : > { %1052 = vmatmul.mubr.bf16.gmra.mrb[4].mxu0 %v491_v0 }
  0x60   : > { %1061 = vmatprep.mubr.bf16.mxu0 %v495_v21  ;;  %1127 = vmatpush1.bf16.msra.mxu0 %v9081_v1  ;;  %v9092_v1 = vld [vmem:[%s13916_s1 + $0x1fc] ss:$12 sps:$4 sm:$0xff]  }
  0x61   : > { %1128 = vmatprep.subr.bf16.mxu0 %v9086_v23  ;;  %1268 = vmatmul.mubr.bf16.vlgmr.msra.gmra.mrb[0].mxu1 %v9951_v12  ;;  %v14190_v12 = vmax.f32 %v9782_v43, 0.0  ;;  %v9120_v43 = vld [vmem:[%s13916_s1 + $0x200] ss:$12 sps:$4 sm:$0xff]   ;;  %v14195_v23 = vmax.f32 %v9803_v54, 0.0  ;;  %v503_v54 = vpack.c.bf16 %v14197_v53, %v14196_v52  ;;  %v9152_v52 = vld [vmem:[%s13918_s3 + $0x38] sm:$0xff]  }
  0x62   : > { %1275 = vmatprep.mubr.bf16.mxu1 %v492_v20  ;;  %8693 = vmatpush3.bf16.msra.mxu1 %v9115_v32  ;;  %v14191_v20 = vmax.f32 %v9788_v47, 0.0  ;;  %v14192_v47 = vmax.f32 %v9791_v48, 0.0  ;;  %v9122_v48 = vld [vmem:[%s13916_s1 + $0x230] ss:$12 sps:$4 sm:$0xff]   ;;  %v14199_v32 = vmax.f32 %v9845_v14, 0.0  ;;  %v14204_v14 = vmax.f32 %v9882_v60, 0.0 }
  0x63   : > { %8694 = vmatprep.subr.bf16.mxu1 %v9116_v51  ;;  %v504_v29 = vpack.c.bf16 %v14195_v23, %v14194_v19  ;;  %v14208_v60 = vmax.f32 %v9915_v13, 0.0  ;;  %v14212_v13 = vmax.f32 %v9936_v6, 0.0  ;;  %v9123_v6 = vld [vmem:[%s13918_s3 + $0x40] sm:$0xff]   ;;  %v9147_v19 = vld [vmem:[%s13918_s3 + $0x70] sm:$0xff]   ;;  %v9153_v53 = vld [vmem:[%s13918_s3 + $0xf8] sm:$0xff]  }
  0x64   : > { %1129 = vmatpush1.bf16.msra.mxu0 %v9084_v50  ;;  %v501_v10 = vpack.c.bf16 %v14191_v20, %v14190_v12  ;;  %v14198_v50 = vmax.f32 %v9832_v9, 0.0  ;;  %v9138_v12 = vld [vmem:[%s13918_s3 + $0x98] sm:$0xff]   ;;  %v9139_v20 = vld [vmem:[%s13918_s3 + $0x60] sm:$0xff]   ;;  %v9148_v23 = vld [vmem:[%s13918_s3 + $0x30] sm:$0xff]  }
  0x65   : > { %1130 = vmatprep.subr.bf16.mxu0 %v9089_v33 }
  0x66   : > { %8695 = vmatpush3.bf16.msra.mxu1 %v9116_v51  ;;  %v507_v33 = vpack.c.bf16 %v14199_v32, %v14198_v50  ;;  %v14200_v51 = vmax.f32 %v9848_v15, 0.0  ;;  %v13931_v15 = vmov 0   ;;  %v9155_v50 = vld [vmem:[%s13918_s3 + $0x140] sm:$0xff]  }
  0x67   : > { %1062 = vmatmul.mubr.bf16.gmra.mrb[8].mxu0 %v494_v27  ;;  %8696 = vmatprep.subr.bf16.mxu1 %v9117_v34 }
  0x68   : > { %1071 = vmatprep.mubr.bf16.mxu0 %v498_v45  ;;  %1131 = vmatpush1.bf16.msra.mxu0 %v9087_v56  ;;  %v506_v56 = vpack.c.bf16 %v14201_v59, %v14200_v51 }
  0x69   : > { %1132 = vmatprep.subr.bf16.mxu0 %v9092_v1  ;;  %1276 = vmatmul.mubr.bf16.gmra.mrb[4].mxu1 %v491_v0  ;;  %v500_v0 = vpack.c.bf16 %v14193_v63, %v14192_v47  ;;  %v14205_v1 = vmax.f32 %v9891_v16, 0.0  ;;  %v14209_v16 = vmax.f32 %v9925_v26, 0.0  ;;  %v14213_v26 = vmax.f32 %v9958_v4, 0.0  ;;  %v9144_v47 = vld [vmem:[%s13918_s3 + $0x28] sm:$0xff]  }
  0x6a   : > { %1283 = vmatprep.mubr.bf16.mxu1 %v495_v21  ;;  %8697 = vmatpush3.bf16.msra.mxu1 %v9117_v34  ;;  %v9121_v21 = vld [vmem:[%s13916_s1 + $0x218] ss:$12 sps:$4 sm:$0xff]   ;;  %v508_v4 = vpack.c.bf16 %v481_v30, %v478_v11  ;;  %v9132_v11 = vld [vmem:[%s13918_s3 + $0x10] sm:$0xff]   ;;  %v9145_v63 = vld [vmem:[%s13918_s3 + $0xe8] sm:$0xff]  }
  0x6b   : > { %8698 = vmatprep.subr.bf16.mxu1 %v9118_v38  ;;  %v493_v34 = vpack.c.bf16 %v14209_v16, %v14208_v60  ;;  %v9133_v30 = vld [vmem:[%s13918_s3 + $0xd0] sm:$0xff]  }
  0x6c   : > { %1133 = vmatpush1.bf16.msra.mxu0 %v9090_v35  ;;  %v496_v35 = vpack.c.bf16 %v14211_v24, %v14210_v55  ;;  %v9165_v24 = vld [vmem:[%s13918_s3 + $0x1c0] sm:$0xff]  }
  0x6d   : > { %1134 = vmatprep.subr.bf16.mxu0 %v9095_v37  ;;  %v499_v37 = vpack.c.bf16 %v14213_v26, %v14212_v13 }
  0x6e   : > { %8699 = vmatpush3.bf16.msra.mxu1 %v9118_v38  ;;  %v14214_v38 = vmax.f32 %v9968_v44, 0.0  ;;  %v9128_v44 = vld [vmem:[%s13918_s3 + $0x8] sm:$0xff]  }
  0x6f   : > { %1072 = vmatmul.mubr.bf16.gmra.mrb[12].mxu0 %v497_v61  ;;  %8700 = vmatprep.subr.bf16.mxu1 %v9119_v39 }
  0x70   : > { %1081 = vmatprep.mubr.bf16.mxu0 %v501_v10  ;;  %1135 = vmatpush1.bf16.msra.mxu0 %v9093_v57  ;;  %v14215_v57 = vmax.f32 %v9971_v3, 0.0  ;;  %v511_v3 = vpack.c.bf16 %v487_v49, %v484_v31  ;;  %v9134_v31 = vld [vmem:[%s13918_s3 + $0x90] sm:$0xff]   ;;  %v9135_v49 = vld [vmem:[%s13918_s3 + $0x58] sm:$0xff]  }
  0x71   : > { %1136 = vmatprep.subr.bf16.mxu0 %v9098_v62  ;;  %1284 = vmatmul.mubr.bf16.gmra.mrb[8].mxu1 %v494_v27  ;;  %v14203_v27 = vmax.f32 %v9878_v40, 0.0  ;;  %v490_v40 = vpack.c.bf16 %v14207_v36, %v14206_v18  ;;  %v9137_v62 = vld [vmem:[%s13918_s3 + $0xd8] sm:$0xff]  }
  0x72   : > { %1291 = vmatprep.mubr.bf16.mxu1 %v498_v45  ;;  %8701 = vmatpush3.bf16.msra.mxu1 %v9119_v39  ;;  %v509_v45 = vpack.c.bf16 %v14205_v1, %v14204_v14  ;;  %v502_v58 = vpack.c.bf16 %v14215_v57, %v14214_v38  ;;  %v9141_v39 = vld [vmem:[%s13918_s3 + $0xe0] sm:$0xff]  }
  0x73   : > { %8702 = vmatprep.subr.bf16.mxu1 %v9120_v43  ;;  %v510_v9 = vpack.c.bf16 %v14203_v27, %v14202_v5 }
  0x74   : > { %1137 = vmatpush1.bf16.msra.mxu0 %v9096_v42  ;;  %v9142_v42 = vld [vmem:[%s13918_s3 + $0xa0] sm:$0xff]  }
  0x75   : > { %7860 = vmatprep.subr.bf16.mxu0 %v9125_v2 }
  0x76   : > { %8703 = vmatpush3.bf16.msra.mxu1 %v9120_v43  ;;  %v9143_v43 = vld [vmem:[%s13918_s3 + $0x68] sm:$0xff]  }
  0x77   : > { %1082 = vmatmul.mubr.bf16.gmra.mrb[16].mxu0 %v500_v0  ;;  %8704 = vmatprep.subr.bf16.mxu1 %v9121_v21 }
  0x78   : > { %1091 = vmatprep.mubr.bf16.mxu0 %v504_v29 }
  0x79   : > { %1292 = vmatmul.mubr.bf16.gmra.mrb[12].mxu1 %v497_v61  ;;  %v9136_v61 = vld [vmem:[%s13918_s3 + $0x18] sm:$0xff]  }
  0x7a   : > { %1299 = vmatprep.mubr.bf16.mxu1 %v501_v10  ;;  %8705 = vmatpush3.bf16.msra.mxu1 %v9121_v21  ;;  %v9140_v10 = vld [vmem:[%s13918_s3 + $0x20] sm:$0xff]   ;;  %v9150_v21 = vld [vmem:[%s13918_s3 + $0xb0] sm:$0xff]  }
  0x7b   : > { %8706 = vmatprep.subr.bf16.mxu1 %v9122_v48 }
  0x7e   : > { %8707 = vmatpush3.bf16.msra.mxu1 %v9122_v48  ;;  %v9151_v48 = vld [vmem:[%s13918_s3 + $0x78] sm:$0xff]  }
  0x7f   : > { %1092 = vmatmul.mubr.bf16.gmra.mrb[20].mxu0 %v503_v54  ;;  %7796 = vmatprep.subr.bf16.mxu1 %v9123_v6  ;;  %v610_v6 = vlaneseq }
  0x80   : > { %1101 = vmatprep.mubr.bf16.mxu0 %v507_v33 }
  0x81   : > { %1300 = vmatmul.mubr.bf16.gmra.mrb[16].mxu1 %v500_v0  ;;  %v9146_v0 = vld [vmem:[%s13918_s3 + $0xa8] sm:$0xff]   ;;  %v10295_v2 = vshrl.u32 %v610_v6, 7 }
  0x82   : > { %1307 = vmatprep.mubr.bf16.mxu1 %v504_v29  ;;  %v9149_v29 = vld [vmem:[%s13918_s3 + $0xf0] sm:$0xff]  }
  0x83   : > { %14217 = vst [vmem:[#allocation7_spill] sm:$0xff] %v10295_v2  ;;  %vm14071_vm0 = vcmp.lt.s32.totalorder %v10295_v2, 7  ;;  %vm14066_vm1 = vcmp.lt.s32.totalorder %v10295_v2, 1 }
  0x87   : > { %1102 = vmatmul.mubr.bf16.gmra.mrb[24].mxu0 %v506_v56 }
  0x88   : > { %1111 = vmatprep.mubr.bf16.mxu0 %v510_v9 }
  0x89   : > { %1308 = vmatmul.mubr.bf16.gmra.mrb[20].mxu1 %v503_v54  ;;  %v9154_v54 = vld [vmem:[%s13918_s3 + $0xb8] sm:$0xff]  }
  0x8a   : > { %1315 = vmatprep.mubr.bf16.mxu1 %v507_v33 }
  0x8f   : > { %1112 = vmatmul.mubr.bf16.gmra.mrb[28].mxu0 %v509_v45 }
  0x90   : > { %1154 = vmatprep.mubr.bf16.mxu0 %v13931_v15 }
  0x91   : > { %1316 = vmatmul.mubr.bf16.gmra.mrb[24].mxu1 %v506_v56 }
  0x92   : > { %1323 = vmatprep.mubr.bf16.mxu1 %v510_v9 }
  0x97   : > { %1155 = vmatmul.mubr.bf16.vlgmr.msra.gmra.mrb[0].mxu0 %v490_v40 }
  0x98   : > { %1164 = vmatprep.mubr.bf16.mxu0 %v13931_v15  ;;  %7861 = vmatpush3.bf16.msra.mxu0 %v9126_v25 }
  0x99   : > { %1324 = vmatmul.mubr.bf16.gmra.mrb[28].mxu1 %v509_v45  ;;  %7862 = vmatprep.subr.bf16.mxu0 %v9129_v28 }
  0x9a   : > { %8708 = vmatprep.mubr.bf16.mxu1 %v490_v40 }
  0x9c   : > { %7863 = vmatpush3.bf16.msra.mxu0 %v9130_v46 }
  0x9d   : > { %7864 = vmatprep.subr.bf16.mxu0 %v9133_v30  ;;  %v608_v30 = vld [vmem:[%s13917_s2] sm:$0x7] }
  0x9f   : > { %1165 = vmatmul.mubr.bf16.gmra.mrb[4].mxu0 %v493_v34 }
  0xa0   : > { %1174 = vmatprep.mubr.bf16.mxu0 %v13931_v15  ;;  %7865 = vmatpush3.bf16.msra.mxu0 %v9134_v31  ;;  %v13928_v31 = vsub.s32 1, %v10295_v2 }
  0xa1   : > { %8709 = vmatmul.mubr.bf16.vlgmr.msra.gmra.mrb[32].mxu1 %v493_v34  ;;  %7866 = vmatprep.subr.bf16.mxu0 %v9137_v62 }
  0xa2   : > { %8712 = vmatprep.mubr.bf16.mxu1 %v496_v35  ;;  %7797 = vmatpush3.bf16.msra.mxu1 %v9124_v17  ;;  %v10312_v62 = vrot.slane %v608_v30, %v13928_v31 }
  0xa3   : > { %7798 = vmatprep.subr.bf16.mxu1 %v9127_v41 }
  0xa4   : > { %7867 = vmatpush3.bf16.msra.mxu0 %v9138_v12 }
  0xa5   : > { %7868 = vmatprep.subr.bf16.mxu0 %v9141_v39 }
  0xa6   : > { %7799 = vmatpush3.bf16.msra.mxu1 %v9128_v44 }
  0xa7   : > { %1175 = vmatmul.mubr.bf16.gmra.mrb[8].mxu0 %v496_v35  ;;  %7800 = vmatprep.subr.bf16.mxu1 %v9131_v22  ;;  %v13929_v22 = vsub.s32 0, %v10295_v2 }
  0xa8   : > { %1184 = vmatprep.mubr.bf16.mxu0 %v13931_v15  ;;  %7869 = vmatpush3.bf16.msra.mxu0 %v9142_v42 }
  0xa9   : > { %8713 = vmatmul.mubr.bf16.gmra.mrb[36].mxu1 %v499_v37  ;;  %7870 = vmatprep.subr.bf16.mxu0 %v9145_v63 }
  0xaa   : > { %8716 = vmatprep.mubr.bf16.mxu1 %v502_v58  ;;  %7801 = vmatpush3.bf16.msra.mxu1 %v9132_v11 }
  0xab   : > { %7802 = vmatprep.subr.bf16.mxu1 %v9135_v49  ;;  %v10308_v49 = vrot.slane %v608_v30, %v13929_v22 }
  0xac   : > { %7871 = vmatpush3.bf16.msra.mxu0 %v9146_v0 }
  0xad   : > { %7872 = vmatprep.subr.bf16.mxu0 %v9149_v29 }
  0xae   : > { %7803 = vmatpush3.bf16.msra.mxu1 %v9136_v61 }
  0xaf   : > { %1185 = vmatmul.mubr.bf16.gmra.mrb[12].mxu0 %v499_v37  ;;  %7804 = vmatprep.subr.bf16.mxu1 %v9139_v20  ;;  %v10315_v20 = vadd.s32 8, %v10295_v2 }
  0xb0   : > { %1194 = vmatprep.mubr.bf16.mxu0 %v13931_v15  ;;  %7873 = vmatpush3.bf16.msra.mxu0 %v9150_v21 }
  0xb1   : > { %8717 = vmatmul.mubr.bf16.gmra.mrb[40].mxu1 %v505_v8  ;;  %7874 = vmatprep.subr.bf16.mxu0 %v9153_v53  ;;  %v13930_v53 = vsub.s32 2, %v10295_v2 }
  0xb2   : > { %8720 = vmatprep.mubr.bf16.mxu1 %v508_v4  ;;  %7805 = vmatpush3.bf16.msra.mxu1 %v9140_v10 }
  0xb3   : > { %7806 = vmatprep.subr.bf16.mxu1 %v9143_v43 }
  0xb4   : > { %7875 = vmatpush3.bf16.msra.mxu0 %v9154_v54 }
  0xb5   : > { %7988 = vmatprep.subr.bf16.mxu0 %v9165_v24 }
  0xb6   : > { %7807 = vmatpush3.bf16.msra.mxu1 %v9144_v47 }
  0xb7   : > { %1195 = vmatmul.mubr.bf16.gmra.mrb[16].mxu0 %v502_v58  ;;  %7808 = vmatprep.subr.bf16.mxu1 %v9147_v19 }
  0xb8   : > { %1204 = vmatprep.mubr.bf16.mxu0 %v13931_v15 }
  0xb9   : > { %8721 = vmatmul.mubr.bf16.gmra.mrb[44].mxu1 %v511_v3 }
  0xba   : > { %7809 = vmatpush3.bf16.msra.mxu1 %v9148_v23 }
  0xbb   : > { %7810 = vmatprep.subr.bf16.mxu1 %v9151_v48 }
  0xbe   : > { %7811 = vmatpush3.bf16.msra.mxu1 %v9152_v52 }
  0xbf   : > { %1205 = vmatmul.mubr.bf16.gmra.mrb[20].mxu0 %v505_v8  ;;  %7924 = vmatprep.subr.bf16.mxu1 %v9155_v50 }
  0xc0   : > { %1214 = vmatprep.mubr.bf16.mxu0 %v13931_v15 }
  0xc7   : > { %1215 = vmatmul.mubr.bf16.gmra.mrb[24].mxu0 %v508_v4 }
  0xc8   : > { %1224 = vmatprep.mubr.bf16.mxu0 %v13931_v15 }
  0xcf   : > { %1225 = vmatmul.mubr.bf16.gmra.mrb[28].mxu0 %v511_v3 }
 0x134   : > { %v7732_v32 = vpop.f32.mrb[0].mxu1 }
 0x135   : > { %v7733_v33 = vpop.f32.mrb[1].mxu1 }
 0x136   : > { %v10272_v51 = vadd.f32 %v7733_v33, %v7732_v32  ;;  %v7735_v59 = vpop.f32.mrb[2].mxu1  ;;  %v10333_v32 = vadd.s32 16, %v10295_v2  ;;  %v10336_v33 = vadd.s32 24, %v10295_v2 }
 0x137   : > { %v7736_v56 = vpop.f32.mrb[3].mxu1 }
 0x138   : > { %v10274_v5 = vadd.f32 %v7736_v56, %v7735_v59 }
 0x13c   : > { %v7738_v27 = vpop.f32.mrb[4].mxu1 }
 0x13d   : > { %v7739_v9 = vpop.f32.mrb[5].mxu1 }
 0x13e   : > { %v10276_v14 = vadd.f32 %v7739_v9, %v7738_v27  ;;  %v7741_v1 = vpop.f32.mrb[6].mxu1  ;;  %v10339_v27 = vadd.s32 32, %v10295_v2  ;;  %v10342_v9 = vadd.s32 40, %v10295_v2 }
 0x13f   : > { %v7742_v45 = vpop.f32.mrb[7].mxu1 }
 0x140   : > { %v10278_v18 = vadd.f32 %v7742_v45, %v7741_v1 }
 0x144   : > { %v7744_v36 = vpop.f32.mrb[8].mxu1 }
 0x145   : > { %v7745_v40 = vpop.f32.mrb[9].mxu1 }
 0x146   : > { %v10280_v60 = vadd.f32 %v7745_v40, %v7744_v36  ;;  %v7747_v16 = vpop.f32.mrb[10].mxu1  ;;  %v13935_v36 = vmov 0.0  }
 0x147   : > { %v7748_v34 = vpop.f32.mrb[11].mxu1 }
 0x148   : > { %v10282_v55 = vadd.f32 %v7748_v34, %v7747_v16  ;;  %v10349_v16 = vadd.s32 48, %v10295_v2  ;;  %v10352_v34 = vadd.s32 56, %v10295_v2 }
 0x14c   : > { %v7750_v35 = vpop.f32.mrb[12].mxu1 }
 0x14d   : > { %v7751_v13 = vpop.f32.mrb[13].mxu1 }
 0x14e   : > { %v10287_v26 = vadd.f32 %v7751_v13, %v7750_v35  ;;  %v7753_v37 = vpop.f32.mrb[14].mxu1 }
 0x14f   : > { %v7754_v38 = vpop.f32.mrb[15].mxu1 }
 0x150   : > { %v10289_v57 = vadd.f32 %v7754_v38, %v7753_v37  ;;  %v10359_v37 = vrot.slane %v608_v30, %v13930_v53 }
 0x154   : > { %v7756_v58 = vpop.f32.mrb[16].mxu1 }
 0x155   : > { %v7757_v7 = vpop.f32.mrb[17].mxu1 }
 0x156   : > { %v10291_v8 = vadd.f32 %v7757_v7, %v7756_v58  ;;  %v7759_v4 = vpop.f32.mrb[18].mxu1 }
 0x157   : > { %v7760_v3 = vpop.f32.mrb[19].mxu1 }
 0x158   : > { %v10293_v17 = vadd.f32 %v7760_v3, %v7759_v4 }
 0x15c   : > { %v7762_v25 = vpop.f32.mrb[20].mxu1 }
 0x15d   : > { %v7763_v41 = vpop.f32.mrb[21].mxu1 }
 0x15e   : > { %v10297_v44 = vadd.f32 %v7763_v41, %v7762_v25  ;;  %v7765_v28 = vpop.f32.mrb[22].mxu1 }
 0x15f   : > { %v7766_v46 = vpop.f32.mrb[23].mxu1 }
 0x160   : > { %v10300_v11 = vadd.f32 %v7766_v46, %v7765_v28 }
 0x164   : > { %v7768_v61 = vpop.f32.mrb[24].mxu1 }
 0x165   : > { %v7769_v12 = vpop.f32.mrb[25].mxu1 }
 0x166   : > { %v10317_v10 = vadd.f32 %v7769_v12, %v7768_v61  ;;  %v7771_v39 = vpop.f32.mrb[26].mxu1 }
 0x167   : > { %v7772_v43 = vpop.f32.mrb[27].mxu1 }
 0x168   : > { %v10320_v0 = vadd.f32 %v7772_v43, %v7771_v39 }
 0x16a   : > { %v1156_v42 = vpop.f32.mrb[0].mxu0 }
 0x16b   : > { %v8852_v47 = vadd.f32 %v1156_v42, %v10308_v49  ;;  %v1158_v63 = vpop.f32.mrb[1].mxu0 }
 0x16c   : > { %v8853_v19 = vadd.f32 %v1158_v63, %v10312_v62  ;;  %v1160_v23 = vpop.f32.mrb[2].mxu0  ;;  %v7774_v1 = vpop.f32.mrb[28].mxu1 }
 0x16d   : > { %v8854_v29 = vadd.f32 %v1160_v23, %v10308_v49  ;;  %v1162_v21 = vpop.f32.mrb[3].mxu0  ;;  %v1429_v59 = vmax.f32 %v8852_v47, 0.0  ;;  %v7775_v24 = vpop.f32.mrb[29].mxu1 }
 0x16e   : > { %v10329_v54 = vmax.f32 %v8853_v19, 0.0  ;;  %v8855_v50 = vadd.f32 %v1162_v21, %v10312_v62  ;;  %v10361_v38 = vadd.f32 %v7775_v24, %v7774_v1  ;;  %v7777_v58 = vpop.f32.mrb[30].mxu1  ;;  %v1270_v21 = vadd.f32 %v10272_v51, %v10359_v37 }
 0x16f   : > { %v1432_v56 = vmax.f32 %v8854_v29, 0.0  ;;  %v7778_v25 = vpop.f32.mrb[31].mxu1 }
 0x170   : > { %v10344_v45 = vmax.f32 %v8855_v50, 0.0  ;;  %v1679_v40 = vpack.c.bf16 %v10329_v54, %v13935_v36  ;;  %v13934_v35 = vrot.slane %v10329_v54, 7  ;;  %v13933_v7 = vrot.slane %v10329_v54, 1 }
 0x171   : > { %v10355_v13 = vpack.c.bf16 %v1432_v56, %v1429_v59  ;;  %v10371_v12 = vadd.f32 %v7778_v25, %v7777_v58  ;;  %v1278_v50 = vadd.f32 %v10276_v14, %v10359_v37  ;;  %v10401_v25 = vadd.s32 64, %v10295_v2 }
 0x172   : > { %14218 = vst [vmem:[#allocation8_spill] sm:$0xff] %v10344_v45  ;;  %v1591_v4 = vrot.slane %v10344_v45, 7  ;;  %v1688_v3 = vrot.slane %v10344_v45, 1  ;;  %v1166_v6 = vpop.f32.mrb[4].mxu0  ;;  %2535 = vmatprep.mubr.bf16.mxu1 %v1679_v40  ;;  %v1286_v40 = vadd.f32 %v10280_v60, %v10359_v37 }
 0x173   : > { %14219 = vst [vmem:[#allocation9_spill] sm:$0xff] %v10355_v13  ;;  %v8856_v28 = vadd.f32 %v1166_v6, %v10308_v49  ;;  %v1168_v46 = vpop.f32.mrb[5].mxu0  ;;  %v1281_v6 = vadd.f32 %v10278_v18, %v10359_v37  ;;  %14222 = vst [vmem:[#allocation12_spill] sm:$0xff] %v10401_v25 }
 0x174   : > { %v10377_v39 = vsel %vm14071_vm0, %v13933_v7, %v1688_v3  ;;  %v8857_v42 = vadd.f32 %v1168_v46, %v10312_v62  ;;  %v1170_v43 = vpop.f32.mrb[6].mxu0  ;;  %v10384_v47 = vsel %vm14066_vm1, %v13934_v35, %v1591_v4  ;;  %v8710_v51 = vpop.f32.mrb[32].mxu1 }
 0x175   : > { %14220 = vst [vmem:[#allocation10_spill] sm:$0xff] %v10377_v39  ;;  %v8858_v19 = vadd.f32 %v1170_v43, %v10308_v49  ;;  %v1172_v23 = vpop.f32.mrb[7].mxu0  ;;  %v1435_v24 = vmax.f32 %v8856_v28, 0.0  ;;  %v10416_v18 = vadd.f32 %v8710_v51, %v1278_v50 }
 0x176   : > { %v10393_v59 = vmax.f32 %v8857_v42, 0.0  ;;  %v8859_v56 = vadd.f32 %v1172_v23, %v10312_v62  ;;  %v1366_v23 = vpop.f32.mrb[33].mxu1 }
 0x177   : > { %v1438_v58 = vmax.f32 %v8858_v19, 0.0  ;;  %v10414_v19 = vadd.s32 72, %v10295_v2  ;;  %v10418_v31 = vadd.f32 %v1366_v23, %v1270_v21  ;;  %v8711_v22 = vpop.f32.mrb[34].mxu1  ;;  %v1273_v23 = vadd.f32 %v10274_v5, %v10359_v37 }
 0x178   : > { %14221 = vst [vmem:[#allocation11_spill] sm:$0xff] %v10393_v59  ;;  %v1592_v46 = vrot.slane %v10393_v59, 7  ;;  %v1689_v14 = vrot.slane %v10393_v59, 1  ;;  %v10405_v42 = vmax.f32 %v8859_v56, 0.0  ;;  %v10409_v43 = vpack.c.bf16 %v10393_v59, %v10344_v45 }
 0x179   : > { %v10411_v28 = vpack.c.bf16 %v1438_v58, %v1435_v24  ;;  %14225 = vst [vmem:[#allocation15_spill] sm:$0xff] %v10414_v19  ;;  %v1369_v58 = vpop.f32.mrb[35].mxu1  ;;  %v10448_v7 = vadd.f32 %v8711_v22, %v1281_v6  ;;  %v1289_v22 = vadd.f32 %v10282_v55, %v10359_v37 }
 0x17a   : > { %14223 = vst [vmem:[#allocation13_spill] sm:$0xff] %v10405_v42  ;;  %v1593_v53 = vrot.slane %v10405_v42, 7  ;;  %v1690_v56 = vrot.slane %v10405_v42, 1  ;;  %v1176_v15 = vpop.f32.mrb[8].mxu0  ;;  %v10424_v41 = vsel %vm14066_vm1, %v1591_v4, %v1592_v46  ;;  %v10428_v24 = vsel %vm14071_vm0, %v1688_v3, %v1689_v14 }
 0x17b   : > { %14224 = vst [vmem:[#allocation14_spill] sm:$0xff] %v10411_v28  ;;  %14226 = vst [vmem:[#allocation16_spill] sm:$0xff] %v10428_v24  ;;  %v8860_v50 = vadd.f32 %v1176_v15, %v10308_v49  ;;  %v1178_v51 = vpop.f32.mrb[9].mxu0  ;;  %v10433_v21 = vpack.c.bf16 %v10424_v41, %v10384_v47  ;;  %v10464_v6 = vadd.f32 %v1369_v58, %v1273_v23 }
 0x17c   : > { %v8861_v4 = vadd.f32 %v1178_v51, %v10312_v62  ;;  %v1180_v1 = vpop.f32.mrb[10].mxu0  ;;  %v10442_v3 = vsel %vm14066_vm1, %v1592_v46, %v1593_v53  ;;  %v10446_v15 = vsel %vm14071_vm0, %v1689_v14, %v1690_v56  ;;  %v1294_v46 = vadd.f32 %v10287_v26, %v10359_v37  ;;  %v8714_v61 = vpop.f32.mrb[36].mxu1 }
 0x17d   : > { %14227 = vst [vmem:[#allocation17_spill] sm:$0xff] %v10446_v15  ;;  %v8862_v35 = vadd.f32 %v1180_v1, %v10308_v49  ;;  %v1182_v29 = vpop.f32.mrb[11].mxu0  ;;  %v10455_v60 = vpack.c.bf16 %v10446_v15, %v10428_v24  ;;  %v1441_v51 = vmax.f32 %v8860_v50, 0.0  ;;  %v1382_v55 = vpop.f32.mrb[37].mxu1  ;;  %v1297_v58 = vadd.f32 %v10289_v57, %v10359_v37 }
 0x17e   : > { %v10459_v63 = vmax.f32 %v8861_v4, 0.0  ;;  %v8863_v14 = vadd.f32 %v1182_v29, %v10312_v62  ;;  %v10482_v23 = vadd.f32 %v8714_v61, %v1294_v46  ;;  %v10484_v5 = vadd.f32 %v1382_v55, %v1286_v40  ;;  %v8715_v30 = vpop.f32.mrb[38].mxu1 }
 0x17f   : > { %14228 = vst [vmem:[#allocation18_spill] sm:$0xff] %v10455_v60  ;;  %v1444_v1 = vmax.f32 %v8862_v35, 0.0  ;;  %v1310_v55 = vadd.f32 %v10297_v44, %v10359_v37  ;;  %v1302_v28 = vadd.f32 %v10291_v8, %v10359_v37 }
 0x180   : > { %14229 = vst [vmem:[#allocation19_spill] sm:$0xff] %v10459_v63  ;;  %v1594_v26 = vrot.slane %v10459_v63, 7  ;;  %v1691_v50 = vrot.slane %v10459_v63, 1  ;;  %v10472_v4 = vmax.f32 %v8863_v14, 0.0  ;;  %v10476_v29 = vpack.c.bf16 %v10459_v63, %v10405_v42 }
 0x181   : > { %v10478_v35 = vpack.c.bf16 %v1444_v1, %v1441_v51  ;;  %v1385_v1 = vpop.f32.mrb[39].mxu1  ;;  %v10527_v42 = vadd.f32 %v8715_v30, %v1297_v58 }
 0x182   : > { %14230 = vst [vmem:[#allocation20_spill] sm:$0xff] %v10472_v4  ;;  %14231 = vst [vmem:[#allocation21_spill] sm:$0xff] %v10476_v29  ;;  %v1595_v52 = vrot.slane %v10472_v4, 7  ;;  %v1692_v14 = vrot.slane %v10472_v4, 1  ;;  %v1186_v48 = vpop.f32.mrb[12].mxu0  ;;  %v10490_v36 = vsel %vm14066_vm1, %v1593_v53, %v1594_v26  ;;  %v10494_v51 = vsel %vm14071_vm0, %v1690_v56, %v1691_v50 }
 0x183   : > { %14232 = vst [vmem:[#allocation22_spill] sm:$0xff] %v10478_v35  ;;  %14233 = vst [vmem:[#allocation23_spill] sm:$0xff] %v10494_v51  ;;  %v8864_v57 = vadd.f32 %v1186_v48, %v10308_v49  ;;  %v1188_v61 = vpop.f32.mrb[13].mxu0  ;;  %v10499_v40 = vpack.c.bf16 %v10490_v36, %v10442_v3  ;;  %v10529_v8 = vadd.f32 %v1385_v1, %v1289_v22 }
 0x184   : > { %v8865_v53 = vadd.f32 %v1188_v61, %v10312_v62  ;;  %v1190_v35 = vpop.f32.mrb[14].mxu0  ;;  %v10507_v56 = vsel %vm14066_vm1, %v1594_v26, %v1595_v52  ;;  %v10511_v48 = vsel %vm14071_vm0, %v1691_v50, %v1692_v14  ;;  %v1313_v26 = vadd.f32 %v10300_v11, %v10359_v37  ;;  %v8718_v24 = vpop.f32.mrb[40].mxu1 }
 0x185   : > { %14234 = vst [vmem:[#allocation24_spill] sm:$0xff] %v10499_v40  ;;  %14235 = vst [vmem:[#allocation25_spill] sm:$0xff] %v10511_v48  ;;  %v8866_v13 = vadd.f32 %v1190_v35, %v10308_v49  ;;  %v1192_v46 = vpop.f32.mrb[15].mxu0  ;;  %v10520_v61 = vpack.c.bf16 %v10511_v48, %v10494_v51  ;;  %v1447_v35 = vmax.f32 %v8864_v57, 0.0  ;;  %v1398_v22 = vpop.f32.mrb[41].mxu1  ;;  %v1305_v57 = vadd.f32 %v10293_v17, %v10359_v37 }
 0x186   : > { %v10524_v59 = vmax.f32 %v8865_v53, 0.0  ;;  %v8867_v50 = vadd.f32 %v1192_v46, %v10312_v62  ;;  %v8719_v1 = vpop.f32.mrb[42].mxu1  ;;  %v1318_v46 = vadd.f32 %v10317_v10, %v10359_v37 }
 0x187   : > { %14236 = vst [vmem:[#allocation26_spill] sm:$0xff] %v10520_v61  ;;  %v1450_v45 = vmax.f32 %v8866_v13, 0.0  ;;  %v10545_v13 = vadd.f32 %v8718_v24, %v1310_v55  ;;  %v1401_v24 = vpop.f32.mrb[43].mxu1  ;;  %v10579_v15 = vadd.f32 %v8719_v1, %v1313_v26  ;;  %v10594_v26 = vmax.f32 %v10418_v31, 0.0 }
 0x188   : > { %14237 = vst [vmem:[#allocation27_spill] sm:$0xff] %v10524_v59  ;;  %v1596_v61 = vrot.slane %v10524_v59, 7  ;;  %v1693_v11 = vrot.slane %v10524_v59, 1  ;;  %v10537_v53 = vmax.f32 %v8867_v50, 0.0  ;;  %v10541_v30 = vpack.c.bf16 %v10524_v59, %v10472_v4 }
 0x189   : > { %v10543_v58 = vpack.c.bf16 %v1450_v45, %v1447_v35  ;;  %v10566_v35 = vadd.f32 %v1398_v22, %v1302_v28  ;;  %14248 = vst [vmem:[#allocation38_spill] sm:$0xff] %v10594_v26  ;;  %v10599_v22 = vadd.f32 %v1401_v24, %v1305_v57  ;;  %v10611_v31 = vmax.f32 %v10416_v18, 0.0 }
 0x18a   : > { %14238 = vst [vmem:[#allocation28_spill] sm:$0xff] %v10537_v53  ;;  %14239 = vst [vmem:[#allocation29_spill] sm:$0xff] %v10541_v30  ;;  %v1597_v25 = vrot.slane %v10537_v53, 7  ;;  %v1694_v50 = vrot.slane %v10537_v53, 1  ;;  %v1196_v44 = vpop.f32.mrb[16].mxu0  ;;  %v10555_v63 = vsel %vm14066_vm1, %v1595_v52, %v1596_v61  ;;  %v10559_v45 = vsel %vm14071_vm0, %v1692_v14, %v1693_v11 }
 0x18b   : > { %14240 = vst [vmem:[#allocation30_spill] sm:$0xff] %v10543_v58  ;;  %14241 = vst [vmem:[#allocation31_spill] sm:$0xff] %v10555_v63  ;;  %v8868_v55 = vadd.f32 %v1196_v44, %v10308_v49  ;;  %v1198_v17 = vpop.f32.mrb[17].mxu0  ;;  %v10564_v10 = vpack.c.bf16 %v10555_v63, %v10507_v56  ;;  %v1326_v58 = vadd.f32 %v10361_v38, %v10359_v37 }
 0x18c   : > { %14242 = vst [vmem:[#allocation32_spill] sm:$0xff] %v10559_v45  ;;  %v8869_v52 = vadd.f32 %v1198_v17, %v10312_v62  ;;  %v1200_v4 = vpop.f32.mrb[18].mxu0  ;;  %v10573_v14 = vsel %vm14066_vm1, %v1596_v61, %v1597_v25  ;;  %v10577_v44 = vsel %vm14071_vm0, %v1693_v11, %v1694_v50  ;;  %v1329_v61 = vadd.f32 %v10371_v12, %v10359_v37  ;;  %v8722_v63 = vpop.f32.mrb[44].mxu1 }
 0x18d   : > { %14243 = vst [vmem:[#allocation33_spill] sm:$0xff] %v10564_v10  ;;  %14244 = vst [vmem:[#allocation34_spill] sm:$0xff] %v10573_v14  ;;  %v8870_v51 = vadd.f32 %v1200_v4, %v10308_v49  ;;  %v1202_v28 = vpop.f32.mrb[19].mxu0  ;;  %v10586_v38 = vpack.c.bf16 %v10577_v44, %v10559_v45  ;;  %v10597_v4 = vmax.f32 %v10464_v6, 0.0  ;;  %v1453_v1 = vmax.f32 %v8868_v55, 0.0  ;;  %v1414_v6 = vpop.f32.mrb[45].mxu1 }
 0x18e   : > { %14245 = vst [vmem:[#allocation35_spill] sm:$0xff] %v10577_v44  ;;  %v10590_v17 = vmax.f32 %v8869_v52, 0.0  ;;  %v8871_v11 = vadd.f32 %v1202_v28, %v10312_v62  ;;  %v14251_v14 = vmov 0.0   ;;  %v10616_v24 = vadd.f32 %v8722_v63, %v1326_v58 }
 0x18f   : > { %14246 = vst [vmem:[#allocation36_spill] sm:$0xff] %v10586_v38  ;;  %14249 = vst [vmem:[#allocation39_spill] sm:$0xff] %v10597_v4  ;;  %v1456_v10 = vmax.f32 %v8870_v51, 0.0  ;;  %v10608_v28 = vpack.c.bf16 %v10377_v39, %v14251_v14  ;;  %v10618_v55 = vadd.f32 %v1414_v6, %v1318_v46  ;;  %v8723_v38 = vpop.f32.mrb[46].mxu1  ;;  %v10629_v63 = vmax.f32 %v10448_v7, 0.0 }
 0x190   : > { %14247 = vst [vmem:[#allocation37_spill] sm:$0xff] %v10590_v17  ;;  %v1598_v12 = vrot.slane %v10590_v17, 7  ;;  %v10604_v52 = vmax.f32 %v8871_v11, 0.0  ;;  %v1695_v51 = vrot.slane %v10590_v17, 1  ;;  %v1426_v18 = vadd.f32 %v8723_v38, %v1329_v61 }
 0x191   : > { %v10614_v57 = vpack.c.bf16 %v1456_v10, %v1453_v1 }
 0x192   : > { %14250 = vst [vmem:[#allocation40_spill] sm:$0xff] %v10604_v52  ;;  %v1599_v11 = vrot.slane %v10604_v52, 7  ;;  %v1696_v48 = vrot.slane %v10604_v52, 1  ;;  %v1206_v45 = vpop.f32.mrb[20].mxu0  ;;  %v10624_v39 = vsel %vm14066_vm1, %v1597_v25, %v1598_v12  ;;  %v10647_v10 = vmax.f32 %v1426_v18, 0.0 }
 0x193   : > { %14252 = vst [vmem:[#allocation41_spill] sm:$0xff] %v10614_v57  ;;  %14253 = vst [vmem:[#allocation42_spill] sm:$0xff] %v10624_v39  ;;  %v8872_v30 = vadd.f32 %v1206_v45, %v10308_v49  ;;  %v1208_v40 = vpop.f32.mrb[21].mxu0  ;;  %v10642_v45 = vmax.f32 %v10482_v23, 0.0  ;;  %v10655_v57 = vsel %vm14071_vm0, %v1694_v50, %v1695_v51  ;;  %v1417_v39 = vpop.f32.mrb[47].mxu1 }
 0x194   : > { %v8873_v46 = vadd.f32 %v1208_v40, %v10312_v62  ;;  %v1210_v1 = vpop.f32.mrb[22].mxu0  ;;  %v10635_v6 = vsel %vm14066_vm1, %v1598_v12, %v1599_v11  ;;  %v10639_v25 = vsel %vm14071_vm0, %v1695_v51, %v1696_v48  ;;  %14257 = vst [vmem:[#allocation46_spill] sm:$0xff] %v10647_v10  ;;  %v3004_v40 = vrot.slane %v10594_v26, 7  ;;  %14259 = vst [vmem:[#allocation48_spill] sm:$0xff] %v10655_v57 }
 0x195   : > { %14254 = vst [vmem:[#allocation43_spill] sm:$0xff] %v10635_v6  ;;  %14255 = vst [vmem:[#allocation44_spill] sm:$0xff] %v10639_v25  ;;  %v8874_v38 = vadd.f32 %v1210_v1, %v10308_v49  ;;  %v1212_v7 = vpop.f32.mrb[23].mxu0  ;;  %v1459_v1 = vmax.f32 %v8872_v30, 0.0  ;;  %v1321_v30 = vadd.f32 %v10320_v0, %v10359_v37 }
 0x196   : > { %14256 = vst [vmem:[#allocation45_spill] sm:$0xff] %v10642_v45  ;;  %v10650_v58 = vmax.f32 %v8873_v46, 0.0  ;;  %v8875_v12 = vadd.f32 %v1212_v7, %v10312_v62 }
 0x197   : > { %v1462_v19 = vmax.f32 %v8874_v38, 0.0  ;;  %v10715_v38 = vmax.f32 %v10484_v5, 0.0  ;;  %v14272_v5 = vrot.slane %v10647_v10, 7  ;;  %v14325_v10 = vrot.slane %v10329_v54, 7 }
 0x198   : > { %14258 = vst [vmem:[#allocation47_spill] sm:$0xff] %v10650_v58  ;;  %v1600_v46 = vrot.slane %v10650_v58, 7  ;;  %v1697_v7 = vrot.slane %v10650_v58, 1  ;;  %v10665_v26 = vmax.f32 %v8875_v12, 0.0  ;;  %v10669_v50 = vpack.c.bf16 %v10650_v58, %v10604_v52 }
 0x199   : > { %v10671_v51 = vpack.c.bf16 %v1462_v19, %v1459_v1  ;;  %v10705_v52 = vadd.f32 %v1417_v39, %v1321_v30  ;;  %v10721_v39 = vmax.f32 %v10527_v42, 0.0 }
 0x19a   : > { %14260 = vst [vmem:[#allocation49_spill] sm:$0xff] %v10665_v26  ;;  %14261 = vst [vmem:[#allocation50_spill] sm:$0xff] %v10669_v50  ;;  %v1601_v23 = vrot.slane %v10665_v26, 7  ;;  %v1698_v61 = vrot.slane %v10665_v26, 1  ;;  %v1216_v59 = vpop.f32.mrb[24].mxu0  ;;  %v10681_v12 = vsel %vm14066_vm1, %v1599_v11, %v1600_v46  ;;  %v10685_v19 = vsel %vm14071_vm0, %v1696_v48, %v1697_v7 }
 0x19b   : > { %14262 = vst [vmem:[#allocation51_spill] sm:$0xff] %v10671_v51  ;;  %14263 = vst [vmem:[#allocation52_spill] sm:$0xff] %v10681_v12  ;;  %v8876_v1 = vadd.f32 %v1216_v59, %v10308_v49  ;;  %v1218_v0 = vpop.f32.mrb[25].mxu0  ;;  %v10690_v37 = vpack.c.bf16 %v10681_v12, %v10635_v6  ;;  %v3088_v12 = vrot.slane %v10715_v38, 1 }
 0x19c   : > { %14264 = vst [vmem:[#allocation53_spill] sm:$0xff] %v10685_v19  ;;  %v8877_v11 = vadd.f32 %v1218_v0, %v10312_v62  ;;  %v1220_v51 = vpop.f32.mrb[26].mxu0  ;;  %v10699_v48 = vsel %vm14066_vm1, %v1600_v46, %v1601_v23  ;;  %v10703_v59 = vsel %vm14071_vm0, %v1697_v7, %v1698_v61 }
 0x19d   : > { %14265 = vst [vmem:[#allocation54_spill] sm:$0xff] %v10690_v37  ;;  %14266 = vst [vmem:[#allocation55_spill] sm:$0xff] %v10699_v48  ;;  %v8878_v44 = vadd.f32 %v1220_v51, %v10308_v49  ;;  %v1222_v57 = vpop.f32.mrb[27].mxu0  ;;  %v10712_v0 = vpack.c.bf16 %v10703_v59, %v10685_v19  ;;  %v14270_v51 = vrot.slane %v10597_v4, 7  ;;  %v1465_v18 = vmax.f32 %v8876_v1, 0.0 }
 0x19e   : > { %14267 = vst [vmem:[#allocation56_spill] sm:$0xff] %v10703_v59  ;;  %v10717_v46 = vmax.f32 %v8877_v11, 0.0  ;;  %v8879_v7 = vadd.f32 %v1222_v57, %v10312_v62  ;;  %v10730_v19 = vmax.f32 %v10529_v8, 0.0  ;;  %v10736_v11 = vsel %vm14066_vm1, %v14272_v5, %v3004_v40 }
 0x19f   : > { %14268 = vst [vmem:[#allocation57_spill] sm:$0xff] %v10712_v0  ;;  %v10727_v30 = vsel %vm14066_vm1, %v3004_v40, %v14270_v51  ;;  %v1468_v58 = vmax.f32 %v8878_v44, 0.0  ;;  %14273 = vst [vmem:[#allocation60_spill] sm:$0xff] %v10736_v11  ;;  %v14275_v51 = vand.u32 7, %v10315_v20  ;;  %v14280_v40 = vand.u32 7, %v10295_v2 }
 0x1a0   : > { %14269 = vst [vmem:[#allocation58_spill] sm:$0xff] %v10717_v46  ;;  %14271 = vst [vmem:[#allocation59_spill] sm:$0xff] %v10727_v30  ;;  %v1602_v42 = vrot.slane %v10717_v46, 7  ;;  %v1699_v57 = vrot.slane %v10717_v46, 1  ;;  %v10740_v53 = vmax.f32 %v8879_v7, 0.0  ;;  %v10750_v8 = vpack.c.bf16 %v10717_v46, %v10665_v26 }
 0x1a1   : > { %vm10744_vm2 = vcmp.ge.s32.totalorder %v14275_v51, 1  ;;  %v10752_v44 = vpack.c.bf16 %v1468_v58, %v1465_v18  ;;  %vm10756_vm3 = vcmp.ge.s32.totalorder %v14280_v40, 1  ;;  %v10761_v7 = vmax.f32 %v10545_v13, 0.0  ;;  %v9188_v40 = vld [vmem:[%s13918_s3 + $0x208] sm:$0xff]  }
 0x1a2   : > { %14274 = vst [vmem:[#allocation61_spill] sm:$0xff] %v10740_v53  ;;  %14278 = vst [vmem:[#allocation62_spill] sm:$0xff] %v10750_v8  ;;  %v3006_v0 = vrot.slane %v10611_v31, 7  ;;  %v1603_v37 = vrot.slane %v10740_v53, 7  ;;  %v1700_v26 = vrot.slane %v10740_v53, 1  ;;  %v1226_v58 = vpop.f32.mrb[28].mxu0  ;;  %v14284_v18 = vmov %v14275_v51 }
 0x1a3   : > { %14279 = vst [vmem:[#allocation63_spill] sm:$0xff] %v10752_v44  ;;  %14283 = vst [vmem:[#allocation64_spill] sm:$0xff] %v10761_v7  ;;  %vm10770_vm4 = vcmp.le.s32.totalorder %v14284_v18, 6  ;;  %v10776_v13 = vsel %vm14066_vm1, %v1601_v23, %v1602_v42  ;;  %v10780_v51 = vsel %vm14071_vm0, %v1698_v61, %v1699_v57  ;;  %v8880_v44 = vadd.f32 %v1226_v58, %v10308_v49  ;;  %v1228_v11 = vpop.f32.mrb[29].mxu0 }
 0x1a4   : > { %14287 = vst [vmem:[#allocation65_spill] sm:$0xff] %v10776_v13  ;;  %14288 = vst [vmem:[#allocation66_spill] sm:$0xff] %v10780_v51  ;;  %v14289_v8 = vand.u32 7, %v10333_v32  ;;  %v14292_v20 = vand.u32 7, %v10336_v33  ;;  %v10797_v23 = vpack.c.bf16 %v10776_v13, %v10699_v48  ;;  %v1230_v50 = vpop.f32.mrb[30].mxu0  ;;  %v10806_v25 = vsel %vm14066_vm1, %v1602_v42, %v1603_v37 }
 0x1a5   : > { %14296 = vst [vmem:[#allocation68_spill] sm:$0xff] %v10806_v25  ;;  %v3007_v48 = vrot.slane %v10629_v63, 7  ;;  %v1232_v6 = vpop.f32.mrb[31].mxu0  ;;  %v10821_v58 = vmax.f32 %v10566_v35, 0.0  ;;  %v1471_v61 = vmax.f32 %v8880_v44, 0.0  ;;  %v3087_v44 = vrot.slane %v10629_v63, 1  ;;  %vm10884_vm10 = vmpackc.low %vm10744_vm2, %vm14021_vm9 }
 0x1a6   : > { %vm10785_vm5 = vcmp.ge.s32.totalorder %v14289_v8, 1  ;;  %vm10791_vm6 = vcmp.ge.s32.totalorder %v14292_v20, 1  ;;  %14295 = vst [vmem:[#allocation67_spill] sm:$0xff] %v10797_v23  ;;  %v8881_v8 = vadd.f32 %v1228_v11, %v10312_v62  ;;  %v10810_v20 = vsel %vm14071_vm0, %v1699_v57, %v1700_v26  ;;  %vm10917_vm13 = vmpackc.low %vm10744_vm2, %vm10756_vm3 }
 0x1a7   : > { %14297 = vst [vmem:[#allocation69_spill] sm:$0xff] %v10810_v20  ;;  %v8882_v23 = vadd.f32 %v1230_v50, %v10308_v49  ;;  %v10818_v11 = vpack.c.bf16 %v10810_v20, %v10780_v51  ;;  %v8883_v57 = vadd.f32 %v1232_v6, %v10312_v62  ;;  %v10828_v46 = vsel %vm14066_vm1, %v3006_v0, %v3007_v48  ;;  %vm10940_vm14 = vmpackc.low %vm10770_vm4, %vm14021_vm9 }
 0x1a8   : > { %v10823_v42 = vmax.f32 %v8881_v8, 0.0  ;;  %14300 = vst [vmem:[#allocation72_spill] sm:$0xff] %v10828_v46  ;;  %v14301_v49 = vrot.slane %v10597_v4, 7  ;;  %v3086_v8 = vrot.slane %v10611_v31, 1  ;;  %vm10957_vm15 = vmpackc.low %vm10791_vm6, %vm10785_vm5 }
 0x1a9   : > { %14298 = vst [vmem:[#allocation70_spill] sm:$0xff] %v10818_v11  ;;  %v1474_v59 = vmax.f32 %v8882_v23, 0.0  ;;  %v10841_v6 = vmax.f32 %v8883_v57, 0.0  ;;  %v14307_v23 = vrot.slane %v10597_v4, 1 }
 0x1aa   : > { %14299 = vst [vmem:[#allocation71_spill] sm:$0xff] %v10823_v42  ;;  %v10834_v50 = vsel %vm14066_vm1, %v14301_v49, %v3006_v0  ;;  %v1604_v51 = vrot.slane %v10823_v42, 7  ;;  %v1701_v62 = vrot.slane %v10823_v42, 1  ;;  %v10845_v11 = vpack.c.bf16 %v10823_v42, %v10740_v53 }
 0x1ab   : > { %14302 = vst [vmem:[#allocation73_spill] sm:$0xff] %v10834_v50  ;;  %14303 = vst [vmem:[#allocation74_spill] sm:$0xff] %v10841_v6  ;;  %v10847_v13 = vpack.c.bf16 %v1474_v59, %v1471_v61  ;;  %v10850_v0 = vmax.f32 %v10579_v15, 0.0  ;;  %v10857_v49 = vsel %vm14071_vm0, %v14307_v23, %v3086_v8  ;;  %v1605_v57 = vrot.slane %v10841_v6, 7 }
 0x1ac   : > { %14304 = vst [vmem:[#allocation75_spill] sm:$0xff] %v10845_v11  ;;  %14308 = vst [vmem:[#allocation78_spill] sm:$0xff] %v10857_v49  ;;  %v1702_v35 = vrot.slane %v10841_v6, 1  ;;  %v14309_v53 = vand.u32 7, %v10333_v32  ;;  %v14312_v15 = vand.u32 7, %v10336_v33  ;;  %v10875_v23 = vsel %vm14066_vm1, %v1603_v37, %v1604_v51 }
 0x1ad   : > { %14305 = vst [vmem:[#allocation76_spill] sm:$0xff] %v10847_v13  ;;  %14306 = vst [vmem:[#allocation77_spill] sm:$0xff] %v10850_v0  ;;  %v10879_v13 = vsel %vm14071_vm0, %v1700_v26, %v1701_v62  ;;  %v14316_v32 = vmov 0  ;;  %v14319_v33 = vand.u32 7, %v10339_v27  ;;  %v14322_v37 = vand.u32 7, %v10342_v9 }
 0x1ae   : > { %vm10863_vm7 = vcmp.le.s32.totalorder %v14309_v53, 6  ;;  %vm10869_vm8 = vcmp.le.s32.totalorder %v14312_v15, 6  ;;  %14315 = vst [vmem:[#allocation79_spill] sm:$0xff] %v10879_v13  ;;  %v14317_v32 = vsel %vm10884_vm10, 4294967295, %v14316_v32  ;;  %v10902_v26 = vpack.c.bf16 %v10875_v23, %v10806_v25 }
 0x1af   : > { %14318 = vst [vmem:[#allocation80_spill] sm:$0xff] %v14317_v32  ;;  %vm10890_vm11 = vcmp.ge.s32.totalorder %v14319_v33, 1  ;;  %vm10896_vm12 = vcmp.ge.s32.totalorder %v14322_v37, 1  ;;  %v3008_v33 = vrot.slane %v10715_v38, 7  ;;  %v1622_v37 = vsel %vm14066_vm1, %v1605_v57, %v14325_v10  ;;  %vm11098_vm9 = vmpackc.low %vm10869_vm8, %vm10863_vm7 }
 0x1b0   : > { %v14326_v25 = vmov 0  ;;  %v10923_v11 = vsel %vm14066_vm1, %v1604_v51, %v1605_v57  ;;  %v10927_v17 = vsel %vm14071_vm0, %v1701_v62, %v1702_v35  ;;  %v14330_v42 = vrot.slane %v10329_v54, 1  ;;  %v9156_v62 = vld [vmem:[%s13918_s3 + $0x100] sm:$0xff]   ;;  %vm11119_vm7 = vmpackc.low %vm10896_vm12, %vm10890_vm11 }
 0x1b1   : > { %v14327_v25 = vsel %vm10917_vm13, 4294967295, %v14326_v25  ;;  %14329 = vst [vmem:[#allocation82_spill] sm:$0xff] %v10927_v17  ;;  %v7062_v1 = vpack.c.bf16 %v1622_v37, %v14251_v14  ;;  %v7086_v5 = vpack.c.bf16 %v10384_v47, %v1622_v37  ;;  %v14332_v51 = vmov 0  ;;  %v9166_v37 = vld [vmem:[%s13918_s3 + $0x180] sm:$0xff]  }
 0x1b2   : > { %14328 = vst [vmem:[#allocation81_spill] sm:$0xff] %v14327_v25  ;;  %v10933_v10 = vsel %vm14071_vm0, %v1702_v35, %v14330_v42  ;;  %v14333_v51 = vsel %vm10940_vm14, 4294967295, %v14332_v51  ;;  %v10951_v42 = vpack.c.bf16 %v10927_v17, %v10879_v13  ;;  %v14335_v47 = vmov 0  ;;  %v9157_v35 = vld [vmem:[%s13918_s3 + $0x148] sm:$0xff]  }
 0x1b3   : > { %14331 = vst [vmem:[#allocation83_spill] sm:$0xff] %v10933_v10  ;;  %14334 = vst [vmem:[#allocation84_spill] sm:$0xff] %v14333_v51  ;;  %v14336_v47 = vsel %vm10957_vm15, 4294967295, %v14335_v47  ;;  %v10968_v57 = vmax.f32 %v10599_v22, 0.0  ;;  %v10974_v18 = vsel %vm14071_vm0, %v3086_v8, %v3087_v44  ;;  %v3009_v6 = vrot.slane %v10730_v19, 7  ;;  %7063 = vmatmul.mubr.msk.bf16.vlgmr.msra.gmra.mrb[48].mxu1 %vm10884_vm10, %v7062_v1  ;;  %7087 = vmatprep.mubr.msk.bf16.mxu0 %vm10917_vm13, %v7086_v5  ;;  %v9167_v22 = vld [vmem:[%s13918_s3 + $0x1c8] sm:$0xff]  }
 0x1b4   : > { %14337 = vst [vmem:[#allocation85_spill] sm:$0xff] %v14336_v47  ;;  %14339 = vst [vmem:[#allocation87_spill] sm:$0xff] %v10974_v18  ;;  %v10986_v20 = vpack.c.bf16 %v10974_v18, %v10857_v49  ;;  %v10990_v8 = vsel %vm14066_vm1, %v3007_v48, %v3008_v33  ;;  %v3089_v32 = vrot.slane %v10730_v19, 1  ;;  %2543 = vmatprep.mubr.bf16.mxu1 %v10409_v43  ;;  %7090 = vmatmul.mubr.msk.bf16.vlgmr.msra.gmra.mrb[32].mxu0 %vm10940_vm14, %v10608_v28  ;;  %v9158_v28 = vld [vmem:[%s13918_s3 + $0x108] sm:$0xff]   ;;  %v14434_v18 = vld [vmem:[#allocation37_spill] sm:$0xff] }
 0x1b5   : > { %14338 = vst [vmem:[#allocation86_spill] sm:$0xff] %v10968_v57  ;;  %14341 = vst [vmem:[#allocation89_spill] sm:$0xff] %v10990_v8  ;;  %v10999_v1 = vmax.f32 %v10618_v55, 0.0  ;;  %v11003_v5 = vsel %vm14066_vm1, %v3008_v33, %v3009_v6  ;;  %v3010_v48 = vrot.slane %v10642_v45, 7  ;;  %7925 = vmatpush3.bf16.msra.mxu1 %v9156_v62  ;;  %v14344_v17 = vpack.c.bf16 %v10442_v3, %v10424_v41  ;;  %v9159_v3 = vld [vmem:[%s13918_s3 + $0x150] sm:$0xff]  }
 0x1b6   : > { %14340 = vst [vmem:[#allocation88_spill] sm:$0xff] %v10986_v20  ;;  %14343 = vst [vmem:[#allocation91_spill] sm:$0xff] %v11003_v5  ;;  %v3011_v20 = vrot.slane %v10721_v39, 7  ;;  %v11019_v33 = vsel %vm14071_vm0, %v3088_v12, %v3089_v32  ;;  %v11023_v62 = vsel %vm14071_vm0, %v3087_v44, %v3088_v12  ;;  %v3090_v41 = vrot.slane %v10642_v45, 1  ;;  %7926 = vmatprep.subr.bf16.mxu1 %v9157_v35  ;;  %v9168_v44 = vld [vmem:[%s13918_s3 + $0x188] sm:$0xff]  }
 0x1b7   : > { %14342 = vst [vmem:[#allocation90_spill] sm:$0xff] %v10999_v1  ;;  %7093 = vmatprep.mubr.msk.bf16.mxu0 %vm10957_vm15, %v14344_v17  ;;  %v14345_v17 = vand.u32 7, %v10339_v27  ;;  %v14348_v55 = vand.u32 7, %v10342_v9  ;;  %7989 = vmatpush3.bf16.msra.mxu0 %v9166_v37  ;;  %v11046_v35 = vpack.c.bf16 %v11019_v33, %v11023_v62  ;;  %v11054_v9 = vsel %vm14066_vm1, %v3009_v6, %v3010_v48  ;;  %v9171_v6 = vld [vmem:[%s13918_s3 + $0x1d0] sm:$0xff]  }
 0x1b8   : > { %v11050_v27 = vsel %vm14066_vm1, %v3010_v48, %v3011_v20  ;;  %14353 = vst [vmem:[#allocation94_spill] sm:$0xff] %v11054_v9  ;;  %v14354_v37 = vand.u32 7, %v10349_v16  ;;  %7990 = vmatprep.subr.bf16.mxu0 %v9167_v22  ;;  %v11073_v48 = vmax.f32 %v10705_v52, 0.0  ;;  %v11079_v12 = vsel %vm14071_vm0, %v3089_v32, %v3090_v41  ;;  %v9392_v32 = vld [vmem:[%s13924_s9 + $0x38] ss:$12 sps:$4 sm:$0xff]  }
 0x1b9   : > { %vm11031_vm2 = vcmp.le.s32.totalorder %v14345_v17, 6  ;;  %vm11037_vm3 = vcmp.le.s32.totalorder %v14348_v55, 6  ;;  %14351 = vst [vmem:[#allocation92_spill] sm:$0xff] %v11046_v35  ;;  %14352 = vst [vmem:[#allocation93_spill] sm:$0xff] %v11050_v27  ;;  %v14355_v55 = vmov 0  ;;  %v14358_v17 = vand.u32 7, %v10352_v34  ;;  %7927 = vmatpush3.bf16.msra.mxu1 %v9158_v28 }
 0x1ba   : > { %vm11059_vm5 = vcmp.ge.s32.totalorder %v14354_v37, 1  ;;  %14361 = vst [vmem:[#allocation96_spill] sm:$0xff] %v11073_v48  ;;  %v14362_v13 = vrot.slane %v10721_v39, 1  ;;  %v3013_v25 = vrot.slane %v10968_v57, 7  ;;  %v11091_v52 = vpack.c.bf16 %v10611_v31, %v10597_v4  ;;  %7928 = vmatprep.subr.bf16.mxu1 %v9159_v3  ;;  %vm11240_vm8 = vmpackc.low %vm11037_vm3, %vm11031_vm2 }
 0x1bb   : > { %v14356_v55 = vsel %vm11059_vm5, 4294967295, %v14355_v55  ;;  %vm11065_vm6 = vcmp.ge.s32.totalorder %v14358_v17, 1  ;;  %v3012_v17 = vrot.slane %v10821_v58, 7  ;;  %v3093_v59 = vrot.slane %v10968_v57, 1  ;;  %7991 = vmatpush3.bf16.msra.mxu0 %v9168_v44  ;;  %7066 = vmatmul.mubr.msk.bf16.gmra.mrb[52].mxu1 %vm10957_vm15, %v10433_v21  ;;  %v9173_v44 = vld [vmem:[%s13918_s3 + $0x1d8] sm:$0xff]  }
 0x1bc   : > { %14357 = vst [vmem:[#allocation95_spill] sm:$0xff] %v14356_v55  ;;  %v11086_v22 = vsel %vm14071_vm0, %v3090_v41, %v14362_v13  ;;  %14364 = vst [vmem:[#allocation98_spill] sm:$0xff] %v11091_v52  ;;  %v9160_v13 = vld [vmem:[%s13918_s3 + $0x110] sm:$0xff]   ;;  %v3014_v61 = vrot.slane %v10761_v7, 7  ;;  %v14369_v28 = vmov 0  ;;  %v9161_v52 = vld [vmem:[%s13918_s3 + $0x158] sm:$0xff]   ;;  %v11136_v15 = vpack.c.bf16 %v10834_v50, %v10727_v30  ;;  %7992 = vmatprep.subr.bf16.mxu0 %v9171_v6  ;;  %2551 = vmatprep.mubr.bf16.mxu1 %v10476_v29 }
 0x1bd   : > { %14363 = vst [vmem:[#allocation97_spill] sm:$0xff] %v11086_v22  ;;  %v11107_v41 = vpack.c.bf16 %v11086_v22, %v11079_v12  ;;  %v11111_v37 = vsel %vm14066_vm1, %v3011_v20, %v3012_v17  ;;  %v14370_v28 = vsel %vm11119_vm7, 4294967295, %v14369_v28  ;;  %v9172_v20 = vld [vmem:[%s13918_s3 + $0x190] sm:$0xff]   ;;  %v3015_v53 = vrot.slane %v10850_v0, 7  ;;  %7096 = vmatmul.mubr.msk.bf16.gmra.mrb[36].mxu0 %vm11098_vm9, %v10455_v60  ;;  %7929 = vmatpush3.bf16.msra.mxu1 %v9160_v13  ;;  %vm11266_vm11 = vmpackc.low %vm11065_vm6, %vm11059_vm5  ;;  %v14403_v29 = vld [vmem:[#allocation24_spill] sm:$0xff] }
 0x1be   : > { %14368 = vst [vmem:[#allocation100_spill] sm:$0xff] %v11111_v37  ;;  %14371 = vst [vmem:[#allocation101_spill] sm:$0xff] %v14370_v28  ;;  %v11140_v3 = vpack.c.bf16 %v10715_v38, %v10629_v63  ;;  %v14375_v27 = vrot.slane %v10821_v58, 1  ;;  %v3094_v50 = vrot.slane %v10761_v7, 1  ;;  %v11166_v6 = vmax.f32 %v10616_v24, 0.0  ;;  %v9162_v24 = vld [vmem:[%s13918_s3 + $0x118] sm:$0xff]   ;;  %7930 = vmatprep.subr.bf16.mxu1 %v9161_v52 }
 0x1bf   : > { %14367 = vst [vmem:[#allocation99_spill] sm:$0xff] %v11107_v41  ;;  %v11131_v41 = vsel %vm14066_vm1, %v3012_v17, %v3013_v25  ;;  %14373 = vst [vmem:[#allocation103_spill] sm:$0xff] %v11136_v15  ;;  %v11170_v17 = vsel %vm14066_vm1, %v3014_v61, %v3015_v53  ;;  %v14379_v37 = vpack.c.bf16 %v10507_v56, %v10490_v36  ;;  %v3017_v60 = vrot.slane %v11073_v48, 7  ;;  %v9163_v56 = vld [vmem:[%s13918_s3 + $0x160] sm:$0xff]   ;;  %v14515_v22 = vld [vmem:[#allocation29_spill] sm:$0xff] }
 0x1c0   : > { %14372 = vst [vmem:[#allocation102_spill] sm:$0xff] %v11131_v41  ;;  %14374 = vst [vmem:[#allocation104_spill] sm:$0xff] %v11140_v3  ;;  %v11154_v15 = vsel %vm14071_vm0, %v14375_v27, %v3093_v59  ;;  %v11158_v3 = vsel %vm14066_vm1, %v3013_v25, %v3014_v61  ;;  %v3095_v27 = vrot.slane %v10850_v0, 1  ;;  %v3016_v25 = vrot.slane %v10999_v1, 7  ;;  %7993 = vmatpush3.bf16.msra.mxu0 %v9172_v20  ;;  %v9177_v20 = vld [vmem:[%s13918_s3 + $0x1e0] sm:$0xff]  }
 0x1c1   : > { %14376 = vst [vmem:[#allocation105_spill] sm:$0xff] %v11158_v3  ;;  %14377 = vst [vmem:[#allocation106_spill] sm:$0xff] %v11166_v6  ;;  %7099 = vmatprep.mubr.msk.bf16.mxu0 %vm11119_vm7, %v14379_v37  ;;  %v11186_v61 = vsel %vm14071_vm0, %v3093_v59, %v3094_v50  ;;  %v11191_v36 = vpack.c.bf16 %v10990_v8, %v10828_v46  ;;  %v9174_v37 = vld [vmem:[%s13918_s3 + $0x198] sm:$0xff]   ;;  %v11209_v52 = vpack.c.bf16 %v10642_v45, %v10730_v19  ;;  %v14410_v28 = vmov 0 }
 0x1c2   : > { %14378 = vst [vmem:[#allocation107_spill] sm:$0xff] %v11170_v17  ;;  %14380 = vst [vmem:[#allocation108_spill] sm:$0xff] %v11186_v61  ;;  %v11201_v13 = vsel %vm14071_vm0, %v3094_v50, %v3095_v27  ;;  %v11205_v59 = vsel %vm14066_vm1, %v3015_v53, %v3016_v25  ;;  %v3096_v30 = vrot.slane %v10999_v1, 1  ;;  %7994 = vmatprep.subr.bf16.mxu0 %v9173_v44  ;;  %v3097_v53 = vrot.slane %v11073_v48, 1  ;;  %v9164_v44 = vld [vmem:[%s13918_s3 + $0x120] sm:$0xff]   ;;  %v14392_v46 = vld [vmem:[#allocation46_spill] sm:$0xff] }
 0x1c3   : > { %14381 = vst [vmem:[#allocation109_spill] sm:$0xff] %v11191_v36  ;;  %14382 = vst [vmem:[#allocation110_spill] sm:$0xff] %v11201_v13  ;;  %v11217_v36 = vpack.c.bf16 %v11201_v13, %v11186_v61  ;;  %v11221_v50 = vsel %vm14066_vm1, %v3016_v25, %v3017_v60  ;;  %v3018_v8 = vrot.slane %v11166_v6, 7  ;;  %7931 = vmatpush3.bf16.msra.mxu1 %v9162_v24  ;;  %v3098_v24 = vrot.slane %v11166_v6, 1 }
 0x1c4   : > { %14383 = vst [vmem:[#allocation111_spill] sm:$0xff] %v11205_v59  ;;  %14384 = vst [vmem:[#allocation112_spill] sm:$0xff] %v11209_v52  ;;  %v14386_v52 = vld [vmem:[#allocation15_spill] sm:$0xff]  ;;  %v11230_v47 = vsel %vm14071_vm0, %v3095_v27, %v3096_v30  ;;  %v11249_v27 = vsel %vm14071_vm0, %v3096_v30, %v3097_v53  ;;  %7932 = vmatprep.subr.bf16.mxu1 %v9163_v56  ;;  %v9169_v30 = vld [vmem:[%s13918_s3 + $0x168] sm:$0xff]   ;;  %7995 = vmatpush3.bf16.msra.mxu0 %v9174_v37  ;;  %v3099_v37 = vrot.slane %v14392_v46, 1 }
 0x1c5   : > { %14385 = vst [vmem:[#allocation113_spill] sm:$0xff] %v11217_v36  ;;  %14387 = vst [vmem:[#allocation15_spill] sm:$0xff] %v11230_v47  ;;  %v11234_v36 = vpack.c.bf16 %v11054_v9, %v11003_v5  ;;  %v14393_v9 = vrot.slane %v14392_v46, 7  ;;  %v11259_v10 = vsel %vm14066_vm1, %v3017_v60, %v3018_v8  ;;  %v9178_v60 = vld [vmem:[%s13918_s3 + $0x1a0] sm:$0xff]   ;;  %v11286_v56 = vpack.c.bf16 %v11249_v27, %v11230_v47  ;;  %v14507_v46 = vld [vmem:[#allocation21_spill] sm:$0xff] }
 0x1c6   : > { %14391 = vst [vmem:[#allocation115_spill] sm:$0xff] %v11249_v27  ;;  %14395 = vst [vmem:[#allocation117_spill] sm:$0xff] %v11259_v10  ;;  %7069 = vmatmul.mubr.msk.bf16.gmra.mrb[56].mxu1 %vm11119_vm7, %v14403_v29  ;;  %7996 = vmatprep.subr.bf16.mxu0 %v9177_v20  ;;  %v11307_v55 = vpack.c.bf16 %v11158_v3, %v11131_v41  ;;  %v14409_v20 = vand.u32 7, %v10349_v16  ;;  %v14415_v3 = vld [vmem:[#allocation34_spill] sm:$0xff]  ;;  %v14416_v41 = vld [vmem:[#allocation31_spill] sm:$0xff]  ;;  %v14418_v16 = vand.u32 7, %v10352_v34 }
 0x1c7   : > { %14388 = vst [vmem:[#allocation114_spill] sm:$0xff] %v11234_v36  ;;  %v11255_v51 = vsel %vm14066_vm1, %v3018_v8, %v14393_v9  ;;  %v14396_v36 = vmov 0  ;;  %v14399_v8 = vrot.slane %v10597_v4, 1  ;;  %v14400_v9 = vld [vmem:[#allocation38_spill] sm:$0xff]  ;;  %v9179_v4 = vld [vmem:[%s13918_s3 + $0x1e8] sm:$0xff]   ;;  %7933 = vmatpush3.bf16.msra.mxu1 %v9164_v44  ;;  %v11357_v34 = vpack.c.bf16 %v11166_v6, %v11073_v48 }
 0x1c8   : > { %14394 = vst [vmem:[#allocation116_spill] sm:$0xff] %v11255_v51  ;;  %v14397_v36 = vsel %vm11266_vm11, 4294967295, %v14396_v36  ;;  %v14401_v5 = vrot.slane %v14400_v9, 1  ;;  %14402 = vst [vmem:[#allocation38_spill] sm:$0xff] %v11286_v56  ;;  %v14407_v51 = vld [vmem:[#allocation29_spill] sm:$0xff]  ;;  %v14408_v56 = vld [vmem:[#allocation26_spill] sm:$0xff]  ;;  %7934 = vmatprep.subr.bf16.mxu1 %v9169_v30  ;;  %7997 = vmatpush3.bf16.msra.mxu0 %v9178_v60 }
 0x1c9   : > { %14398 = vst [vmem:[#allocation118_spill] sm:$0xff] %v14397_v36  ;;  %14406 = vst [vmem:[#allocation120_spill] sm:$0xff] %v11307_v55  ;;  %2559 = vmatprep.mubr.bf16.mxu1 %v14407_v51  ;;  %7102 = vmatmul.mubr.msk.bf16.gmra.mrb[40].mxu0 %vm11240_vm8, %v14408_v56  ;;  %vm11315_vm12 = vcmp.le.s32.totalorder %v14409_v20, 6  ;;  %v11329_v55 = vpack.c.bf16 %v11205_v59, %v11170_v17  ;;  %v14417_v56 = vpack.c.bf16 %v14415_v3, %v14416_v41  ;;  %v9170_v41 = vld [vmem:[%s13918_s3 + $0x128] sm:$0xff]   ;;  %v9183_v30 = vld [vmem:[%s13918_s3 + $0x1f0] sm:$0xff]   ;;  %v14437_v20 = vmov 0 }
 0x1ca   : > { %v11282_v35 = vsel %vm14071_vm0, %v14401_v5, %v14399_v8  ;;  %v11299_v5 = vsel %vm14071_vm0, %v3097_v53, %v3098_v24  ;;  %v11303_v8 = vpack.c.bf16 %v10761_v7, %v10968_v57  ;;  %v14411_v28 = vsel %vm11315_vm12, 4294967295, %v14410_v28  ;;  %14426 = vst [vmem:[#allocation31_spill] sm:$0xff] %v11357_v34  ;;  %7998 = vmatprep.subr.bf16.mxu0 %v9179_v4  ;;  %v14443_v27 = vld [vmem:[#allocation36_spill] sm:$0xff] }
 0x1cb   : > { %14404 = vst [vmem:[#allocation24_spill] sm:$0xff] %v11299_v5  ;;  %v11321_v53 = vsel %vm14071_vm0, %v3098_v24, %v3099_v37  ;;  %14414 = vst [vmem:[#allocation123_spill] sm:$0xff] %v11329_v55  ;;  %7105 = vmatprep.mubr.msk.bf16.mxu0 %vm11266_vm11, %v14417_v56  ;;  %vm11338_vm2 = vcmp.le.s32.totalorder %v14418_v16, 6  ;;  %v14421_v24 = vld [vmem:[#allocation12_spill] sm:$0xff]  ;;  %v14427_v16 = vand.u32 7, %v14386_v52  ;;  %v11366_v44 = vadd.s32 80, %v10295_v2  ;;  %7935 = vmatpush3.bf16.msra.mxu1 %v9170_v41 }
 0x1cc   : > { %14405 = vst [vmem:[#allocation119_spill] sm:$0xff] %v11303_v8  ;;  %14412 = vst [vmem:[#allocation121_spill] sm:$0xff] %v11321_v53  ;;  %v11325_v8 = vpack.c.bf16 %v10999_v1, %v10850_v0  ;;  %v14422_v51 = vand.u32 7, %v14421_v24  ;;  %v11353_v56 = vpack.c.bf16 %v11321_v53, %v11299_v5  ;;  %v9175_v55 = vld [vmem:[%s13918_s3 + $0x170] sm:$0xff]   ;;  %v11376_v34 = vpack.c.bf16 %v11259_v10, %v11221_v50  ;;  %v14445_v5 = vld [vmem:[#allocation42_spill] sm:$0xff] }
 0x1cd   : > { %vm11361_vm6 = vcmp.ge.s32.totalorder %v14427_v16, 1  ;;  %v11381_v59 = vadd.s32 88, %v10295_v2  ;;  %v14431_v49 = vrot.slane %v10821_v58, 1  ;;  %v14432_v4 = vrot.slane %v10721_v39, 1  ;;  %vm11410_vm1 = vmpackc.low %vm11338_vm2, %vm11315_vm12  ;;  %7936 = vmatprep.subr.bf16.mxu1 %v9175_v55  ;;  %v14461_v53 = vld [vmem:[#allocation50_spill] sm:$0xff] }
 0x1ce   : > { %14413 = vst [vmem:[#allocation122_spill] sm:$0xff] %v11325_v8  ;;  %vm11344_vm3 = vcmp.ge.s32.totalorder %v14422_v51, 1  ;;  %14425 = vst [vmem:[#allocation34_spill] sm:$0xff] %v11353_v56  ;;  %v9180_v56 = vld [vmem:[%s13918_s3 + $0x1a8] sm:$0xff]   ;;  %v1683_v17 = vpack.c.bf16 %v14434_v18, %v14251_v14  ;;  %v14435_v16 = vmov 0  ;;  %v1520_v41 = vand.u32 7, %v11366_v44 }
 0x1cf   : > { %14430 = vst [vmem:[#allocation12_spill] sm:$0xff] %v11376_v34  ;;  %v11400_v10 = vsel %vm14071_vm0, %v14432_v4, %v14431_v49  ;;  %v14436_v16 = vsel %vm11410_vm1, 4294967295, %v14435_v16  ;;  %v9176_v49 = vld [vmem:[%s13918_s3 + $0x130] sm:$0xff]   ;;  %vm11427_vm2 = vmpackc.low %vm11361_vm6, %vm11344_vm3  ;;  %7999 = vmatpush3.bf16.msra.mxu0 %v9180_v56  ;;  %v9181_v4 = vld [vmem:[%s13918_s3 + $0x178] sm:$0xff]   ;;  %v1521_v55 = vand.u32 7, %v11381_v59  ;;  %v14441_v13 = vrot.slane %v14400_v9, 1 }
 0x1d0   : > { %14433 = vst [vmem:[#allocation124_spill] sm:$0xff] %v11400_v10  ;;  %v14438_v20 = vsel %vm11427_vm2, 4294967295, %v14437_v20  ;;  %v9184_v34 = vld [vmem:[%s13918_s3 + $0x1b0] sm:$0xff]   ;;  %8000 = vmatprep.subr.bf16.mxu0 %v9183_v30  ;;  %v9185_v56 = vld [vmem:[%s13918_s3 + $0x1f8] sm:$0xff]   ;;  %v14444_v30 = vld [vmem:[#allocation43_spill] sm:$0xff]  ;;  %7937 = vmatpush3.bf16.msra.mxu1 %v9176_v49  ;;  %v14454_v57 = vmov 0 }
 0x1d1   : > { %14439 = vst [vmem:[#allocation37_spill] sm:$0xff] %v14438_v20  ;;  %v14440_v44 = vld [vmem:[#allocation33_spill] sm:$0xff]  ;;  %v11457_v60 = vsel %vm14071_vm0, %v3099_v37, %v14441_v13  ;;  %7108 = vmatmul.mubr.msk.bf16.gmra.mrb[44].mxu0 %vm11410_vm1, %v14443_v27  ;;  %v14446_v8 = vpack.c.bf16 %v14444_v30, %v14445_v5  ;;  %v9182_v13 = vld [vmem:[%s13918_s3 + $0x138] sm:$0xff]   ;;  %7938 = vmatprep.subr.bf16.mxu1 %v9181_v4  ;;  %v9187_v49 = vld [vmem:[%s13918_s3 + $0x200] sm:$0xff]   ;;  %vm1568_vm0 = vcmp.ge.s32.totalorder %v1520_v41, 1  ;;  %vm1569_vm10 = vcmp.ge.s32.totalorder %v1521_v55, 1 }
 0x1d2   : > { %7072 = vmatmul.mubr.msk.bf16.gmra.mrb[60].mxu1 %vm11266_vm11, %v14440_v44  ;;  %14442 = vst [vmem:[#allocation33_spill] sm:$0xff] %v11457_v60  ;;  %v9186_v30 = vld [vmem:[%s13918_s3 + $0x1b8] sm:$0xff]   ;;  %v9192_v4 = vld [vmem:[%s13920_s5 + $0xc0] sm:$0xff]   ;;  %vm14450_vm11 = vmmov 1   ;;  %v14458_v51 = vmov 0  ;;  %v14463_v60 = vld [vmem:[#allocation52_spill] sm:$0xff] }
 0x1d3   : > { %2567 = vmatprep.mubr.bf16.mxu1 %v1683_v17  ;;  %7111 = vmatprep.mubr.msk.bf16.mxu0 %vm11427_vm2, %v14446_v8  ;;  %v14447_v17 = vand.u32 7, %v14386_v52  ;;  %v1490_v8 = vadd.s32 96, %v10295_v2  ;;  %v1491_v52 = vadd.s32 104, %v10295_v2  ;;  %vm11494_vm12 = vmpackc.low %vm11361_vm6, %vm14450_vm11  ;;  %v14477_v7 = vmov 0  ;;  %v9206_v37 = vld [vmem:[%s13918_s3 + $0x238] sm:$0xff]  }
 0x1d4   : > { %8001 = vmatpush3.bf16.msra.mxu0 %v9184_v34  ;;  %v14451_v34 = vmov 0  ;;  %7939 = vmatpush3.bf16.msra.mxu1 %v9182_v13  ;;  %vm11509_vm2 = vmpackc.low %vm1569_vm10, %vm1568_vm0  ;;  %v14462_v13 = vld [vmem:[#allocation55_spill] sm:$0xff]  ;;  %vm1584_vm0 = vcmp.le.s32.totalorder %v1520_v41, 6  ;;  %vm1585_vm10 = vcmp.le.s32.totalorder %v1521_v55, 6  ;;  %v14472_v55 = vld [vmem:[#allocation62_spill] sm:$0xff]  ;;  %v14491_v0 = vand.u32 7, %v10295_v2 }
 0x1d5   : > { %vm11476_vm3 = vcmp.le.s32.totalorder %v14447_v17, 6  ;;  %8002 = vmatprep.subr.bf16.mxu0 %v9185_v56  ;;  %v14452_v34 = vsel %vm11494_vm12, 4294967295, %v14451_v34  ;;  %v7074_v17 = vpack.c.bf16 %v14445_v5, %v14251_v14  ;;  %v14457_v56 = vld [vmem:[#allocation44_spill] sm:$0xff]  ;;  %v14459_v51 = vsel %vm11509_vm2, 4294967295, %v14458_v51  ;;  %8724 = vmatprep.subr.bf16.mxu1 %v9187_v49 }
 0x1d6   : > { %14453 = vst [vmem:[#allocation36_spill] sm:$0xff] %v14452_v34  ;;  %vm11503_vm14 = vmpackc.low %vm11476_vm3, %vm14450_vm11  ;;  %v7113_v59 = vpack.c.bf16 %v14457_v56, %v14251_v14  ;;  %v1522_v5 = vand.u32 7, %v1490_v8  ;;  %v1523_v6 = vand.u32 7, %v1491_v52  ;;  %v14464_v1 = vpack.c.bf16 %v14462_v13, %v14463_v60  ;;  %v14471_v60 = vld [vmem:[#allocation54_spill] sm:$0xff]  ;;  %v14475_v13 = vld [vmem:[#allocation65_spill] sm:$0xff] }
 0x1d7   : > { %v14455_v57 = vsel %vm11503_vm14, 4294967295, %v14454_v57  ;;  %14460 = vst [vmem:[#allocation42_spill] sm:$0xff] %v14459_v51  ;;  %v1493_v8 = vadd.s32 120, %v10295_v2  ;;  %v14465_v52 = vmov 0  ;;  %v14492_v47 = vmov 0 }
 0x1d8   : > { %14456 = vst [vmem:[#allocation43_spill] sm:$0xff] %v14455_v57  ;;  %8003 = vmatpush3.bf16.msra.mxu0 %v9186_v30  ;;  %vm1570_vm6 = vcmp.ge.s32.totalorder %v1522_v5, 1  ;;  %vm1571_vm11 = vcmp.ge.s32.totalorder %v1523_v6, 1  ;;  %v1492_v30 = vadd.s32 112, %v10295_v2  ;;  %v14501_v2 = vld [vmem:[#allocation8_spill] sm:$0xff] }
 0x1d9   : > { %8132 = vmatprep.subr.bf16.mxu0 %v9192_v4  ;;  %7114 = vmatmul.mubr.msk.bf16.gmra.mrb[48].mxu0 %vm11503_vm14, %v7113_v59  ;;  %vm11529_vm5 = vmpackc.low %vm1571_vm11, %vm1570_vm6  ;;  %v14468_v59 = vmov 0  ;;  %v1525_v41 = vand.u32 7, %v1493_v8  ;;  %v14473_v4 = vld [vmem:[#allocation57_spill] sm:$0xff]  ;;  %vm1586_vm11 = vcmp.le.s32.totalorder %v1522_v5, 6  ;;  %v14482_v8 = vmov 0 }
 0x1da   : > { %7075 = vmatmul.mubr.msk.bf16.gmra.mrb[64].mxu1 %vm11494_vm12, %v7074_v17  ;;  %7117 = vmatprep.mubr.msk.bf16.mxu0 %vm11509_vm2, %v14464_v1  ;;  %vm11525_vm12 = vmpackc.low %vm1585_vm10, %vm1584_vm0  ;;  %v14469_v59 = vsel %vm11529_vm5, 4294967295, %v14468_v59  ;;  %v1524_v1 = vand.u32 7, %v1492_v30  ;;  %v14474_v17 = vld [vmem:[#allocation68_spill] sm:$0xff]  ;;  %vm1587_vm0 = vcmp.le.s32.totalorder %v1523_v6, 6  ;;  %v14479_v30 = vmov 0  ;;  %v14487_v6 = vld [vmem:[#allocation70_spill] sm:$0xff] }
 0x1db   : > { %2575 = vmatprep.mubr.bf16.mxu1 %v14461_v53  ;;  %v14466_v52 = vsel %vm11525_vm12, 4294967295, %v14465_v52  ;;  %14470 = vst [vmem:[#allocation50_spill] sm:$0xff] %v14469_v59  ;;  %v14476_v48 = vpack.c.bf16 %v14474_v17, %v14475_v13  ;;  %vm1573_vm6 = vcmp.ge.s32.totalorder %v1525_v41, 1  ;;  %vm11549_vm14 = vmpackc.low %vm1587_vm0, %vm1586_vm11  ;;  %v14485_v17 = vld [vmem:[#allocation67_spill] sm:$0xff]  ;;  %v14488_v5 = vpack.c.bf16 %v10923_v11, %v10875_v23 }
 0x1dc   : > { %14467 = vst [vmem:[#allocation44_spill] sm:$0xff] %v14466_v52  ;;  %vm11545_vm10 = vcmp.ge.s32.totalorder %v1524_v1, 1  ;;  %v14480_v30 = vsel %vm11549_vm14, 4294967295, %v14479_v30  ;;  %vm11571_vm11 = vcmp.le.s32.totalorder %v1524_v1, 6  ;;  %vm1589_vm0 = vcmp.le.s32.totalorder %v1525_v41, 6  ;;  %v14499_v1 = vld [vmem:[#allocation10_spill] sm:$0xff] }
 0x1dd   : > { %v14478_v7 = vsel %vm11545_vm10, 4294967295, %v14477_v7  ;;  %14481 = vst [vmem:[#allocation55_spill] sm:$0xff] %v14480_v30  ;;  %v14495_v23 = vmov 0  ;;  %v14502_v61 = vpack.c.bf16 %v14501_v2, %v10329_v54  ;;  %v9189_v2 = vld [vmem:[%s13918_s3 + $0x210] sm:$0xff]   ;;  %v9195_v54 = vld [vmem:[%s13920_s5 + $0x88] sm:$0xff]   ;;  %v3076_v13 = vpack.c.bf16 %v14400_v9, %v14251_v14 }
 0x1e1   : > { %7120 = vmatmul.mubr.msk.bf16.gmra.mrb[52].mxu0 %vm11525_vm12, %v14473_v4 }
 0x1e2   : > { %7078 = vmatmul.mubr.msk.bf16.gmra.mrb[68].mxu1 %vm11509_vm2, %v14471_v60  ;;  %7123 = vmatprep.mubr.msk.bf16.mxu0 %vm11529_vm5, %v14476_v48  ;;  %vm11555_vm2 = vmpackc.low %vm1573_vm6, %vm11545_vm10  ;;  %v14486_v48 = vld [vmem:[#allocation75_spill] sm:$0xff]  ;;  %vm1574_vm6 = vcmp.le.s32.totalorder %v14491_v0, 6  ;;  %v14498_v0 = vld [vmem:[#allocation16_spill] sm:$0xff] }
 0x1e3   : > { %2583 = vmatprep.mubr.bf16.mxu1 %v14472_v55  ;;  %v14483_v8 = vsel %vm11555_vm2, 4294967295, %v14482_v8  ;;  %vm11579_vm10 = vmpackc.low %vm1589_vm0, %vm11571_vm11  ;;  %v14500_v41 = vpack.c.bf16 %v14498_v0, %v14499_v1  ;;  %v9194_v0 = vld [vmem:[%s13920_s5 + $0xc8] sm:$0xff]   ;;  %v14503_v1 = vld [vmem:[#allocation23_spill] sm:$0xff] }
 0x1e4   : > { %14484 = vst [vmem:[#allocation52_spill] sm:$0xff] %v14483_v8  ;;  %v14493_v47 = vsel %vm11579_vm10, 4294967295, %v14492_v47 }
 0x1e5   : > { %14494 = vst [vmem:[#allocation54_spill] sm:$0xff] %v14493_v47 }
 0x1e9   : > { %7126 = vmatmul.mubr.msk.bf16.gmra.mrb[56].mxu0 %vm11549_vm14, %v14487_v6 }
 0x1ea   : > { %7081 = vmatmul.mubr.msk.bf16.gmra.mrb[72].mxu1 %vm11529_vm5, %v14485_v17  ;;  %7129 = vmatprep.mubr.msk.bf16.mxu0 %vm11555_vm2, %v14488_v5  ;;  %vm11585_vm5 = vmpackc.low %vm10770_vm4, %vm1574_vm6  ;;  %v9193_v5 = vld [vmem:[%s13920_s5 + $0x80] sm:$0xff]  }
 0x1eb   : > { %2591 = vmatprep.mubr.bf16.mxu1 %v14486_v48  ;;  %v14496_v23 = vsel %vm11585_vm5, 4294967295, %v14495_v23 }
 0x1ec   : > { %14497 = vst [vmem:[#allocation62_spill] sm:$0xff] %v14496_v23 }
 0x1f1   : > { %7132 = vmatmul.mubr.msk.bf16.gmra.mrb[60].mxu0 %vm11579_vm10, %v10951_v42 }
 0x1f2   : > { %7084 = vmatmul.mubr.msk.bf16.gmra.mrb[76].mxu1 %vm11555_vm2, %v10902_v26  ;;  %2826 = vmatprep.mubr.bf16.mxu0 %v10409_v43  ;;  %vm14530_vm2 = vmmov 1   ;;  %v9339_v43 = vld [vmem:[%s13924_s9 + $0x30] ss:$12 sps:$4 sm:$0xff]  }
 0x1f3   : > { %7135 = vmatprep.mubr.msk.bf16.mxu1 %vm11585_vm5, %v14500_v41  ;;  %v14504_v41 = vld [vmem:[#allocation17_spill] sm:$0xff] }
 0x1f4   : > { %v14505_v45 = vpack.c.bf16 %v14503_v1, %v14504_v41  ;;  %v14512_v1 = vld [vmem:[#allocation25_spill] sm:$0xff] }
 0x1f9   : > { %7159 = vmatmul.mubr.msk.bf16.vlgmr.msra.gmra.mrb[64].mxu0 %vm10917_vm13, %v10433_v21  ;;  %v9190_v21 = vld [vmem:[%s13918_s3 + $0x218] sm:$0xff]  }
 0x1fa   : > { %2730 = vmatmul.mubr.bf16.vlgmr.msra.gmra.mrb[80].mxu1 %v14502_v61  ;;  %2834 = vmatprep.mubr.bf16.mxu0 %v14507_v46  ;;  %v9198_v46 = vld [vmem:[%s13920_s5 + $0x90] sm:$0xff]  }
 0x1fb   : > { %7138 = vmatprep.mubr.msk.bf16.mxu1 %vm11098_vm9, %v14505_v45  ;;  %8725 = vmatpush3.bf16.msra.mxu1 %v9187_v49  ;;  %v9197_v45 = vld [vmem:[%s13920_s5 + $0xd0] sm:$0xff]   ;;  %v14509_v49 = vld [vmem:[#allocation11_spill] sm:$0xff] }
 0x1fc   : > { %8726 = vmatprep.subr.bf16.mxu1 %v9188_v40  ;;  %8133 = vmatpush3.bf16.msra.mxu0 %v9193_v5  ;;  %v14508_v61 = vld [vmem:[#allocation13_spill] sm:$0xff] }
 0x1fd   : > { %8134 = vmatprep.subr.bf16.mxu0 %v9194_v0  ;;  %v14510_v5 = vpack.c.bf16 %v14508_v61, %v14509_v49  ;;  %v9199_v0 = vld [vmem:[%s13920_s5 + $0xd8] sm:$0xff]   ;;  %v9202_v49 = vld [vmem:[%s13920_s5 + $0xe0] sm:$0xff]  }
 0x1fe   : > { %v9200_v61 = vld [vmem:[%s13920_s5 + $0x98] sm:$0xff]  }
 0x1ff   : > { %8727 = vmatpush3.bf16.msra.mxu1 %v9188_v40  ;;  %v14511_v40 = vld [vmem:[#allocation32_spill] sm:$0xff] }
 0x200   : > { %8728 = vmatprep.subr.bf16.mxu1 %v9189_v2  ;;  %8135 = vmatpush3.bf16.msra.mxu0 %v9195_v54  ;;  %v14513_v41 = vpack.c.bf16 %v14511_v40, %v14512_v1  ;;  %v14520_v1 = vld [vmem:[#allocation48_spill] sm:$0xff] }
 0x201   : > { %8136 = vmatprep.subr.bf16.mxu0 %v9197_v45  ;;  %7162 = vmatmul.mubr.msk.bf16.gmra.mrb[68].mxu0 %vm10957_vm15, %v14403_v29  ;;  %v9191_v45 = vld [vmem:[%s13918_s3 + $0x220] sm:$0xff]   ;;  %v9196_v29 = vld [vmem:[%s13918_s3 + $0x228] sm:$0xff]  }
 0x202   : > { %2738 = vmatmul.mubr.bf16.gmra.mrb[84].mxu1 %v14510_v5  ;;  %2842 = vmatprep.mubr.bf16.mxu0 %v14515_v22  ;;  %v9203_v22 = vld [vmem:[%s13920_s5 + $0xa0] sm:$0xff]  }
 0x203   : > { %7141 = vmatprep.mubr.msk.bf16.mxu1 %vm11240_vm8, %v14513_v41  ;;  %8729 = vmatpush3.bf16.msra.mxu1 %v9189_v2  ;;  %v14516_v2 = vld [vmem:[#allocation20_spill] sm:$0xff]  ;;  %v14521_v41 = vld [vmem:[#allocation35_spill] sm:$0xff] }
 0x204   : > { %8730 = vmatprep.subr.bf16.mxu1 %v9190_v21  ;;  %8137 = vmatpush3.bf16.msra.mxu0 %v9198_v46  ;;  %v14517_v46 = vld [vmem:[#allocation19_spill] sm:$0xff]  ;;  %v14522_v10 = vpack.c.bf16 %v14520_v1, %v14521_v41 }
 0x205   : > { %8138 = vmatprep.subr.bf16.mxu0 %v9199_v0  ;;  %v14518_v5 = vpack.c.bf16 %v14516_v2, %v14517_v46  ;;  %v14519_v0 = vld [vmem:[#allocation28_spill] sm:$0xff]  ;;  %v14524_v2 = vand.u32 7, %v14421_v24  ;;  %v14525_v24 = vmov 0 }
 0x206   : > { %v1875_v40 = vpack.c.bf16 %v14251_v14, %v14519_v0  ;;  %v9205_v46 = vld [vmem:[%s13920_s5 + $0xa8] sm:$0xff]  }
 0x207   : > { %8731 = vmatpush3.bf16.msra.mxu1 %v9190_v21  ;;  %v9204_v21 = vld [vmem:[%s13920_s5 + $0xe8] sm:$0xff]   ;;  %vm1582_vm4 = vcmp.le.s32.totalorder %v14524_v2, 6  ;;  %v9211_v2 = vld [vmem:[%s13920_s5 + $0x40] sm:$0xff]  }
 0x208   : > { %8732 = vmatprep.subr.bf16.mxu1 %v9191_v45  ;;  %8139 = vmatpush3.bf16.msra.mxu0 %v9200_v61  ;;  %vm11696_vm0 = vmpackc.low %vm11476_vm3, %vm1582_vm4  ;;  %vm14543_vm3 = vnez %v14438_v20  ;;  %vm14550_vm4 = vnez %v14459_v51  ;;  %v9346_v54 = vld [vmem:[%s13924_s9 + $0x60] ss:$12 sps:$4 sm:$0xff]  }
 0x209   : > { %8140 = vmatprep.subr.bf16.mxu0 %v9202_v49  ;;  %7165 = vmatmul.mubr.msk.bf16.gmra.mrb[72].mxu0 %vm11119_vm7, %v14440_v44  ;;  %v9201_v49 = vld [vmem:[%s13918_s3 + $0x230] sm:$0xff]   ;;  %v14526_v24 = vsel %vm11696_vm0, 4294967295, %v14525_v24  ;;  %v14528_v44 = vld [vmem:[#allocation95_spill] sm:$0xff] }
 0x20a   : > { %2746 = vmatmul.mubr.bf16.gmra.mrb[88].mxu1 %v14518_v5  ;;  %2850 = vmatprep.mubr.bf16.mxu0 %v1875_v40  ;;  %14527 = vst [vmem:[#allocation57_spill] sm:$0xff] %v14526_v24  ;;  %vm14529_vm6 = vnez %v14528_v44  ;;  %v9208_v5 = vld [vmem:[%s13920_s5 + $0xb0] sm:$0xff]   ;;  %v14534_v40 = vld [vmem:[#allocation27_spill] sm:$0xff] }
 0x20b   : > { %7144 = vmatprep.mubr.msk.bf16.mxu1 %vm11410_vm1, %v14522_v10  ;;  %8733 = vmatpush3.bf16.msra.mxu1 %v9191_v45  ;;  %v9207_v10 = vld [vmem:[%s13920_s5 + $0xf0] sm:$0xff]   ;;  %vm11703_vm1 = vmpackc.low %vm14530_vm2, %vm14529_vm6  ;;  %v14531_v45 = vmov 0  ;;  %vm14558_vm6 = vnez %v14469_v59 }
 0x20c   : > { %8734 = vmatprep.subr.bf16.mxu1 %v9196_v29  ;;  %8141 = vmatpush3.bf16.msra.mxu0 %v9203_v22  ;;  %v14532_v45 = vsel %vm11703_vm1, 4294967295, %v14531_v45  ;;  %v7167_v22 = vpack.c.bf16 %v14251_v14, %v14415_v3  ;;  %v14536_v3 = vld [vmem:[#allocation53_spill] sm:$0xff] }
 0x20d   : > { %8142 = vmatprep.subr.bf16.mxu0 %v9204_v21  ;;  %14533 = vst [vmem:[#allocation68_spill] sm:$0xff] %v14532_v45  ;;  %v14535_v21 = vpack.c.bf16 %v14519_v0, %v14534_v40  ;;  %v14537_v41 = vpack.c.bf16 %v14536_v3, %v14457_v56  ;;  %v9210_v0 = vld [vmem:[%s13920_s5 + $0xb8] sm:$0xff]   ;;  %v9229_v56 = vld [vmem:[%s13920_s5 + $0x1c0] sm:$0xff]  }
 0x20e   : > { %v14547_v40 = vld [vmem:[#allocation79_spill] sm:$0xff] }
 0x20f   : > { %8735 = vmatpush3.bf16.msra.mxu1 %v9196_v29  ;;  %v9209_v29 = vld [vmem:[%s13920_s5 + $0xf8] sm:$0xff]  }
 0x210   : > { %8736 = vmatprep.subr.bf16.mxu1 %v9201_v49  ;;  %8143 = vmatpush3.bf16.msra.mxu0 %v9205_v46  ;;  %v14540_v46 = vld [vmem:[#allocation66_spill] sm:$0xff] }
 0x211   : > { %8144 = vmatprep.subr.bf16.mxu0 %v9207_v10  ;;  %7168 = vmatmul.mubr.msk.bf16.gmra.mrb[76].mxu0 %vm11703_vm1, %v7167_v22  ;;  %v14541_v10 = vld [vmem:[#allocation56_spill] sm:$0xff]  ;;  %v14544_v22 = vld [vmem:[#allocation49_spill] sm:$0xff]  ;;  %vm14559_vm1 = vnez %v14478_v7  ;;  %v14566_v7 = vld [vmem:[#allocation59_spill] sm:$0xff] }
 0x212   : > { %2754 = vmatmul.mubr.bf16.gmra.mrb[92].mxu1 %v14535_v21  ;;  %2858 = vmatprep.mubr.bf16.mxu0 %v14461_v53  ;;  %v14538_v53 = vld [vmem:[#allocation40_spill] sm:$0xff]  ;;  %v14542_v44 = vpack.c.bf16 %v14540_v46, %v14541_v10  ;;  %v14565_v46 = vld [vmem:[#allocation18_spill] sm:$0xff] }
 0x213   : > { %7147 = vmatprep.mubr.msk.bf16.mxu1 %vm11696_vm0, %v14537_v41  ;;  %8737 = vmatpush3.bf16.msra.mxu1 %v9201_v49  ;;  %v14539_v49 = vpack.c.bf16 %v14538_v53, %v14434_v18  ;;  %v14548_v18 = vld [vmem:[#allocation69_spill] sm:$0xff]  ;;  %v14563_v53 = vld [vmem:[#allocation71_spill] sm:$0xff] }
 0x214   : > { %8738 = vmatprep.subr.bf16.mxu1 %v9206_v37  ;;  %8145 = vmatpush3.bf16.msra.mxu0 %v9208_v5  ;;  %v14549_v21 = vpack.c.bf16 %v14547_v40, %v14548_v18  ;;  %v9231_v40 = vld [vmem:[%s13920_s5 + $0x1c8] sm:$0xff]  }
 0x215   : > { %8146 = vmatprep.subr.bf16.mxu0 %v9209_v29  ;;  %v14551_v29 = vld [vmem:[#allocation61_spill] sm:$0xff]  ;;  %v9214_v18 = vld [vmem:[%s13920_s5 + $0x8] sm:$0xff]  }
 0x217   : > { %8739 = vmatpush3.bf16.msra.mxu1 %v9206_v37  ;;  %v14545_v37 = vld [vmem:[#allocation47_spill] sm:$0xff] }
 0x218   : > { %8147 = vmatpush3.bf16.msra.mxu0 %v9210_v0  ;;  %8068 = vmatprep.subr.bf16.mxu1 %v9211_v2  ;;  %v14546_v5 = vpack.c.bf16 %v14544_v22, %v14545_v37  ;;  %v14555_v0 = vld [vmem:[#allocation83_spill] sm:$0xff]  ;;  %v14556_v2 = vld [vmem:[#allocation82_spill] sm:$0xff] }
 0x219   : > { %8260 = vmatprep.subr.bf16.mxu0 %v9229_v56  ;;  %7171 = vmatmul.mubr.msk.bf16.gmra.mrb[80].mxu0 %vm14543_vm3, %v14471_v60  ;;  %v14552_v60 = vld [vmem:[#allocation58_spill] sm:$0xff]  ;;  %v14557_v56 = vpack.c.bf16 %v14555_v0, %v14556_v2  ;;  %v9230_v22 = vld [vmem:[%s13920_s5 + $0x180] sm:$0xff]   ;;  %v14576_v2 = vmov 0 }
 0x21a   : > { %2762 = vmatmul.mubr.bf16.gmra.mrb[96].mxu1 %v14539_v49  ;;  %2866 = vmatprep.mubr.bf16.mxu0 %v14472_v55  ;;  %v14553_v3 = vpack.c.bf16 %v14551_v29, %v14552_v60  ;;  %v14554_v55 = vld [vmem:[#allocation74_spill] sm:$0xff]  ;;  %v9215_v29 = vld [vmem:[%s13920_s5 + $0x50] sm:$0xff]   ;;  %v14572_v60 = vld [vmem:[#allocation72_spill] sm:$0xff] }
 0x21b   : > { %7150 = vmatprep.mubr.msk.bf16.mxu1 %vm11525_vm12, %v14542_v44  ;;  %v1879_v41 = vpack.c.bf16 %v14251_v14, %v14554_v55  ;;  %v14564_v49 = vpack.c.bf16 %v14554_v55, %v14563_v53  ;;  %v9213_v44 = vld [vmem:[%s13920_s5 + $0x48] sm:$0xff]   ;;  %v14569_v37 = vld [vmem:[#allocation26_spill] sm:$0xff] }
 0x21c   : > { %v9217_v53 = vld [vmem:[%s13920_s5 + $0x58] sm:$0xff]  }
 0x221   : > { %7174 = vmatmul.mubr.msk.bf16.gmra.mrb[84].mxu0 %vm14550_vm4, %v14485_v17  ;;  %vm11778_vm4 = vmpackc.low %vm14530_vm2, %vm14559_vm1  ;;  %v14560_v17 = vmov 0 }
 0x222   : > { %2770 = vmatmul.mubr.bf16.gmra.mrb[100].mxu1 %v14546_v5  ;;  %2874 = vmatprep.mubr.bf16.mxu0 %v14486_v48  ;;  %v14561_v17 = vsel %vm11778_vm4, 4294967295, %v14560_v17  ;;  %v7179_v48 = vpack.c.bf16 %v14251_v14, %v10923_v11  ;;  %v9212_v11 = vld [vmem:[%s13920_s5] sm:$0xff]   ;;  %v7306_v5 = vpack.c.bf16 %v11282_v35, %v14251_v14 }
 0x223   : > { %7153 = vmatprep.mubr.msk.bf16.mxu1 %vm11549_vm14, %v14549_v21  ;;  %14562 = vst [vmem:[#allocation65_spill] sm:$0xff] %v14561_v17  ;;  %v14570_v21 = vld [vmem:[#allocation84_spill] sm:$0xff] }
 0x224   : > { %vm14571_vm1 = vnez %v14570_v21 }
 0x229   : > { %7177 = vmatmul.mubr.msk.bf16.gmra.mrb[88].mxu0 %vm14558_vm6, %v10902_v26  ;;  %v14567_v26 = vld [vmem:[#allocation60_spill] sm:$0xff] }
 0x22a   : > { %2778 = vmatmul.mubr.bf16.gmra.mrb[104].mxu1 %v14553_v3  ;;  %2882 = vmatprep.mubr.bf16.mxu0 %v1879_v41  ;;  %v14568_v10 = vpack.c.bf16 %v14566_v7, %v14567_v26  ;;  %v14573_v3 = vld [vmem:[#allocation73_spill] sm:$0xff]  ;;  %v9219_v7 = vld [vmem:[%s13920_s5 + $0x60] sm:$0xff]  }
 0x22b   : > { %7156 = vmatprep.mubr.msk.bf16.mxu1 %vm11579_vm10, %v14557_v56  ;;  %v14574_v55 = vpack.c.bf16 %v14572_v60, %v14573_v3  ;;  %v9235_v41 = vld [vmem:[%s13920_s5 + $0x1d0] sm:$0xff]   ;;  %v14583_v60 = vld [vmem:[#allocation92_spill] sm:$0xff] }
 0x22c   : > { %v9216_v56 = vld [vmem:[%s13920_s5 + $0x10] sm:$0xff]  }
 0x22d   : > { %v14584_v3 = vld [vmem:[#allocation93_spill] sm:$0xff] }
 0x231   : > { %7180 = vmatmul.mubr.msk.bf16.gmra.mrb[92].mxu0 %vm11778_vm4, %v7179_v48  ;;  %v7191_v48 = vpack.c.bf16 %v14251_v14, %v14520_v1  ;;  %v9218_v1 = vld [vmem:[%s13920_s5 + $0x18] sm:$0xff]  }
 0x232   : > { %2786 = vmatmul.mubr.bf16.gmra.mrb[108].mxu1 %v14564_v49  ;;  %7304 = vmatprep.mubr.msk.bf16.mxu0 %vm10917_vm13, %v14568_v10  ;;  %v9237_v49 = vld [vmem:[%s13920_s5 + $0x1d8] sm:$0xff]   ;;  %v14580_v10 = vld [vmem:[#allocation91_spill] sm:$0xff] }
 0x233   : > { %8740 = vmatprep.mubr.msk.bf16.mxu1 %vm11585_vm5, %v14565_v46  ;;  %v14579_v46 = vld [vmem:[#allocation88_spill] sm:$0xff] }
 0x239   : > { %7307 = vmatmul.mubr.msk.bf16.vlgmr.msra.gmra.mrb[96].mxu0 %vm14571_vm1, %v7306_v5  ;;  %vm14575_vm1 = vnez %v14411_v28  ;;  %v9236_v28 = vld [vmem:[%s13920_s5 + $0x190] sm:$0xff]   ;;  %v9221_v5 = vld [vmem:[%s13920_s5 + $0x68] sm:$0xff]  }
 0x23a   : > { %8741 = vmatmul.mubr.msk.bf16.vlgmr.msra.gmra.mrb[112].mxu1 %vm11098_vm9, %v14569_v37  ;;  %7310 = vmatprep.mubr.msk.bf16.mxu0 %vm10957_vm15, %v14574_v55  ;;  %vm11839_vm4 = vmpackc.low %vm14530_vm2, %vm14575_vm1  ;;  %v9220_v37 = vld [vmem:[%s13920_s5 + $0x20] sm:$0xff]   ;;  %v14585_v55 = vld [vmem:[#allocation94_spill] sm:$0xff]  ;;  %vm14587_vm1 = vnez %v14397_v36  ;;  %v7384_v36 = vpack.c.bf16 %v14251_v14, %v14584_v3 }
 0x23b   : > { %8744 = vmatprep.mubr.msk.bf16.mxu1 %vm11240_vm8, %v14443_v27  ;;  %8069 = vmatpush3.bf16.msra.mxu1 %v9212_v11  ;;  %v9232_v27 = vld [vmem:[%s13920_s5 + $0x188] sm:$0xff]   ;;  %v14577_v2 = vsel %vm11839_vm4, 4294967295, %v14576_v2  ;;  %v14581_v11 = vld [vmem:[#allocation89_spill] sm:$0xff] }
 0x23c   : > { %8070 = vmatprep.subr.bf16.mxu1 %v9213_v44  ;;  %8261 = vmatpush3.bf16.msra.mxu0 %v9230_v22  ;;  %14578 = vst [vmem:[#allocation67_spill] sm:$0xff] %v14577_v2  ;;  %v14582_v44 = vpack.c.bf16 %v14580_v10, %v14581_v11  ;;  %v9241_v22 = vld [vmem:[%s13920_s5 + $0x1e0] sm:$0xff]   ;;  %v14593_v11 = vld [vmem:[#allocation102_spill] sm:$0xff] }
 0x23d   : > { %8262 = vmatprep.subr.bf16.mxu0 %v9231_v40  ;;  %v9242_v40 = vld [vmem:[%s13920_s5 + $0x1a0] sm:$0xff]  }
 0x23e   : > { %v9227_v10 = vld [vmem:[%s13920_s5 + $0x140] sm:$0xff]  }
 0x23f   : > { %8071 = vmatpush3.bf16.msra.mxu1 %v9214_v18  ;;  %v9243_v18 = vld [vmem:[%s13920_s5 + $0x1e8] sm:$0xff]  }
 0x240   : > { %8072 = vmatprep.subr.bf16.mxu1 %v9215_v29  ;;  %8263 = vmatpush3.bf16.msra.mxu0 %v9232_v27  ;;  %v9222_v29 = vld [vmem:[%s13920_s5 + $0x28] sm:$0xff]   ;;  %v14586_v27 = vpack.c.bf16 %v14584_v3, %v14585_v55 }
 0x241   : > { %8264 = vmatprep.subr.bf16.mxu0 %v9235_v41  ;;  %7313 = vmatmul.mubr.msk.bf16.gmra.mrb[100].mxu0 %vm11098_vm9, %v14579_v46  ;;  %v9247_v41 = vld [vmem:[%s13920_s5 + $0x1f0] sm:$0xff]   ;;  %v9234_v55 = vld [vmem:[%s13920_s5 + $0x108] sm:$0xff]  }
 0x242   : > { %8745 = vmatmul.mubr.msk.bf16.gmra.mrb[116].mxu1 %vm11839_vm4, %v7191_v48  ;;  %7316 = vmatprep.mubr.msk.bf16.mxu0 %vm11119_vm7, %v14582_v44  ;;  %vm11923_vm4 = vmpackc.low %vm14530_vm2, %vm11571_vm11  ;;  %v9224_v48 = vld [vmem:[%s13920_s5 + $0x30] sm:$0xff]   ;;  %vm14592_vm2 = vnez %v14436_v16  ;;  %v14594_v44 = vld [vmem:[#allocation100_spill] sm:$0xff] }
 0x243   : > { %8748 = vmatprep.mubr.msk.bf16.mxu1 %vm11696_vm0, %v14473_v4  ;;  %8073 = vmatpush3.bf16.msra.mxu1 %v9216_v56  ;;  %v9238_v4 = vld [vmem:[%s13920_s5 + $0x198] sm:$0xff]   ;;  %v14588_v56 = vmov 0  ;;  %v9355_v16 = vld [vmem:[%s13924_s9 + $0x94] ss:$12 sps:$4 sm:$0xff]  }
 0x244   : > { %8074 = vmatprep.subr.bf16.mxu1 %v9217_v53  ;;  %8265 = vmatpush3.bf16.msra.mxu0 %v9236_v28  ;;  %v14589_v56 = vsel %vm11923_vm4, 4294967295, %v14588_v56  ;;  %v7203_v53 = vpack.c.bf16 %v14251_v14, %v14555_v0  ;;  %v9225_v28 = vld [vmem:[%s13920_s5 + $0x78] sm:$0xff]  }
 0x245   : > { %8266 = vmatprep.subr.bf16.mxu0 %v9237_v49  ;;  %14590 = vst [vmem:[#allocation75_spill] sm:$0xff] %v14589_v56  ;;  %v9248_v49 = vld [vmem:[%s13920_s5 + $0x1b0] sm:$0xff]   ;;  %v9249_v0 = vld [vmem:[%s13920_s5 + $0x1f8] sm:$0xff]  }
 0x247   : > { %8075 = vmatpush3.bf16.msra.mxu1 %v9218_v1  ;;  %v9226_v1 = vld [vmem:[%s13920_s5 + $0x38] sm:$0xff]  }
 0x248   : > { %8076 = vmatprep.subr.bf16.mxu1 %v9219_v7  ;;  %8267 = vmatpush3.bf16.msra.mxu0 %v9238_v4  ;;  %v14591_v7 = vld [vmem:[#allocation99_spill] sm:$0xff]  ;;  %v14595_v4 = vpack.c.bf16 %v14593_v11, %v14594_v44 }
 0x249   : > { %8268 = vmatprep.subr.bf16.mxu0 %v9241_v22  ;;  %7319 = vmatmul.mubr.msk.bf16.gmra.mrb[104].mxu0 %vm11240_vm8, %v14583_v60  ;;  %v9250_v22 = vld [vmem:[%s13920_s5 + $0x1b8] sm:$0xff]  }
 0x24a   : > { %8749 = vmatmul.mubr.msk.bf16.gmra.mrb[120].mxu1 %vm11525_vm12, %v14487_v6  ;;  %v9223_v6 = vld [vmem:[%s13920_s5 + $0x70] sm:$0xff]   ;;  %7322 = vmatprep.mubr.msk.bf16.mxu0 %vm14587_vm1, %v14586_v27  ;;  %v14600_v27 = vld [vmem:[#allocation107_spill] sm:$0xff] }
 0x24b   : > { %8752 = vmatprep.mubr.msk.bf16.mxu1 %vm11549_vm14, %v10951_v42  ;;  %8077 = vmatpush3.bf16.msra.mxu1 %v9220_v37  ;;  %v9244_v42 = vld [vmem:[%s13920_s5 + $0x1a8] sm:$0xff]   ;;  %v9228_v37 = vld [vmem:[%s13920_s5 + $0x100] sm:$0xff]  }
 0x24c   : > { %8078 = vmatprep.subr.bf16.mxu1 %v9221_v5  ;;  %8269 = vmatpush3.bf16.msra.mxu0 %v9242_v40  ;;  %v7279_v5 = vpack.c.bf16 %v14567_v26, %v14251_v14  ;;  %v9233_v40 = vld [vmem:[%s13920_s5 + $0x148] sm:$0xff]   ;;  %v9239_v26 = vld [vmem:[%s13920_s5 + $0x150] sm:$0xff]  }
 0x24d   : > { %8270 = vmatprep.subr.bf16.mxu0 %v9243_v18  ;;  %v14596_v18 = vld [vmem:[#allocation80_spill] sm:$0xff] }
 0x24e   : > { %vm14597_vm11 = vnez %v14596_v18 }
 0x24f   : > { %8079 = vmatpush3.bf16.msra.mxu1 %v9222_v29  ;;  %v7330_v29 = vpack.c.bf16 %v11154_v15, %v14251_v14 }
 0x250   : > { %8080 = vmatprep.subr.bf16.mxu1 %v9223_v6  ;;  %8271 = vmatpush3.bf16.msra.mxu0 %v9244_v42  ;;  %v14598_v6 = vld [vmem:[#allocation98_spill] sm:$0xff]  ;;  %v14601_v42 = vld [vmem:[#allocation105_spill] sm:$0xff] }
 0x251   : > { %8272 = vmatprep.subr.bf16.mxu0 %v9247_v41  ;;  %7325 = vmatmul.mubr.msk.bf16.gmra.mrb[108].mxu0 %vm14592_vm2, %v14591_v7  ;;  %v14602_v41 = vpack.c.bf16 %v14600_v27, %v14601_v42  ;;  %v9256_v42 = vld [vmem:[%s13920_s5 + $0x130] sm:$0xff]  }
 0x252   : > { %8753 = vmatmul.mubr.msk.bf16.gmra.mrb[124].mxu1 %vm11923_vm4, %v7203_v53  ;;  %7328 = vmatprep.mubr.msk.bf16.mxu0 %vm14543_vm3, %v14595_v4  ;;  %vm14599_vm4 = vnez %v14455_v57  ;;  %v9245_v53 = vld [vmem:[%s13920_s5 + $0x158] sm:$0xff]   ;;  %v9252_v4 = vld [vmem:[%s13920_s5 + $0x120] sm:$0xff]  }
 0x253   : > { %8081 = vmatpush3.bf16.msra.mxu1 %v9224_v48  ;;  %3883 = vmatprep.mubr.bf16.mxu1 %v3076_v13  ;;  %v9240_v48 = vld [vmem:[%s13920_s5 + $0x110] sm:$0xff]   ;;  %v14605_v13 = vld [vmem:[#allocation104_spill] sm:$0xff] }
 0x254   : > { %8082 = vmatprep.subr.bf16.mxu1 %v9225_v28  ;;  %8273 = vmatpush3.bf16.msra.mxu0 %v9248_v49  ;;  %v14604_v28 = vld [vmem:[#allocation103_spill] sm:$0xff]  ;;  %v9246_v49 = vld [vmem:[%s13920_s5 + $0x118] sm:$0xff]  }
 0x255   : > { %8274 = vmatprep.subr.bf16.mxu0 %v9249_v0  ;;  %v14606_v0 = vld [vmem:[#allocation113_spill] sm:$0xff] }
 0x257   : > { %8083 = vmatpush3.bf16.msra.mxu1 %v9226_v1  ;;  %v9251_v1 = vld [vmem:[%s13920_s5 + $0x160] sm:$0xff]  }
 0x258   : > { %8196 = vmatprep.subr.bf16.mxu1 %v9227_v10  ;;  %8275 = vmatpush3.bf16.msra.mxu0 %v9250_v22  ;;  %v14607_v10 = vld [vmem:[#allocation111_spill] sm:$0xff]  ;;  %v9253_v22 = vld [vmem:[%s13920_s5 + $0x168] sm:$0xff]  }
 0x259   : > { %7331 = vmatmul.mubr.msk.bf16.gmra.mrb[112].mxu0 %vm14599_vm4, %v7330_v29  ;;  %v14608_v11 = vpack.c.bf16 %v11221_v50, %v14607_v10  ;;  %v9254_v50 = vld [vmem:[%s13920_s5 + $0x128] sm:$0xff]   ;;  %v9255_v29 = vld [vmem:[%s13920_s5 + $0x170] sm:$0xff]   ;;  %vm14615_vm4 = vnez %v14483_v8  ;;  %v9259_v10 = vld [vmem:[%s13920_s5 + $0x200] sm:$0xff]  }
 0x25a   : > { %7280 = vmatmul.mubr.msk.bf16.vlgmr.msra.gmra.mrb[128].mxu1 %vm14597_vm11, %v7279_v5  ;;  %vm14603_vm11 = vnez %v14459_v51  ;;  %v14610_v5 = vld [vmem:[#allocation112_spill] sm:$0xff] }
 0x25b   : > { %3891 = vmatprep.mubr.bf16.mxu1 %v14598_v6  ;;  %8197 = vmatpush3.bf16.msra.mxu1 %v9228_v37  ;;  %v14609_v37 = vld [vmem:[#allocation109_spill] sm:$0xff] }
 0x25c   : > { %8198 = vmatprep.subr.bf16.mxu1 %v9233_v40  ;;  %7334 = vmatprep.mubr.msk.bf16.mxu0 %vm14603_vm11, %v14602_v41  ;;  %v14611_v40 = vld [vmem:[#allocation38_spill] sm:$0xff] }
 0x25d   : > { %v9257_v41 = vld [vmem:[%s13920_s5 + $0x178] sm:$0xff]  }
 0x25f   : > { %8199 = vmatpush3.bf16.msra.mxu1 %v9234_v55  ;;  %v14612_v55 = vld [vmem:[#allocation116_spill] sm:$0xff] }
 0x260   : > { %8200 = vmatprep.subr.bf16.mxu1 %v9239_v26  ;;  %v14613_v26 = vld [vmem:[#allocation117_spill] sm:$0xff] }
 0x261   : > { %7337 = vmatmul.mubr.msk.bf16.gmra.mrb[116].mxu0 %vm11525_vm12, %v14606_v0  ;;  %v14614_v27 = vpack.c.bf16 %v14612_v55, %v14613_v26 }
 0x262   : > { %7283 = vmatmul.mubr.msk.bf16.gmra.mrb[132].mxu1 %vm10957_vm15, %v14604_v28  ;;  %7340 = vmatprep.mubr.msk.bf16.mxu0 %vm14558_vm6, %v14608_v11  ;;  %v7291_v11 = vpack.c.bf16 %v14594_v44, %v14251_v14  ;;  %v14622_v44 = vld [vmem:[#allocation123_spill] sm:$0xff] }
 0x263   : > { %3899 = vmatprep.mubr.bf16.mxu1 %v14605_v13  ;;  %8201 = vmatpush3.bf16.msra.mxu1 %v9240_v48  ;;  %v3080_v48 = vpack.c.bf16 %v10821_v58, %v14251_v14 }
 0x264   : > { %8202 = vmatprep.subr.bf16.mxu1 %v9245_v53  ;;  %v14616_v53 = vld [vmem:[#allocation114_spill] sm:$0xff] }
 0x267   : > { %8203 = vmatpush3.bf16.msra.mxu1 %v9246_v49  ;;  %v9258_v49 = vld [vmem:[%s13920_s5 + $0x138] sm:$0xff]  }
 0x268   : > { %8204 = vmatprep.subr.bf16.mxu1 %v9251_v1  ;;  %v14617_v1 = vld [vmem:[#allocation34_spill] sm:$0xff] }
 0x269   : > { %7343 = vmatmul.mubr.msk.bf16.gmra.mrb[120].mxu0 %vm11549_vm14, %v14611_v40 }
 0x26a   : > { %7286 = vmatmul.mubr.msk.bf16.gmra.mrb[136].mxu1 %vm11119_vm7, %v14609_v37  ;;  %7346 = vmatprep.mubr.msk.bf16.mxu0 %vm14615_vm4, %v14614_v27 }
 0x26b   : > { %3907 = vmatprep.mubr.bf16.mxu1 %v14610_v5  ;;  %8205 = vmatpush3.bf16.msra.mxu1 %v9252_v4  ;;  %v14619_v4 = vld [vmem:[#allocation119_spill] sm:$0xff] }
 0x26c   : > { %8206 = vmatprep.subr.bf16.mxu1 %v9253_v22  ;;  %v14620_v22 = vld [vmem:[#allocation120_spill] sm:$0xff] }
 0x26f   : > { %8207 = vmatpush3.bf16.msra.mxu1 %v9254_v50  ;;  %v14623_v50 = vld [vmem:[#allocation31_spill] sm:$0xff] }
 0x270   : > { %8208 = vmatprep.subr.bf16.mxu1 %v9255_v29 }
 0x271   : > { %7349 = vmatmul.mubr.msk.bf16.gmra.mrb[124].mxu0 %vm11579_vm10, %v14617_v1 }
 0x272   : > { %7289 = vmatmul.mubr.msk.bf16.gmra.mrb[140].mxu1 %vm14587_vm1, %v14616_v53  ;;  %4174 = vmatprep.mubr.bf16.mxu0 %v14598_v6  ;;  %vm14618_vm1 = vnez %v14452_v34  ;;  %v14621_v6 = vld [vmem:[#allocation122_spill] sm:$0xff] }
 0x273   : > { %3915 = vmatprep.mubr.bf16.mxu1 %v3080_v48  ;;  %8209 = vmatpush3.bf16.msra.mxu1 %v9256_v42 }
 0x274   : > { %8210 = vmatprep.subr.bf16.mxu1 %v9257_v41 }
 0x277   : > { %8211 = vmatpush3.bf16.msra.mxu1 %v9258_v49 }
 0x278   : > { %8756 = vmatprep.subr.bf16.mxu1 %v9259_v10 }
 0x279   : > { %7376 = vmatmul.mubr.msk.bf16.vlgmr.msra.gmra.mrb[128].mxu0 %vm10917_vm13, %v14604_v28  ;;  %v3239_v28 = vpack.c.bf16 %v14251_v14, %v10721_v39 }
 0x27a   : > { %7292 = vmatmul.mubr.msk.bf16.gmra.mrb[144].mxu1 %vm14618_vm1, %v7291_v11  ;;  %4182 = vmatprep.mubr.bf16.mxu0 %v14605_v13  ;;  %vm14627_vm1 = vnez %v14532_v45 }
 0x27b   : > { %3923 = vmatprep.mubr.bf16.mxu1 %v14619_v4 }
 0x281   : > { %7379 = vmatmul.mubr.msk.bf16.gmra.mrb[132].mxu0 %vm10957_vm15, %v14609_v37  ;;  %v12086_v37 = vld [vmem:[%s13919_s4] ss:$0 sm:$0xff] }
 0x282   : > { %7295 = vmatmul.mubr.msk.bf16.gmra.mrb[148].mxu1 %vm14603_vm11, %v14620_v22  ;;  %4190 = vmatprep.mubr.bf16.mxu0 %v14610_v5 }
 0x283   : > { %3931 = vmatprep.mubr.bf16.mxu1 %v14621_v6 }
 0x286   : > { %v7812_v13 = vpop.f32.mrb[48].mxu1 }
 0x287   : > { %v7813_v5 = vpop.f32.mrb[49].mxu1  ;;  %v7876_v29 = vpop.f32.mrb[32].mxu0 }
 0x288   : > { %v7814_v26 = vadd.f32 %v7813_v5, %v7812_v13  ;;  %v7815_v27 = vpop.f32.mrb[50].mxu1  ;;  %v7877_v42 = vpop.f32.mrb[33].mxu0  ;;  %v14625_v5 = vld [vmem:[#allocation78_spill] sm:$0xff] }
 0x289   : > { %7382 = vmatmul.mubr.msk.bf16.gmra.mrb[136].mxu0 %vm11119_vm7, %v14616_v53  ;;  %v7878_v41 = vadd.f32 %v7877_v42, %v7876_v29  ;;  %v7816_v48 = vpop.f32.mrb[51].mxu1  ;;  %v7879_v49 = vpop.f32.mrb[34].mxu0  ;;  %v14626_v29 = vpack.c.bf16 %v14625_v5, %v11282_v35  ;;  %v14628_v35 = vld [vmem:[#allocation39_spill] sm:$0xff] }
 0x28a   : > { %7298 = vmatmul.mubr.msk.bf16.gmra.mrb[152].mxu1 %vm14558_vm6, %v14622_v44  ;;  %4198 = vmatprep.mubr.bf16.mxu0 %v3239_v28  ;;  %v2538_v11 = vadd.f32 %v7814_v26, %v12086_v37  ;;  %v7817_v57 = vadd.f32 %v7816_v48, %v7815_v27  ;;  %v7880_v34 = vpop.f32.mrb[35].mxu0  ;;  %v14624_v28 = vld [vmem:[#allocation12_spill] sm:$0xff]  ;;  %v3164_v5 = vpack.c.bf16 %v14628_v35, %v14400_v9  ;;  %v9261_v9 = vld [vmem:[%s13920_s5 + $0x210] sm:$0xff]  }
 0x28b   : > { %3939 = vmatprep.mubr.bf16.mxu1 %v14623_v50  ;;  %v7881_v53 = vadd.f32 %v7880_v34, %v7879_v49 }
 0x28c   : > { %v12094_v61 = vadd.f32 %v7878_v41, %v2538_v11  ;;  %v2541_v13 = vadd.f32 %v7817_v57, %v12086_v37 }
 0x28e   : > { %v12104_v34 = vadd.f32 %v7881_v53, %v2541_v13  ;;  %v7818_v26 = vpop.f32.mrb[52].mxu1 }
 0x28f   : > { %v7819_v27 = vpop.f32.mrb[53].mxu1 }
 0x290   : > { %v7882_v3 = vpop.f32.mrb[36].mxu0  ;;  %v7820_v42 = vadd.f32 %v7819_v27, %v7818_v26  ;;  %v7821_v41 = vpop.f32.mrb[54].mxu1  ;;  %v14629_v27 = vld [vmem:[#allocation87_spill] sm:$0xff] }
 0x291   : > { %7385 = vmatmul.mubr.msk.bf16.gmra.mrb[140].mxu0 %vm14627_vm1, %v7384_v36  ;;  %v7883_v48 = vpop.f32.mrb[37].mxu0  ;;  %v7822_v49 = vpop.f32.mrb[55].mxu1  ;;  %v9260_v36 = vld [vmem:[%s13920_s5 + $0x208] sm:$0xff]   ;;  %vm14642_vm1 = vnez %v14561_v17 }
 0x292   : > { %7301 = vmatmul.mubr.msk.bf16.gmra.mrb[156].mxu1 %vm14615_vm4, %v14624_v28  ;;  %4206 = vmatprep.mubr.bf16.mxu0 %v14619_v4  ;;  %v7884_v57 = vadd.f32 %v7883_v48, %v7882_v3  ;;  %v7885_v11 = vpop.f32.mrb[38].mxu0  ;;  %v2546_v53 = vadd.f32 %v7820_v42, %v12086_v37  ;;  %v7823_v13 = vadd.f32 %v7822_v49, %v7821_v41 }
 0x293   : > { %7352 = vmatprep.mubr.msk.bf16.mxu1 %vm11585_vm5, %v14626_v29  ;;  %v7886_v4 = vpop.f32.mrb[39].mxu0  ;;  %v14630_v3 = vpack.c.bf16 %v11023_v62, %v14629_v27  ;;  %v14632_v27 = vpack.c.bf16 %v11079_v12, %v11019_v33 }
 0x294   : > { %v7887_v29 = vadd.f32 %v7886_v4, %v7885_v11  ;;  %v12113_v45 = vadd.f32 %v7884_v57, %v2546_v53  ;;  %v2549_v26 = vadd.f32 %v7823_v13, %v12086_v37 }
 0x296   : > { %v12127_v42 = vadd.f32 %v7887_v29, %v2549_v26  ;;  %v14631_v29 = vpack.c.bf16 %v10629_v63, %v10611_v31  ;;  %v9263_v31 = vld [vmem:[%s13920_s5 + $0x220] sm:$0xff]  }
 0x299   : > { %7388 = vmatmul.mubr.msk.bf16.gmra.mrb[144].mxu0 %vm14543_vm3, %v14620_v22  ;;  %v7824_v41 = vpop.f32.mrb[56].mxu1  ;;  %v9262_v22 = vld [vmem:[%s13920_s5 + $0x218] sm:$0xff]  }
 0x29a   : > { %4078 = vmatmul.mubr.bf16.vlgmr.msra.gmra.mrb[160].mxu1 %v3164_v5  ;;  %4214 = vmatprep.mubr.bf16.mxu0 %v14621_v6  ;;  %v7825_v48 = vpop.f32.mrb[57].mxu1 }
 0x29b   : > { %7355 = vmatprep.mubr.msk.bf16.mxu1 %vm11098_vm9, %v14630_v3  ;;  %8757 = vmatpush3.bf16.msra.mxu1 %v9259_v10  ;;  %v7826_v57 = vadd.f32 %v7825_v48, %v7824_v41  ;;  %v7827_v49 = vpop.f32.mrb[58].mxu1 }
 0x29c   : > { %8758 = vmatprep.subr.bf16.mxu1 %v9260_v36  ;;  %v7888_v62 = vpop.f32.mrb[40].mxu0  ;;  %v7828_v35 = vpop.f32.mrb[59].mxu1 }
 0x29d   : > { %v7889_v11 = vpop.f32.mrb[41].mxu0  ;;  %v2554_v53 = vadd.f32 %v7826_v57, %v12086_v37  ;;  %v7829_v13 = vadd.f32 %v7828_v35, %v7827_v49 }
 0x29e   : > { %v7890_v10 = vadd.f32 %v7889_v11, %v7888_v62  ;;  %v7891_v5 = vpop.f32.mrb[42].mxu0 }
 0x29f   : > { %8759 = vmatpush3.bf16.msra.mxu1 %v9260_v36  ;;  %v7892_v4 = vpop.f32.mrb[43].mxu0  ;;  %v2557_v36 = vadd.f32 %v7829_v13, %v12086_v37  ;;  %v14634_v13 = vld [vmem:[#allocation124_spill] sm:$0xff] }
 0x2a0   : > { %8760 = vmatprep.subr.bf16.mxu1 %v9261_v9  ;;  %v7893_v6 = vadd.f32 %v7892_v4, %v7891_v5  ;;  %v12137_v26 = vadd.f32 %v7890_v10, %v2554_v53  ;;  %v14633_v5 = vpack.c.bf16 %v10730_v19, %v10715_v38  ;;  %v14635_v4 = vld [vmem:[#allocation97_spill] sm:$0xff] }
 0x2a1   : > { %7391 = vmatmul.mubr.msk.bf16.gmra.mrb[148].mxu0 %vm14603_vm11, %v14622_v44  ;;  %v9264_v44 = vld [vmem:[%s13920_s5 + $0x228] sm:$0xff]   ;;  %v9265_v38 = vld [vmem:[%s13920_s5 + $0x230] sm:$0xff]  }
 0x2a2   : > { %4086 = vmatmul.mubr.bf16.gmra.mrb[164].mxu1 %v14631_v29  ;;  %v12151_v63 = vadd.f32 %v7893_v6, %v2557_v36  ;;  %4222 = vmatprep.mubr.bf16.mxu0 %v14623_v50  ;;  %v14636_v6 = vpack.c.bf16 %v14634_v13, %v14635_v4  ;;  %v14637_v29 = vld [vmem:[#allocation46_spill] sm:$0xff]  ;;  %v14640_v4 = vld [vmem:[#allocation108_spill] sm:$0xff] }
 0x2a3   : > { %7358 = vmatprep.mubr.msk.bf16.mxu1 %vm11240_vm8, %v14632_v27  ;;  %8761 = vmatpush3.bf16.msra.mxu1 %v9261_v9  ;;  %v3243_v36 = vpack.c.bf16 %v14251_v14, %v14637_v29 }
 0x2a4   : > { %8762 = vmatprep.subr.bf16.mxu1 %v9262_v22  ;;  %v7894_v33 = vpop.f32.mrb[44].mxu0 }
 0x2a5   : > { %v7830_v3 = vpop.f32.mrb[60].mxu1  ;;  %v7895_v62 = vpop.f32.mrb[45].mxu0 }
 0x2a6   : > { %v7831_v41 = vpop.f32.mrb[61].mxu1  ;;  %v7896_v9 = vadd.f32 %v7895_v62, %v7894_v33  ;;  %v7897_v49 = vpop.f32.mrb[46].mxu0 }
 0x2a7   : > { %v7832_v12 = vadd.f32 %v7831_v41, %v7830_v3  ;;  %v7833_v48 = vpop.f32.mrb[62].mxu1  ;;  %8763 = vmatpush3.bf16.msra.mxu1 %v9262_v22  ;;  %v7898_v35 = vpop.f32.mrb[47].mxu0 }
 0x2a8   : > { %v7834_v57 = vpop.f32.mrb[63].mxu1  ;;  %8764 = vmatprep.subr.bf16.mxu1 %v9263_v31  ;;  %v7899_v50 = vadd.f32 %v7898_v35, %v7897_v49  ;;  %v14638_v35 = vld [vmem:[#allocation45_spill] sm:$0xff] }
 0x2a9   : > { %v2562_v11 = vadd.f32 %v7832_v12, %v12086_v37  ;;  %v7835_v10 = vadd.f32 %v7834_v57, %v7833_v48  ;;  %7394 = vmatmul.mubr.msk.bf16.gmra.mrb[152].mxu0 %vm14558_vm6, %v14624_v28  ;;  %v9266_v28 = vld [vmem:[%s13920_s5 + $0x238] sm:$0xff]  }
 0x2aa   : > { %4094 = vmatmul.mubr.bf16.gmra.mrb[168].mxu1 %v14633_v5  ;;  %4230 = vmatprep.mubr.bf16.mxu0 %v3243_v36 }
 0x2ab   : > { %v12161_v53 = vadd.f32 %v7896_v9, %v2562_v11  ;;  %v2565_v22 = vadd.f32 %v7835_v10, %v12086_v37  ;;  %7361 = vmatprep.mubr.msk.bf16.mxu1 %vm14592_vm2, %v14636_v6  ;;  %8765 = vmatpush3.bf16.msra.mxu1 %v9263_v31  ;;  %v14641_v6 = vpack.c.bf16 %v14640_v4, %v11154_v15 }
 0x2ac   : > { %8766 = vmatprep.subr.bf16.mxu1 %v9264_v44  ;;  %v7900_v41 = vpop.f32.mrb[48].mxu0 }
 0x2ad   : > { %v12177_v19 = vadd.f32 %v7899_v50, %v2565_v22  ;;  %v7836_v27 = vpop.f32.mrb[64].mxu1  ;;  %v7901_v48 = vpop.f32.mrb[49].mxu0  ;;  %v14639_v50 = vpack.c.bf16 %v10721_v39, %v14638_v35  ;;  %v14645_v35 = vld [vmem:[#allocation15_spill] sm:$0xff] }
 0x2ae   : > { %v7837_v3 = vpop.f32.mrb[65].mxu1  ;;  %v7902_v31 = vadd.f32 %v7901_v48, %v7900_v41  ;;  %v7903_v9 = vpop.f32.mrb[50].mxu0 }
 0x2af   : > { %v7838_v33 = vadd.f32 %v7837_v3, %v7836_v27  ;;  %v7839_v12 = vpop.f32.mrb[66].mxu1  ;;  %8767 = vmatpush3.bf16.msra.mxu1 %v9264_v44  ;;  %v7904_v11 = vpop.f32.mrb[51].mxu0  ;;  %v7396_v44 = vpack.c.bf16 %v14251_v14, %v14612_v55 }
 0x2b0   : > { %v7840_v62 = vpop.f32.mrb[67].mxu1  ;;  %8768 = vmatprep.subr.bf16.mxu1 %v9265_v38  ;;  %v7905_v10 = vadd.f32 %v7904_v11, %v7903_v9 }
 0x2b1   : > { %v2570_v57 = vadd.f32 %v7838_v33, %v12086_v37  ;;  %v7841_v49 = vadd.f32 %v7840_v62, %v7839_v12  ;;  %7397 = vmatmul.mubr.msk.bf16.gmra.mrb[156].mxu0 %vm14642_vm1, %v7396_v44  ;;  %vm14662_vm1 = vnez %v14577_v2 }
 0x2b2   : > { %4102 = vmatmul.mubr.bf16.gmra.mrb[172].mxu1 %v14639_v50  ;;  %v14646_v50 = vld [vmem:[#allocation110_spill] sm:$0xff] }
 0x2b3   : > { %v12188_v5 = vadd.f32 %v7902_v31, %v2570_v57  ;;  %v2573_v22 = vadd.f32 %v7841_v49, %v12086_v37  ;;  %7364 = vmatprep.mubr.msk.bf16.mxu1 %vm11696_vm0, %v14641_v6  ;;  %8769 = vmatpush3.bf16.msra.mxu1 %v9265_v38  ;;  %v14643_v57 = vld [vmem:[#allocation86_spill] sm:$0xff]  ;;  %v14647_v44 = vpack.c.bf16 %v14645_v35, %v14646_v50 }
 0x2b4   : > { %8770 = vmatprep.subr.bf16.mxu1 %v9266_v28  ;;  %v7906_v55 = vpop.f32.mrb[52].mxu0  ;;  %v14644_v49 = vpack.c.bf16 %v14643_v57, %v10821_v58 }
 0x2b5   : > { %v12198_v39 = vadd.f32 %v7905_v10, %v2573_v22  ;;  %v7842_v36 = vpop.f32.mrb[68].mxu1  ;;  %v7907_v33 = vpop.f32.mrb[53].mxu0 }
 0x2b6   : > { %v7843_v27 = vpop.f32.mrb[69].mxu1  ;;  %v7908_v12 = vadd.f32 %v7907_v33, %v7906_v55  ;;  %v7909_v15 = vpop.f32.mrb[54].mxu0 }
 0x2b7   : > { %v7844_v3 = vadd.f32 %v7843_v27, %v7842_v36  ;;  %v7845_v41 = vpop.f32.mrb[70].mxu1  ;;  %8771 = vmatpush3.bf16.msra.mxu1 %v9266_v28  ;;  %v7910_v38 = vpop.f32.mrb[55].mxu0 }
 0x2b8   : > { %v7846_v48 = vpop.f32.mrb[71].mxu1  ;;  %v7911_v9 = vadd.f32 %v7910_v38, %v7909_v15 }
 0x2b9   : > { %v2578_v31 = vadd.f32 %v7844_v3, %v12086_v37  ;;  %v7847_v62 = vadd.f32 %v7846_v48, %v7845_v41 }
 0x2ba   : > { %4110 = vmatmul.mubr.bf16.gmra.mrb[176].mxu1 %v14644_v49  ;;  %v14651_v49 = vld [vmem:[#allocation24_spill] sm:$0xff] }
 0x2bb   : > { %v12204_v11 = vadd.f32 %v7908_v12, %v2578_v31  ;;  %v2581_v10 = vadd.f32 %v7847_v62, %v12086_v37  ;;  %7367 = vmatprep.mubr.msk.bf16.mxu1 %vm11525_vm12, %v14647_v44  ;;  %v14648_v31 = vld [vmem:[#allocation77_spill] sm:$0xff]  ;;  %v14649_v62 = vld [vmem:[#allocation64_spill] sm:$0xff] }
 0x2bc   : > { %v7912_v6 = vpop.f32.mrb[56].mxu0  ;;  %v14650_v38 = vpack.c.bf16 %v14648_v31, %v14649_v62  ;;  %v14654_v31 = vld [vmem:[#allocation96_spill] sm:$0xff]  ;;  %v14655_v62 = vld [vmem:[#allocation90_spill] sm:$0xff] }
 0x2bd   : > { %v12212_v28 = vadd.f32 %v7911_v9, %v2581_v10  ;;  %v7848_v22 = vpop.f32.mrb[72].mxu1  ;;  %v7913_v55 = vpop.f32.mrb[57].mxu0  ;;  %v14652_v10 = vld [vmem:[#allocation115_spill] sm:$0xff] }
 0x2be   : > { %v7849_v4 = vpop.f32.mrb[73].mxu1  ;;  %v7914_v58 = vadd.f32 %v7913_v55, %v7912_v6  ;;  %v7915_v41 = vpop.f32.mrb[58].mxu0  ;;  %v14653_v35 = vpack.c.bf16 %v14651_v49, %v14652_v10  ;;  %v14657_v49 = vld [vmem:[#allocation33_spill] sm:$0xff] }
 0x2bf   : > { %v7850_v36 = vadd.f32 %v7849_v4, %v7848_v22  ;;  %v7851_v27 = vpop.f32.mrb[74].mxu1  ;;  %v7916_v48 = vpop.f32.mrb[59].mxu0  ;;  %v14658_v10 = vld [vmem:[#allocation121_spill] sm:$0xff] }
 0x2c0   : > { %v7852_v3 = vpop.f32.mrb[75].mxu1  ;;  %v7917_v15 = vadd.f32 %v7916_v48, %v7915_v41 }
 0x2c1   : > { %v2586_v33 = vadd.f32 %v7850_v36, %v12086_v37  ;;  %v7853_v12 = vadd.f32 %v7852_v3, %v7851_v27 }
 0x2c2   : > { %4118 = vmatmul.mubr.bf16.gmra.mrb[180].mxu1 %v14650_v38  ;;  %v14656_v38 = vpack.c.bf16 %v14654_v31, %v14655_v62  ;;  %v14660_v62 = vld [vmem:[#allocation106_spill] sm:$0xff] }
 0x2c3   : > { %v12218_v9 = vadd.f32 %v7914_v58, %v2586_v33  ;;  %v2589_v57 = vadd.f32 %v7853_v12, %v12086_v37  ;;  %7370 = vmatprep.mubr.msk.bf16.mxu1 %vm11549_vm14, %v14653_v35  ;;  %v14659_v35 = vpack.c.bf16 %v14657_v49, %v14658_v10 }
 0x2c4   : > { %v7918_v4 = vpop.f32.mrb[60].mxu0 }
 0x2c5   : > { %v12226_v50 = vadd.f32 %v7917_v15, %v2589_v57  ;;  %v7854_v44 = vpop.f32.mrb[76].mxu1  ;;  %v7919_v27 = vpop.f32.mrb[61].mxu0 }
 0x2c6   : > { %v7855_v22 = vpop.f32.mrb[77].mxu1  ;;  %v7920_v55 = vadd.f32 %v7919_v27, %v7918_v4  ;;  %v7921_v58 = vpop.f32.mrb[62].mxu0 }
 0x2c7   : > { %v7856_v6 = vadd.f32 %v7855_v22, %v7854_v44  ;;  %v7857_v36 = vpop.f32.mrb[78].mxu1  ;;  %v7922_v12 = vpop.f32.mrb[63].mxu0 }
 0x2c8   : > { %v7858_v3 = vpop.f32.mrb[79].mxu1  ;;  %v7923_v48 = vadd.f32 %v7922_v12, %v7921_v58 }
 0x2c9   : > { %v2594_v41 = vadd.f32 %v7856_v6, %v12086_v37  ;;  %v7859_v33 = vadd.f32 %v7858_v3, %v7857_v36 }
 0x2ca   : > { %4126 = vmatmul.mubr.bf16.gmra.mrb[184].mxu1 %v14656_v38  ;;  %v14661_v38 = vpack.c.bf16 %v14637_v29, %v14660_v62 }
 0x2cb   : > { %v12232_v15 = vadd.f32 %v7920_v55, %v2594_v41  ;;  %v2597_v57 = vadd.f32 %v7859_v33, %v12086_v37  ;;  %7373 = vmatprep.mubr.msk.bf16.mxu1 %vm11579_vm10, %v14659_v35 }
 0x2cc   : > { %v8004_v6 = vpop.f32.mrb[64].mxu0 }
 0x2cd   : > { %v12240_v44 = vadd.f32 %v7923_v48, %v2597_v57  ;;  %v7940_v22 = vpop.f32.mrb[80].mxu1  ;;  %v8005_v3 = vpop.f32.mrb[65].mxu0 }
 0x2ce   : > { %v7941_v4 = vpop.f32.mrb[81].mxu1  ;;  %v8006_v58 = vadd.f32 %v8005_v3, %v8004_v6  ;;  %v8007_v55 = vpop.f32.mrb[66].mxu0 }
 0x2cf   : > { %v7942_v36 = vadd.f32 %v7941_v4, %v7940_v22  ;;  %v7943_v27 = vpop.f32.mrb[82].mxu1  ;;  %v8008_v33 = vpop.f32.mrb[67].mxu0 }
 0x2d0   : > { %v7944_v12 = vpop.f32.mrb[83].mxu1  ;;  %v8009_v31 = vadd.f32 %v8008_v33, %v8007_v55 }
 0x2d1   : > { %v2732_v41 = vadd.f32 %v7942_v36, %v12094_v61  ;;  %v7945_v37 = vadd.f32 %v7944_v12, %v7943_v27 }
 0x2d2   : > { %4134 = vmatmul.mubr.bf16.gmra.mrb[188].mxu1 %v14661_v38 }
 0x2d3   : > { %v2735_v48 = vadd.f32 %v7945_v37, %v12104_v34  ;;  %8772 = vmatprep.mubr.msk.bf16.mxu1 %vm11585_vm5, %v14579_v46  ;;  %v12250_v57 = vadd.f32 %v8006_v58, %v2732_v41 }
 0x2d4   : > { %v8010_v61 = vpop.f32.mrb[68].mxu0 }
 0x2d5   : > { %v7946_v10 = vpop.f32.mrb[84].mxu1  ;;  %v12252_v35 = vadd.f32 %v8009_v31, %v2735_v48  ;;  %v8011_v36 = vpop.f32.mrb[69].mxu0 }
 0x2d6   : > { %v7947_v22 = vpop.f32.mrb[85].mxu1  ;;  %v8012_v27 = vadd.f32 %v8011_v36, %v8010_v61  ;;  %v8013_v29 = vpop.f32.mrb[70].mxu0 }
 0x2d7   : > { %v7948_v4 = vadd.f32 %v7947_v22, %v7946_v10  ;;  %v7949_v6 = vpop.f32.mrb[86].mxu1  ;;  %v8014_v55 = vpop.f32.mrb[71].mxu0 }
 0x2d8   : > { %v7950_v3 = vpop.f32.mrb[87].mxu1  ;;  %v8015_v37 = vadd.f32 %v8014_v55, %v8013_v29 }
 0x2d9   : > { %v2740_v12 = vadd.f32 %v7948_v4, %v12113_v45  ;;  %v7951_v34 = vadd.f32 %v7950_v3, %v7949_v6 }
 0x2da   : > { %8773 = vmatmul.mubr.msk.bf16.vlgmr.msra.gmra.mrb[192].mxu1 %vm11098_vm9, %v14583_v60  ;;  %v7408_v60 = vpack.c.bf16 %v14251_v14, %v14634_v13 }
 0x2db   : > { %v2743_v46 = vadd.f32 %v7951_v34, %v12127_v42  ;;  %8776 = vmatprep.mubr.msk.bf16.mxu1 %vm11240_vm8, %v14591_v7  ;;  %v12262_v58 = vadd.f32 %v8012_v27, %v2740_v12 }
 0x2dc   : > { %v8016_v45 = vpop.f32.mrb[72].mxu0 }
 0x2dd   : > { %v7952_v41 = vpop.f32.mrb[88].mxu1  ;;  %v12264_v33 = vadd.f32 %v8015_v37, %v2743_v46  ;;  %v8017_v48 = vpop.f32.mrb[73].mxu0 }
 0x2de   : > { %v7953_v31 = vpop.f32.mrb[89].mxu1  ;;  %v8018_v10 = vadd.f32 %v8017_v48, %v8016_v45  ;;  %v8019_v61 = vpop.f32.mrb[74].mxu0 }
 0x2df   : > { %v7954_v62 = vadd.f32 %v7953_v31, %v7952_v41  ;;  %v7955_v38 = vpop.f32.mrb[90].mxu1  ;;  %v8020_v7 = vpop.f32.mrb[75].mxu0 }
 0x2e0   : > { %v7956_v22 = vpop.f32.mrb[91].mxu1  ;;  %v8021_v6 = vadd.f32 %v8020_v7, %v8019_v61 }
 0x2e1   : > { %v2748_v42 = vadd.f32 %v7954_v62, %v12137_v26  ;;  %v7957_v4 = vadd.f32 %v7956_v22, %v7955_v38 }
 0x2e2   : > { %8777 = vmatmul.mubr.msk.bf16.gmra.mrb[196].mxu1 %vm14662_vm1, %v7408_v60  ;;  %vm14663_vm1 = vnez %v14589_v56 }
 0x2e3   : > { %v2751_v36 = vadd.f32 %v7957_v4, %v12151_v63  ;;  %8780 = vmatprep.mubr.msk.bf16.mxu1 %vm11696_vm0, %v14606_v0  ;;  %v12275_v27 = vadd.f32 %v8018_v10, %v2748_v42 }
 0x2e4   : > { %v8022_v12 = vpop.f32.mrb[76].mxu0 }
 0x2e5   : > { %v7958_v3 = vpop.f32.mrb[92].mxu1  ;;  %v12277_v29 = vadd.f32 %v8021_v6, %v2751_v36  ;;  %v8023_v55 = vpop.f32.mrb[77].mxu0 }
 0x2e6   : > { %v7959_v13 = vpop.f32.mrb[93].mxu1  ;;  %v8024_v37 = vadd.f32 %v8023_v55, %v8022_v12  ;;  %v8025_v41 = vpop.f32.mrb[78].mxu0 }
 0x2e7   : > { %v7960_v26 = vadd.f32 %v7959_v13, %v7958_v3  ;;  %v7961_v34 = vpop.f32.mrb[94].mxu1  ;;  %v8026_v45 = vpop.f32.mrb[79].mxu0 }
 0x2e8   : > { %v7962_v46 = vpop.f32.mrb[95].mxu1  ;;  %v8027_v62 = vadd.f32 %v8026_v45, %v8025_v41 }
 0x2e9   : > { %v2756_v31 = vadd.f32 %v7960_v26, %v12161_v53  ;;  %v7963_v63 = vadd.f32 %v7962_v46, %v7961_v34 }
 0x2ea   : > { %8781 = vmatmul.mubr.msk.bf16.gmra.mrb[200].mxu1 %vm11525_vm12, %v14611_v40  ;;  %v7420_v40 = vpack.c.bf16 %v14251_v14, %v14657_v49 }
 0x2eb   : > { %v2759_v0 = vadd.f32 %v7963_v63, %v12177_v19  ;;  %8784 = vmatprep.mubr.msk.bf16.mxu1 %vm11549_vm14, %v14617_v1  ;;  %v12287_v38 = vadd.f32 %v8024_v37, %v2756_v31 }
 0x2ec   : > { %v8028_v53 = vpop.f32.mrb[80].mxu0 }
 0x2ed   : > { %v7964_v48 = vpop.f32.mrb[96].mxu1  ;;  %v12289_v10 = vadd.f32 %v8027_v62, %v2759_v0  ;;  %v8029_v42 = vpop.f32.mrb[81].mxu0 }
 0x2ee   : > { %v7965_v22 = vpop.f32.mrb[97].mxu1  ;;  %v8030_v4 = vadd.f32 %v8029_v42, %v8028_v53  ;;  %v8031_v6 = vpop.f32.mrb[82].mxu0 }
 0x2ef   : > { %v7966_v61 = vadd.f32 %v7965_v22, %v7964_v48  ;;  %v7967_v60 = vpop.f32.mrb[98].mxu1  ;;  %v8032_v1 = vpop.f32.mrb[83].mxu0 }
 0x2f0   : > { %v7968_v7 = vpop.f32.mrb[99].mxu1  ;;  %v8033_v3 = vadd.f32 %v8032_v1, %v8031_v6 }
 0x2f1   : > { %v2764_v19 = vadd.f32 %v7966_v61, %v12188_v5  ;;  %v7969_v36 = vadd.f32 %v7968_v7, %v7967_v60 }
 0x2f2   : > { %8785 = vmatmul.mubr.msk.bf16.gmra.mrb[204].mxu1 %vm14663_vm1, %v7420_v40 }
 0x2f3   : > { %v2767_v13 = vadd.f32 %v7969_v36, %v12198_v39  ;;  %v12297_v12 = vadd.f32 %v8030_v4, %v2764_v19 }
 0x2f4   : > { %v8034_v37 = vpop.f32.mrb[84].mxu0 }
 0x2f5   : > { %v7970_v26 = vpop.f32.mrb[100].mxu1  ;;  %v12299_v34 = vadd.f32 %v8033_v3, %v2767_v13  ;;  %v8035_v49 = vpop.f32.mrb[85].mxu0 }
 0x2f6   : > { %v7971_v55 = vpop.f32.mrb[101].mxu1  ;;  %v8036_v31 = vadd.f32 %v8035_v49, %v8034_v37  ;;  %v8037_v63 = vpop.f32.mrb[86].mxu0 }
 0x2f7   : > { %v7972_v46 = vadd.f32 %v7971_v55, %v7970_v26  ;;  %v7973_v41 = vpop.f32.mrb[102].mxu1  ;;  %v8038_v0 = vpop.f32.mrb[87].mxu0 }
 0x2f8   : > { %v7974_v5 = vpop.f32.mrb[103].mxu1  ;;  %v8039_v48 = vadd.f32 %v8038_v0, %v8037_v63 }
 0x2f9   : > { %v2772_v45 = vadd.f32 %v7972_v46, %v12204_v11  ;;  %v7975_v62 = vadd.f32 %v7974_v5, %v7973_v41 }
 0x2fb   : > { %v2775_v39 = vadd.f32 %v7975_v62, %v12212_v28  ;;  %v12303_v22 = vadd.f32 %v8036_v31, %v2772_v45 }
 0x2fc   : > { %v8040_v42 = vpop.f32.mrb[88].mxu0 }
 0x2fd   : > { %v7976_v53 = vpop.f32.mrb[104].mxu1  ;;  %v12305_v61 = vadd.f32 %v8039_v48, %v2775_v39  ;;  %v8041_v6 = vpop.f32.mrb[89].mxu0 }
 0x2fe   : > { %v7977_v60 = vpop.f32.mrb[105].mxu1  ;;  %v8042_v40 = vadd.f32 %v8041_v6, %v8040_v42  ;;  %v8043_v36 = vpop.f32.mrb[90].mxu0 }
 0x2ff   : > { %v7978_v4 = vadd.f32 %v7977_v60, %v7976_v53  ;;  %v7979_v7 = vpop.f32.mrb[106].mxu1  ;;  %v8044_v3 = vpop.f32.mrb[91].mxu0 }
 0x300   : > { %v7980_v19 = vpop.f32.mrb[107].mxu1  ;;  %v8045_v13 = vadd.f32 %v8044_v3, %v8043_v36 }
 0x301   : > { %v2780_v11 = vadd.f32 %v7978_v4, %v12218_v9  ;;  %v7981_v1 = vadd.f32 %v7980_v19, %v7979_v7 }
 0x303   : > { %v2783_v28 = vadd.f32 %v7981_v1, %v12226_v50  ;;  %v12309_v26 = vadd.f32 %v8042_v40, %v2780_v11 }
 0x304   : > { %v8046_v41 = vpop.f32.mrb[92].mxu0 }
 0x305   : > { %v7982_v55 = vpop.f32.mrb[108].mxu1  ;;  %v12311_v37 = vadd.f32 %v8045_v13, %v2783_v28  ;;  %v8047_v5 = vpop.f32.mrb[93].mxu0 }
 0x306   : > { %v7983_v46 = vpop.f32.mrb[109].mxu1  ;;  %v8048_v63 = vadd.f32 %v8047_v5, %v8046_v41  ;;  %v8049_v62 = vpop.f32.mrb[94].mxu0 }
 0x307   : > { %v7984_v49 = vadd.f32 %v7983_v46, %v7982_v55  ;;  %v7985_v31 = vpop.f32.mrb[110].mxu1  ;;  %v8050_v48 = vpop.f32.mrb[95].mxu0 }
 0x308   : > { %v7986_v45 = vpop.f32.mrb[111].mxu1  ;;  %v8051_v39 = vadd.f32 %v8050_v48, %v8049_v62 }
 0x309   : > { %v2788_v9 = vadd.f32 %v7984_v49, %v12232_v15  ;;  %v7987_v0 = vadd.f32 %v7986_v45, %v7985_v31 }
 0x30b   : > { %v2791_v50 = vadd.f32 %v7987_v0, %v12240_v44  ;;  %v12315_v53 = vadd.f32 %v8048_v63, %v2788_v9 }
 0x30c   : > { %v8148_v40 = vpop.f32.mrb[96].mxu0 }
 0x30d   : > { %v8742_v60 = vpop.f32.mrb[112].mxu1  ;;  %v12317_v42 = vadd.f32 %v8051_v39, %v2791_v50  ;;  %v8149_v15 = vpop.f32.mrb[97].mxu0 }
 0x30e   : > { %v2934_v4 = vadd.f32 %v8742_v60, %v12262_v58  ;;  %v2925_v7 = vpop.f32.mrb[113].mxu1  ;;  %v12322_v1 = vadd.f32 %v8149_v15, %v8148_v40  ;;  %v8151_v3 = vpop.f32.mrb[98].mxu0 }
 0x30f   : > { %v2926_v6 = vadd.f32 %v2925_v7, %v12250_v57  ;;  %v8743_v19 = vpop.f32.mrb[114].mxu1  ;;  %v8152_v55 = vpop.f32.mrb[99].mxu0  ;;  %v9267_v57 = vld [vmem:[%s13922_s7 + $0x40] sm:$0xff]  }
 0x310   : > { %v2937_v36 = vadd.f32 %v8743_v19, %v12264_v33  ;;  %v2928_v11 = vpop.f32.mrb[115].mxu1  ;;  %v2990_v13 = vmax.f32 %v2934_v4, 0.0  ;;  %v12325_v58 = vadd.f32 %v8152_v55, %v8151_v3  ;;  %v9268_v33 = vld [vmem:[%s13922_s7] sm:$0xff]   ;;  %8340 = vmatprep.subr.bf16.mxu0 %v9267_v57 }
 0x311   : > { %v2929_v44 = vadd.f32 %v2928_v11, %v12252_v35  ;;  %v2988_v46 = vmax.f32 %v2926_v6, 0.0  ;;  %8341 = vmatpush3.bf16.msra.mxu0 %v9268_v33 }
 0x312   : > { %v2991_v28 = vmax.f32 %v2937_v36, 0.0 }
 0x313   : > { %v2989_v41 = vmax.f32 %v2929_v44, 0.0 }
 0x314   : > { %v12333_v49 = vpack.c.bf16 %v2991_v28, %v2990_v13  ;;  %v8154_v62 = vpop.f32.mrb[100].mxu0 }
 0x315   : > { %v12335_v31 = vpack.c.bf16 %v2989_v41, %v2988_v46  ;;  %v8746_v35 = vpop.f32.mrb[116].mxu1  ;;  %v8155_v48 = vpop.f32.mrb[101].mxu0 }
 0x316   : > { %14664 = vst [vmem:[#allocation70_spill] sm:$0xff] %v12333_v49  ;;  %v2950_v5 = vadd.f32 %v8746_v35, %v12287_v38  ;;  %v2941_v63 = vpop.f32.mrb[117].mxu1  ;;  %v12340_v50 = vadd.f32 %v8155_v48, %v8154_v62  ;;  %v8157_v4 = vpop.f32.mrb[102].mxu0 }
 0x317   : > { %14665 = vst [vmem:[#allocation16_spill] sm:$0xff] %v12335_v31  ;;  %v2942_v45 = vadd.f32 %v2941_v63, %v12275_v27  ;;  %v8747_v9 = vpop.f32.mrb[118].mxu1  ;;  %v8158_v40 = vpop.f32.mrb[103].mxu0  ;;  %v9269_v27 = vld [vmem:[%s13922_s7 + $0x48] sm:$0xff]  }
 0x318   : > { %v2953_v0 = vadd.f32 %v8747_v9, %v12289_v10  ;;  %v2944_v39 = vpop.f32.mrb[119].mxu1  ;;  %v2994_v7 = vmax.f32 %v2950_v5, 0.0  ;;  %v12343_v36 = vadd.f32 %v8158_v40, %v8157_v4  ;;  %v9270_v10 = vld [vmem:[%s13922_s7 + $0x8] sm:$0xff]   ;;  %8342 = vmatprep.subr.bf16.mxu0 %v9269_v27 }
 0x319   : > { %v2945_v60 = vadd.f32 %v2944_v39, %v12277_v29  ;;  %v2992_v19 = vmax.f32 %v2942_v45, 0.0  ;;  %8343 = vmatpush3.bf16.msra.mxu0 %v9270_v10 }
 0x31a   : > { %v2995_v6 = vmax.f32 %v2953_v0, 0.0 }
 0x31b   : > { %v2993_v38 = vmax.f32 %v2945_v60, 0.0 }
 0x31c   : > { %v12351_v15 = vpack.c.bf16 %v2995_v6, %v2994_v7  ;;  %v8160_v28 = vpop.f32.mrb[104].mxu0 }
 0x31d   : > { %v12353_v11 = vpack.c.bf16 %v2993_v38, %v2992_v19  ;;  %v8750_v29 = vpop.f32.mrb[120].mxu1  ;;  %v8161_v41 = vpop.f32.mrb[105].mxu0 }
 0x31e   : > { %14666 = vst [vmem:[#allocation10_spill] sm:$0xff] %v12351_v15  ;;  %v2966_v44 = vadd.f32 %v8750_v29, %v12303_v22  ;;  %v2957_v3 = vpop.f32.mrb[121].mxu1  ;;  %v12358_v33 = vadd.f32 %v8161_v41, %v8160_v28  ;;  %v8163_v5 = vpop.f32.mrb[106].mxu0 }
 0x31f   : > { %14667 = vst [vmem:[#allocation8_spill] sm:$0xff] %v12353_v11  ;;  %v2958_v13 = vadd.f32 %v2957_v3, %v12297_v12  ;;  %v8751_v55 = vpop.f32.mrb[122].mxu1  ;;  %v8164_v62 = vpop.f32.mrb[107].mxu0  ;;  %v9271_v12 = vld [vmem:[%s13922_s7 + $0x50] sm:$0xff]  }
 0x320   : > { %v2969_v46 = vadd.f32 %v8751_v55, %v12305_v61  ;;  %v2960_v57 = vpop.f32.mrb[123].mxu1  ;;  %v2998_v63 = vmax.f32 %v2966_v44, 0.0  ;;  %v12361_v0 = vadd.f32 %v8164_v62, %v8163_v5  ;;  %v9272_v61 = vld [vmem:[%s13922_s7 + $0x10] sm:$0xff]   ;;  %8344 = vmatprep.subr.bf16.mxu0 %v9271_v12 }
 0x321   : > { %v2961_v35 = vadd.f32 %v2960_v57, %v12299_v34  ;;  %v2996_v9 = vmax.f32 %v2958_v13, 0.0  ;;  %8345 = vmatpush3.bf16.msra.mxu0 %v9272_v61 }
 0x322   : > { %v2999_v45 = vmax.f32 %v2969_v46, 0.0 }
 0x323   : > { %v2997_v22 = vmax.f32 %v2961_v35, 0.0  ;;  %v12394_v35 = vld [vmem:[%s13921_s6] ss:$0 sm:$0xff] }
 0x324   : > { %v12369_v48 = vpack.c.bf16 %v2999_v45, %v2998_v63  ;;  %v8166_v6 = vpop.f32.mrb[108].mxu0 }
 0x325   : > { %v12371_v39 = vpack.c.bf16 %v2997_v22, %v2996_v9  ;;  %v8754_v34 = vpop.f32.mrb[124].mxu1  ;;  %v8167_v38 = vpop.f32.mrb[109].mxu0 }
 0x326   : > { %14668 = vst [vmem:[#allocation23_spill] sm:$0xff] %v12369_v48  ;;  %v2982_v60 = vadd.f32 %v8754_v34, %v12315_v53  ;;  %v2973_v4 = vpop.f32.mrb[125].mxu1  ;;  %v12376_v10 = vadd.f32 %v8167_v38, %v8166_v6  ;;  %v8169_v44 = vpop.f32.mrb[110].mxu0 }
 0x327   : > { %14669 = vst [vmem:[#allocation17_spill] sm:$0xff] %v12371_v39  ;;  %v2974_v7 = vadd.f32 %v2973_v4, %v12309_v26  ;;  %v8755_v40 = vpop.f32.mrb[126].mxu1  ;;  %v8170_v28 = vpop.f32.mrb[111].mxu0  ;;  %v9273_v26 = vld [vmem:[%s13922_s7 + $0x58] sm:$0xff]  }
 0x328   : > { %v2985_v19 = vadd.f32 %v8755_v40, %v12317_v42  ;;  %v2976_v27 = vpop.f32.mrb[127].mxu1  ;;  %v3002_v3 = vmax.f32 %v2982_v60, 0.0  ;;  %v12379_v46 = vadd.f32 %v8170_v28, %v8169_v44  ;;  %v9274_v42 = vld [vmem:[%s13922_s7 + $0x18] sm:$0xff]   ;;  %8346 = vmatprep.subr.bf16.mxu0 %v9273_v26 }
 0x329   : > { %v2977_v29 = vadd.f32 %v2976_v27, %v12311_v37  ;;  %v3000_v55 = vmax.f32 %v2974_v7, 0.0  ;;  %8347 = vmatpush3.bf16.msra.mxu0 %v9274_v42 }
 0x32a   : > { %v3003_v13 = vmax.f32 %v2985_v19, 0.0 }
 0x32b   : > { %v3001_v53 = vmax.f32 %v2977_v29, 0.0 }
 0x32c   : > { %v12387_v41 = vpack.c.bf16 %v3003_v13, %v3002_v3  ;;  %v8172_v45 = vpop.f32.mrb[112].mxu0 }
 0x32d   : > { %v12389_v57 = vpack.c.bf16 %v3001_v53, %v3000_v55  ;;  %v8084_v37 = vpop.f32.mrb[128].mxu1  ;;  %v8173_v9 = vpop.f32.mrb[113].mxu0  ;;  %v9275_v55 = vld [vmem:[%s13922_s7 + $0x60] sm:$0xff]  }
 0x32e   : > { %14670 = vst [vmem:[#allocation81_spill] sm:$0xff] %v12387_v41  ;;  %v8085_v5 = vpop.f32.mrb[129].mxu1  ;;  %v12397_v61 = vadd.f32 %v8173_v9, %v8172_v45  ;;  %v8175_v60 = vpop.f32.mrb[114].mxu0  ;;  %v9276_v53 = vld [vmem:[%s13922_s7 + $0x20] sm:$0xff]   ;;  %8348 = vmatprep.subr.bf16.mxu0 %v9275_v55 }
 0x32f   : > { %14671 = vst [vmem:[#allocation21_spill] sm:$0xff] %v12389_v57  ;;  %v8086_v63 = vadd.f32 %v8085_v5, %v8084_v37  ;;  %v8087_v62 = vpop.f32.mrb[130].mxu1  ;;  %v8176_v4 = vpop.f32.mrb[115].mxu0  ;;  %v9278_v5 = vld [vmem:[%s13922_s7 + $0x80] sm:$0xff]   ;;  %8349 = vmatpush3.bf16.msra.mxu0 %v9276_v53 }
 0x330   : > { %v8088_v22 = vpop.f32.mrb[131].mxu1  ;;  %v12400_v6 = vadd.f32 %v8176_v4, %v8175_v60  ;;  %v9282_v4 = vld [vmem:[%s13922_s7 + $0x28] sm:$0xff]  }
 0x331   : > { %v3886_v12 = vadd.f32 %v8086_v63, %v12394_v35  ;;  %v8089_v34 = vadd.f32 %v8088_v22, %v8087_v62  ;;  %v9279_v22 = vld [vmem:[%s13922_s7 + $0xc8] sm:$0xff]  }
 0x333   : > { %v3889_v7 = vadd.f32 %v8089_v34, %v12394_v35  ;;  %v12403_v40 = vadd.f32 %v12322_v1, %v3886_v12  ;;  %v9277_v1 = vld [vmem:[%s13922_s7 + $0xc0] sm:$0xff]   ;;  %v9280_v12 = vld [vmem:[%s13922_s7 + $0x88] sm:$0xff]  }
 0x334   : > { %v8178_v44 = vpop.f32.mrb[116].mxu0  ;;  %8404 = vmatprep.subr.bf16.mxu1 %v9277_v1 }
 0x335   : > { %v8090_v19 = vpop.f32.mrb[132].mxu1  ;;  %v12406_v38 = vadd.f32 %v12325_v58, %v3889_v7  ;;  %v8179_v13 = vpop.f32.mrb[117].mxu0  ;;  %8405 = vmatpush3.bf16.msra.mxu1 %v9278_v5  ;;  %v9283_v7 = vld [vmem:[%s13922_s7 + $0xd0] sm:$0xff]  }
 0x336   : > { %v8091_v27 = vpop.f32.mrb[133].mxu1  ;;  %v12418_v26 = vadd.f32 %v8179_v13, %v8178_v44  ;;  %v8181_v37 = vpop.f32.mrb[118].mxu0  ;;  %8406 = vmatprep.subr.bf16.mxu1 %v9279_v22 }
 0x337   : > { %v8092_v29 = vadd.f32 %v8091_v27, %v8090_v19  ;;  %v8093_v3 = vpop.f32.mrb[134].mxu1  ;;  %v8182_v63 = vpop.f32.mrb[119].mxu0 }
 0x338   : > { %v8094_v28 = vpop.f32.mrb[135].mxu1  ;;  %v12424_v62 = vadd.f32 %v8182_v63, %v8181_v37  ;;  %v9285_v63 = vld [vmem:[%s13922_s7 + $0xd8] sm:$0xff]  }
 0x339   : > { %v3894_v58 = vadd.f32 %v8092_v29, %v12394_v35  ;;  %v8095_v42 = vadd.f32 %v8094_v28, %v8093_v3  ;;  %8407 = vmatpush3.bf16.msra.mxu1 %v9280_v12 }
 0x33a   : > { %8408 = vmatprep.subr.bf16.mxu1 %v9283_v7 }
 0x33b   : > { %v3897_v45 = vadd.f32 %v8095_v42, %v12394_v35  ;;  %v12427_v9 = vadd.f32 %v12340_v50, %v3894_v58  ;;  %v9281_v50 = vld [vmem:[%s13922_s7 + $0x68] sm:$0xff]  }
 0x33c   : > { %v8184_v29 = vpop.f32.mrb[120].mxu0  ;;  %8350 = vmatprep.subr.bf16.mxu0 %v9281_v50  ;;  %v9289_v50 = vld [vmem:[%s13922_s7 + $0xe0] sm:$0xff]  }
 0x33d   : > { %v8096_v34 = vpop.f32.mrb[136].mxu1  ;;  %v12436_v60 = vadd.f32 %v12343_v36, %v3897_v45  ;;  %v9284_v36 = vld [vmem:[%s13922_s7 + $0x90] sm:$0xff]   ;;  %v8185_v3 = vpop.f32.mrb[121].mxu0  ;;  %8351 = vmatpush3.bf16.msra.mxu0 %v9282_v4  ;;  %v9286_v45 = vld [vmem:[%s13922_s7 + $0x98] sm:$0xff]  }
 0x33e   : > { %v8097_v19 = vpop.f32.mrb[137].mxu1  ;;  %v12451_v55 = vadd.f32 %v8185_v3, %v8184_v29  ;;  %v8187_v1 = vpop.f32.mrb[122].mxu0  ;;  %8409 = vmatpush3.bf16.msra.mxu1 %v9284_v36 }
 0x33f   : > { %v8098_v27 = vadd.f32 %v8097_v19, %v8096_v34  ;;  %v8099_v44 = vpop.f32.mrb[138].mxu1  ;;  %v8188_v58 = vpop.f32.mrb[123].mxu0  ;;  %8410 = vmatprep.subr.bf16.mxu1 %v9285_v63  ;;  %v9287_v34 = vld [vmem:[%s13922_s7 + $0x70] sm:$0xff]   ;;  %v9291_v63 = vld [vmem:[%s13922_s7 + $0xe8] sm:$0xff]  }
 0x340   : > { %v8100_v13 = vpop.f32.mrb[139].mxu1  ;;  %v12454_v37 = vadd.f32 %v8188_v58, %v8187_v1  ;;  %8352 = vmatprep.subr.bf16.mxu0 %v9287_v34 }
 0x341   : > { %v3902_v28 = vadd.f32 %v8098_v27, %v12394_v35  ;;  %v8101_v53 = vadd.f32 %v8100_v13, %v8099_v44 }
 0x342   : > { %8411 = vmatpush3.bf16.msra.mxu1 %v9286_v45 }
 0x343   : > { %v3905_v42 = vadd.f32 %v8101_v53, %v12394_v35  ;;  %v12457_v5 = vadd.f32 %v12358_v33, %v3902_v28  ;;  %v9288_v33 = vld [vmem:[%s13922_s7 + $0x30] sm:$0xff]   ;;  %8412 = vmatprep.subr.bf16.mxu1 %v9289_v50 }
 0x344   : > { %v8190_v19 = vpop.f32.mrb[124].mxu0  ;;  %8353 = vmatpush3.bf16.msra.mxu0 %v9288_v33 }
 0x345   : > { %v8102_v22 = vpop.f32.mrb[140].mxu1  ;;  %v12466_v12 = vadd.f32 %v12361_v0, %v3905_v42  ;;  %v9290_v0 = vld [vmem:[%s13922_s7 + $0xa0] sm:$0xff]   ;;  %v8191_v29 = vpop.f32.mrb[125].mxu0 }
 0x346   : > { %v8103_v4 = vpop.f32.mrb[141].mxu1  ;;  %v12481_v3 = vadd.f32 %v8191_v29, %v8190_v19  ;;  %v8193_v28 = vpop.f32.mrb[126].mxu0  ;;  %8413 = vmatpush3.bf16.msra.mxu1 %v9290_v0  ;;  %v9294_v19 = vld [vmem:[%s13922_s7 + $0x38] sm:$0xff]   ;;  %v9295_v0 = vld [vmem:[%s13922_s7 + $0xf0] sm:$0xff]  }
 0x347   : > { %v8104_v7 = vadd.f32 %v8103_v4, %v8102_v22  ;;  %v8105_v27 = vpop.f32.mrb[142].mxu1  ;;  %v8194_v53 = vpop.f32.mrb[127].mxu0  ;;  %8414 = vmatprep.subr.bf16.mxu1 %v9291_v63  ;;  %v9297_v63 = vld [vmem:[%s13922_s7 + $0xf8] sm:$0xff]  }
 0x348   : > { %v8106_v44 = vpop.f32.mrb[143].mxu1  ;;  %v12484_v58 = vadd.f32 %v8194_v53, %v8193_v28  ;;  %v9296_v28 = vld [vmem:[%s13922_s7 + $0xb0] sm:$0xff]   ;;  %v9299_v53 = vld [vmem:[%s13922_s7 + $0x140] sm:$0xff]  }
 0x349   : > { %v3910_v36 = vadd.f32 %v8104_v7, %v12394_v35  ;;  %v8107_v13 = vadd.f32 %v8106_v44, %v8105_v27  ;;  %v9292_v7 = vld [vmem:[%s13922_s7 + $0xa8] sm:$0xff]  }
 0x34a   : > { %8415 = vmatpush3.bf16.msra.mxu1 %v9292_v7  ;;  %v9298_v7 = vld [vmem:[%s13922_s7 + $0xb8] sm:$0xff]  }
 0x34b   : > { %v3913_v1 = vadd.f32 %v8107_v13, %v12394_v35  ;;  %v12487_v42 = vadd.f32 %v12376_v10, %v3910_v36  ;;  %v9293_v10 = vld [vmem:[%s13922_s7 + $0x78] sm:$0xff]   ;;  %8416 = vmatprep.subr.bf16.mxu1 %v9295_v0 }
 0x34c   : > { %v8276_v50 = vpop.f32.mrb[128].mxu0  ;;  %8354 = vmatprep.subr.bf16.mxu0 %v9293_v10 }
 0x34d   : > { %v8108_v45 = vpop.f32.mrb[144].mxu1  ;;  %v12493_v22 = vadd.f32 %v12379_v46, %v3913_v1  ;;  %v8277_v27 = vpop.f32.mrb[129].mxu0  ;;  %8355 = vmatpush3.bf16.msra.mxu0 %v9294_v19 }
 0x34e   : > { %v8109_v34 = vpop.f32.mrb[145].mxu1  ;;  %v12508_v44 = vadd.f32 %v8277_v27, %v8276_v50  ;;  %v8279_v13 = vpop.f32.mrb[130].mxu0  ;;  %8468 = vmatprep.subr.bf16.mxu0 %v9299_v53  ;;  %8417 = vmatpush3.bf16.msra.mxu1 %v9296_v28 }
 0x34f   : > { %v8110_v33 = vadd.f32 %v8109_v34, %v8108_v45  ;;  %v8111_v4 = vpop.f32.mrb[146].mxu1  ;;  %v8280_v1 = vpop.f32.mrb[131].mxu0  ;;  %8418 = vmatprep.subr.bf16.mxu1 %v9297_v63 }
 0x350   : > { %v8112_v46 = vpop.f32.mrb[147].mxu1  ;;  %v12520_v34 = vadd.f32 %v8280_v1, %v8279_v13 }
 0x351   : > { %v3918_v29 = vadd.f32 %v8110_v33, %v12394_v35  ;;  %v8113_v36 = vadd.f32 %v8112_v46, %v8111_v4 }
 0x352   : > { %8419 = vmatpush3.bf16.msra.mxu1 %v9298_v7 }
 0x353   : > { %v3921_v45 = vadd.f32 %v8113_v36, %v12394_v35  ;;  %v12523_v33 = vadd.f32 %v12397_v61, %v3918_v29 }
 0x354   : > { %v8282_v27 = vpop.f32.mrb[132].mxu0 }
 0x355   : > { %v8114_v50 = vpop.f32.mrb[148].mxu1  ;;  %v12526_v4 = vadd.f32 %v12400_v6, %v3921_v45  ;;  %v8283_v0 = vpop.f32.mrb[133].mxu0 }
 0x356   : > { %v8115_v10 = vpop.f32.mrb[149].mxu1  ;;  %v12532_v29 = vadd.f32 %v8283_v0, %v8282_v27  ;;  %v8285_v53 = vpop.f32.mrb[134].mxu0 }
 0x357   : > { %v8116_v19 = vadd.f32 %v8115_v10, %v8114_v50  ;;  %v8117_v46 = vpop.f32.mrb[150].mxu1  ;;  %v8286_v6 = vpop.f32.mrb[135].mxu0 }
 0x358   : > { %v8118_v36 = vpop.f32.mrb[151].mxu1  ;;  %v12535_v1 = vadd.f32 %v8286_v6, %v8285_v53 }
 0x359   : > { %v3926_v61 = vadd.f32 %v8116_v19, %v12394_v35  ;;  %v8119_v13 = vadd.f32 %v8118_v36, %v8117_v46 }
 0x35b   : > { %v3929_v28 = vadd.f32 %v8119_v13, %v12394_v35  ;;  %v12538_v45 = vadd.f32 %v12418_v26, %v3926_v61 }
 0x35c   : > { %v8288_v19 = vpop.f32.mrb[136].mxu0 }
 0x35d   : > { %v8120_v63 = vpop.f32.mrb[152].mxu1  ;;  %v12541_v50 = vadd.f32 %v12424_v62, %v3929_v28  ;;  %v8289_v0 = vpop.f32.mrb[137].mxu0 }
 0x35e   : > { %v8121_v10 = vpop.f32.mrb[153].mxu1  ;;  %v12544_v36 = vadd.f32 %v8289_v0, %v8288_v19  ;;  %v8291_v53 = vpop.f32.mrb[138].mxu0 }
 0x35f   : > { %v8122_v41 = vadd.f32 %v8121_v10, %v8120_v63  ;;  %v8123_v27 = vpop.f32.mrb[154].mxu1  ;;  %v8292_v6 = vpop.f32.mrb[139].mxu0 }
 0x360   : > { %v8124_v46 = vpop.f32.mrb[155].mxu1  ;;  %v12547_v61 = vadd.f32 %v8292_v6, %v8291_v53 }
 0x361   : > { %v3934_v7 = vadd.f32 %v8122_v41, %v12394_v35  ;;  %v8125_v13 = vadd.f32 %v8124_v46, %v8123_v27 }
 0x363   : > { %v3937_v26 = vadd.f32 %v8125_v13, %v12394_v35  ;;  %v12550_v62 = vadd.f32 %v12451_v55, %v3934_v7 }
 0x364   : > { %v8294_v48 = vpop.f32.mrb[140].mxu0 }
 0x365   : > { %v8126_v28 = vpop.f32.mrb[156].mxu1  ;;  %v12553_v63 = vadd.f32 %v12454_v37, %v3937_v26  ;;  %v8295_v19 = vpop.f32.mrb[141].mxu0 }
 0x366   : > { %v8127_v10 = vpop.f32.mrb[157].mxu1  ;;  %v12556_v46 = vadd.f32 %v8295_v19, %v8294_v48  ;;  %v8297_v53 = vpop.f32.mrb[142].mxu0 }
 0x367   : > { %v8128_v57 = vadd.f32 %v8127_v10, %v8126_v28  ;;  %v8129_v41 = vpop.f32.mrb[158].mxu1  ;;  %v8298_v6 = vpop.f32.mrb[143].mxu0 }
 0x368   : > { %v8130_v0 = vpop.f32.mrb[159].mxu1  ;;  %v12559_v7 = vadd.f32 %v8298_v6, %v8297_v53 }
 0x369   : > { %v3942_v27 = vadd.f32 %v8128_v57, %v12394_v35  ;;  %v8131_v13 = vadd.f32 %v8130_v0, %v8129_v41 }
 0x36b   : > { %v3945_v55 = vadd.f32 %v8131_v13, %v12394_v35  ;;  %v12562_v37 = vadd.f32 %v12481_v3, %v3942_v27  ;;  %v9309_v3 = vld [vmem:[%s13922_s7 + $0x1c0] sm:$0xff]  }
 0x36c   : > { %v8300_v56 = vpop.f32.mrb[144].mxu0  ;;  %8532 = vmatprep.subr.bf16.mxu1 %v9309_v3 }
 0x36d   : > { %v8212_v26 = vpop.f32.mrb[160].mxu1  ;;  %v12565_v28 = vadd.f32 %v12484_v58, %v3945_v55  ;;  %v8301_v48 = vpop.f32.mrb[145].mxu0 }
 0x36e   : > { %v8213_v10 = vpop.f32.mrb[161].mxu1  ;;  %v12568_v0 = vadd.f32 %v8301_v48, %v8300_v56  ;;  %v8303_v13 = vpop.f32.mrb[146].mxu0 }
 0x36f   : > { %v8214_v39 = vadd.f32 %v8213_v10, %v8212_v26  ;;  %v8215_v57 = vpop.f32.mrb[162].mxu1  ;;  %v8304_v53 = vpop.f32.mrb[147].mxu0 }
 0x370   : > { %v8216_v19 = vpop.f32.mrb[163].mxu1  ;;  %v8305_v27 = vadd.f32 %v8304_v53, %v8303_v13 }
 0x371   : > { %v4080_v41 = vadd.f32 %v8214_v39, %v12403_v40  ;;  %v8217_v35 = vadd.f32 %v8216_v19, %v8215_v57 }
 0x373   : > { %v4083_v58 = vadd.f32 %v8217_v35, %v12406_v38  ;;  %v12575_v6 = vadd.f32 %v12508_v44, %v4080_v41 }
 0x374   : > { %v8306_v40 = vpop.f32.mrb[148].mxu0 }
 0x375   : > { %v8218_v55 = vpop.f32.mrb[164].mxu1  ;;  %v12578_v26 = vadd.f32 %v12520_v34, %v4083_v58  ;;  %v8307_v57 = vpop.f32.mrb[149].mxu0 }
 0x376   : > { %v8219_v56 = vpop.f32.mrb[165].mxu1  ;;  %v8308_v15 = vadd.f32 %v8307_v57, %v8306_v40  ;;  %v8309_v38 = vpop.f32.mrb[150].mxu0 }
 0x377   : > { %v8220_v39 = vadd.f32 %v8219_v56, %v8218_v55  ;;  %v8221_v10 = vpop.f32.mrb[166].mxu1  ;;  %v8310_v35 = vpop.f32.mrb[151].mxu0 }
 0x378   : > { %v8222_v48 = vpop.f32.mrb[167].mxu1  ;;  %v8311_v41 = vadd.f32 %v8310_v35, %v8309_v38 }
 0x379   : > { %v4088_v19 = vadd.f32 %v8220_v39, %v12427_v9  ;;  %v8223_v11 = vadd.f32 %v8222_v48, %v8221_v10 }
 0x37b   : > { %v4091_v44 = vadd.f32 %v8223_v11, %v12436_v60  ;;  %v12583_v13 = vadd.f32 %v12532_v29, %v4088_v19 }
 0x37c   : > { %v8312_v55 = vpop.f32.mrb[152].mxu0 }
 0x37d   : > { %v8224_v34 = vpop.f32.mrb[168].mxu1  ;;  %v12586_v53 = vadd.f32 %v12535_v1, %v4091_v44  ;;  %v8313_v2 = vpop.f32.mrb[153].mxu0 }
 0x37e   : > { %v8225_v3 = vpop.f32.mrb[169].mxu1  ;;  %v8314_v40 = vadd.f32 %v8313_v2, %v8312_v55  ;;  %v8315_v57 = vpop.f32.mrb[154].mxu0 }
 0x37f   : > { %v8226_v58 = vadd.f32 %v8225_v3, %v8224_v34  ;;  %v8227_v56 = vpop.f32.mrb[170].mxu1  ;;  %v8316_v11 = vpop.f32.mrb[155].mxu0 }
 0x380   : > { %v8228_v9 = vpop.f32.mrb[171].mxu1  ;;  %v8317_v29 = vadd.f32 %v8316_v11, %v8315_v57 }
 0x381   : > { %v4096_v39 = vadd.f32 %v8226_v58, %v12457_v5  ;;  %v8229_v10 = vadd.f32 %v8228_v9, %v8227_v56 }
 0x383   : > { %v4099_v60 = vadd.f32 %v8229_v10, %v12466_v12  ;;  %v12591_v48 = vadd.f32 %v12544_v36, %v4096_v39 }
 0x384   : > { %v8318_v44 = vpop.f32.mrb[156].mxu0 }
 0x385   : > { %v8230_v1 = vpop.f32.mrb[172].mxu1  ;;  %v12594_v19 = vadd.f32 %v12547_v61, %v4099_v60  ;;  %v8319_v3 = vpop.f32.mrb[157].mxu0 }
 0x386   : > { %v8231_v38 = vpop.f32.mrb[173].mxu1  ;;  %v8320_v58 = vadd.f32 %v8319_v3, %v8318_v44  ;;  %v8321_v56 = vpop.f32.mrb[158].mxu0 }
 0x387   : > { %v8232_v35 = vadd.f32 %v8231_v38, %v8230_v1  ;;  %v8233_v34 = vpop.f32.mrb[174].mxu1  ;;  %v8322_v12 = vpop.f32.mrb[159].mxu0 }
 0x388   : > { %v8234_v5 = vpop.f32.mrb[175].mxu1  ;;  %v8323_v36 = vadd.f32 %v8322_v12, %v8321_v56 }
 0x389   : > { %v4104_v2 = vadd.f32 %v8232_v35, %v12487_v42  ;;  %v8235_v55 = vadd.f32 %v8234_v5, %v8233_v34 }
 0x38b   : > { %v4107_v9 = vadd.f32 %v8235_v55, %v12493_v22  ;;  %v12599_v39 = vadd.f32 %v12556_v46, %v4104_v2 }
 0x38d   : > { %v8236_v61 = vpop.f32.mrb[176].mxu1  ;;  %v12602_v10 = vadd.f32 %v12559_v7, %v4107_v9 }
 0x38e   : > { %v8237_v57 = vpop.f32.mrb[177].mxu1 }
 0x38f   : > { %v8238_v11 = vadd.f32 %v8237_v57, %v8236_v61  ;;  %v8239_v60 = vpop.f32.mrb[178].mxu1 }
 0x390   : > { %v8240_v1 = vpop.f32.mrb[179].mxu1 }
 0x391   : > { %v4112_v42 = vadd.f32 %v8238_v11, %v12523_v33  ;;  %v8241_v38 = vadd.f32 %v8240_v1, %v8239_v60 }
 0x393   : > { %v4115_v35 = vadd.f32 %v8241_v38, %v12526_v4  ;;  %v12607_v44 = vadd.f32 %v12568_v0, %v4112_v42 }
 0x395   : > { %v8242_v22 = vpop.f32.mrb[180].mxu1  ;;  %v12609_v34 = vadd.f32 %v8305_v27, %v4115_v35 }
 0x396   : > { %v8243_v46 = vpop.f32.mrb[181].mxu1 }
 0x397   : > { %v8244_v3 = vadd.f32 %v8243_v46, %v8242_v22  ;;  %v8245_v5 = vpop.f32.mrb[182].mxu1 }
 0x398   : > { %v8246_v7 = vpop.f32.mrb[183].mxu1 }
 0x399   : > { %v4120_v2 = vadd.f32 %v8244_v3, %v12538_v45  ;;  %v8247_v55 = vadd.f32 %v8246_v7, %v8245_v5 }
 0x39b   : > { %v4123_v56 = vadd.f32 %v8247_v55, %v12541_v50  ;;  %v12613_v12 = vadd.f32 %v8308_v15, %v4120_v2 }
 0x39d   : > { %v8248_v33 = vpop.f32.mrb[184].mxu1  ;;  %v12615_v9 = vadd.f32 %v8311_v41, %v4123_v56 }
 0x39e   : > { %v8249_v4 = vpop.f32.mrb[185].mxu1 }
 0x39f   : > { %v8250_v0 = vadd.f32 %v8249_v4, %v8248_v33  ;;  %v8251_v61 = vpop.f32.mrb[186].mxu1 }
 0x3a0   : > { %v8252_v57 = vpop.f32.mrb[187].mxu1 }
 0x3a1   : > { %v4128_v27 = vadd.f32 %v8250_v0, %v12550_v62  ;;  %v8253_v11 = vadd.f32 %v8252_v57, %v8251_v61 }
 0x3a3   : > { %v4131_v60 = vadd.f32 %v8253_v11, %v12553_v63  ;;  %v12619_v1 = vadd.f32 %v8314_v40, %v4128_v27 }
 0x3a5   : > { %v8254_v45 = vpop.f32.mrb[188].mxu1  ;;  %v12621_v42 = vadd.f32 %v8317_v29, %v4131_v60 }
 0x3a6   : > { %v8255_v50 = vpop.f32.mrb[189].mxu1 }
 0x3a7   : > { %v8256_v15 = vadd.f32 %v8255_v50, %v8254_v45  ;;  %v8257_v38 = vpop.f32.mrb[190].mxu1 }
 0x3a8   : > { %v8258_v35 = vpop.f32.mrb[191].mxu1 }
 0x3a9   : > { %v4136_v41 = vadd.f32 %v8256_v15, %v12562_v37  ;;  %v8259_v22 = vadd.f32 %v8258_v35, %v8257_v38  ;;  %v14675_v38 = vld [vmem:[#allocation7_spill] sm:$0xff] }
 0x3aa   : > { %vm14676_vm1 = vcmp.lt.s32.totalorder %v14675_v38, 1  ;;  %vm14677_vm0 = vcmp.lt.s32.totalorder %v14675_v38, 7  ;;  %v14758_v38 = vld [vmem:[#allocation62_spill] sm:$0xff] }
 0x3ab   : > { %v4139_v46 = vadd.f32 %v8259_v22, %v12565_v28  ;;  %v12625_v3 = vadd.f32 %v8320_v58, %v4136_v41  ;;  %vm14679_vm5 = vmmov %vm14677_vm0 }
 0x3ac   : > { %vm14681_vm10 = vmmov %vm14676_vm1 }
 0x3ad   : > { %v8774_v62 = vpop.f32.mrb[192].mxu1  ;;  %v12627_v5 = vadd.f32 %v8323_v36, %v4139_v46  ;;  %vm14689_vm4 = vmmov %vm14676_vm1 }
 0x3ae   : > { %v4282_v63 = vadd.f32 %v8774_v62, %v12583_v13  ;;  %v4273_v40 = vpop.f32.mrb[193].mxu1 }
 0x3af   : > { %v4274_v29 = vadd.f32 %v4273_v40, %v12575_v6  ;;  %v8775_v7 = vpop.f32.mrb[194].mxu1 }
 0x3b0   : > { %v12631_v2 = vmax.f32 %v4282_v63, 0.0  ;;  %v4285_v55 = vadd.f32 %v8775_v7, %v12586_v53  ;;  %v4276_v56 = vpop.f32.mrb[195].mxu1 }
 0x3b1   : > { %v12634_v37 = vmax.f32 %v4274_v29, 0.0  ;;  %v4277_v28 = vadd.f32 %v4276_v56, %v12578_v26 }
 0x3b2   : > { %14672 = vst [vmem:[#allocation13_spill] sm:$0xff] %v12631_v2  ;;  %v4354_v58 = vrot.slane %v12631_v2, 7  ;;  %v12638_v33 = vmax.f32 %v4285_v55, 0.0  ;;  %v4434_v36 = vrot.slane %v12631_v2, 1 }
 0x3b3   : > { %v14143_v13 = vrot.slane %v12634_v37, 7  ;;  %v12642_v4 = vmax.f32 %v4277_v28, 0.0  ;;  %v4424_v6 = vpack.c.bf16 %v12634_v37, %v14251_v14  ;;  %v14142_v53 = vrot.slane %v12634_v37, 1 }
 0x3b4   : > { %14673 = vst [vmem:[#allocation11_spill] sm:$0xff] %v12638_v33  ;;  %v4355_v0 = vrot.slane %v12638_v33, 7  ;;  %v4435_v61 = vrot.slane %v12638_v33, 1  ;;  %v14706_v20 = vrot.slane %v12634_v37, 7 }
 0x3b5   : > { %14674 = vst [vmem:[#allocation32_spill] sm:$0xff] %v12642_v4  ;;  %v4353_v57 = vrot.slane %v12642_v4, 7  ;;  %v4433_v27 = vrot.slane %v12642_v4, 1  ;;  %v8778_v60 = vpop.f32.mrb[196].mxu1  ;;  %5231 = vmatprep.mubr.bf16.mxu0 %v4424_v6  ;;  %v12657_v45 = vpack.c.bf16 %v12631_v2, %v12642_v4 }
 0x3b6   : > { %v4298_v50 = vadd.f32 %v8778_v60, %v12599_v39  ;;  %v4289_v15 = vpop.f32.mrb[197].mxu1  ;;  %v12662_v35 = vsel %vm14676_vm1, %v4354_v58, %v4355_v0  ;;  %v12666_v41 = vsel %vm14677_vm0, %v4434_v36, %v4435_v61 }
 0x3b7   : > { %14678 = vst [vmem:[#allocation25_spill] sm:$0xff] %v12666_v41  ;;  %v12672_v22 = vsel %vm14679_vm5, %v14142_v53, %v4433_v27  ;;  %v4290_v46 = vadd.f32 %v4289_v15, %v12591_v48  ;;  %v8779_v62 = vpop.f32.mrb[198].mxu1  ;;  %v12679_v39 = vsel %vm14681_vm10, %v14143_v13, %v4353_v57  ;;  %v12683_v63 = vsel %vm14676_vm1, %v4353_v57, %v4354_v58  ;;  %vm14682_vm5 = vmmov %vm14677_vm0 }
 0x3b8   : > { %14680 = vst [vmem:[#allocation85_spill] sm:$0xff] %v12672_v22  ;;  %v12685_v40 = vmax.f32 %v4298_v50, 0.0  ;;  %v4301_v29 = vadd.f32 %v8779_v62, %v12602_v10  ;;  %v4292_v7 = vpop.f32.mrb[199].mxu1  ;;  %v12695_v28 = vpack.c.bf16 %v12683_v63, %v12679_v39  ;;  %v12699_v58 = vsel %vm14682_vm5, %v4433_v27, %v4434_v36  ;;  %vm14684_vm10 = vmmov %vm14676_vm1 }
 0x3b9   : > { %v12690_v48 = vmax.f32 %v4290_v46, 0.0  ;;  %v4293_v56 = vadd.f32 %v4292_v7, %v12594_v19  ;;  %14683 = vst [vmem:[#allocation29_spill] sm:$0xff] %v12699_v58  ;;  %v12706_v10 = vpack.c.bf16 %v12666_v41, %v12699_v58  ;;  %vm14686_vm5 = vmmov %vm14676_vm1 }
 0x3ba   : > { %v4358_v6 = vrot.slane %v12685_v40, 7  ;;  %v12702_v57 = vmax.f32 %v4301_v29, 0.0  ;;  %v4438_v36 = vrot.slane %v12685_v40, 1 }
 0x3bb   : > { %v4356_v60 = vrot.slane %v12690_v48, 7  ;;  %v4436_v19 = vrot.slane %v12690_v48, 1  ;;  %v12710_v50 = vmax.f32 %v4293_v56, 0.0  ;;  %v12714_v15 = vpack.c.bf16 %v12690_v48, %v12638_v33 }
 0x3bc   : > { %v4359_v27 = vrot.slane %v12702_v57, 7 }
 0x3bd   : > { %v4357_v29 = vrot.slane %v12710_v50, 7  ;;  %v4437_v7 = vrot.slane %v12710_v50, 1  ;;  %v8782_v26 = vpop.f32.mrb[200].mxu1  ;;  %v12725_v56 = vsel %vm14684_vm10, %v4355_v0, %v4356_v60  ;;  %v12729_v11 = vpack.c.bf16 %v12685_v40, %v12710_v50  ;;  %vm14687_vm10 = vmmov %vm14677_vm0 }
 0x3be   : > { %v4314_v53 = vadd.f32 %v8782_v26, %v12613_v12  ;;  %v4305_v55 = vpop.f32.mrb[201].mxu1  ;;  %v12734_v13 = vpack.c.bf16 %v12725_v56, %v12662_v35  ;;  %v12738_v62 = vsel %vm14677_vm0, %v4435_v61, %v4436_v19  ;;  %v12742_v46 = vsel %vm14676_vm1, %v4358_v6, %v4359_v27 }
 0x3bf   : > { %14685 = vst [vmem:[#allocation20_spill] sm:$0xff] %v12738_v62  ;;  %v4306_v0 = vadd.f32 %v4305_v55, %v12607_v44  ;;  %v8783_v49 = vpop.f32.mrb[202].mxu1  ;;  %v12747_v31 = vsel %vm14686_vm5, %v4356_v60, %v4357_v29  ;;  %v12751_v12 = vsel %vm14687_vm10, %v4436_v19, %v4437_v7  ;;  %v12755_v26 = vsel %vm14689_vm4, %v4357_v29, %v4358_v6  ;;  %vm14691_vm4 = vmmov %vm14677_vm0 }
 0x3c0   : > { %14688 = vst [vmem:[#allocation19_spill] sm:$0xff] %v12751_v12  ;;  %v12757_v61 = vmax.f32 %v4314_v53, 0.0  ;;  %v4317_v17 = vadd.f32 %v8783_v49, %v12615_v9  ;;  %v4308_v24 = vpop.f32.mrb[203].mxu1  ;;  %v12764_v55 = vpack.c.bf16 %v12751_v12, %v12738_v62  ;;  %v12773_v53 = vpack.c.bf16 %v12755_v26, %v12747_v31  ;;  %vm14694_vm5 = vmmov %vm14676_vm1 }
 0x3c1   : > { %v12766_v60 = vmax.f32 %v4306_v0, 0.0  ;;  %v4309_v19 = vadd.f32 %v4308_v24, %v12609_v34  ;;  %v14690_v9 = vrot.slane %v12702_v57, 1  ;;  %v12785_v0 = vpack.c.bf16 %v12672_v22, %v14251_v14  ;;  %vm14695_vm10 = vmmov %vm14676_vm1 }
 0x3c2   : > { %v12775_v49 = vmax.f32 %v4317_v17, 0.0  ;;  %v4362_v24 = vrot.slane %v12757_v61, 7  ;;  %v12795_v2 = vsel %vm14677_vm0, %v4437_v7, %v4438_v36  ;;  %v4442_v8 = vrot.slane %v12757_v61, 1 }
 0x3c3   : > { %v12781_v29 = vsel %vm14691_vm4, %v4438_v36, %v14690_v9  ;;  %v4360_v34 = vrot.slane %v12766_v60, 7  ;;  %v12789_v6 = vmax.f32 %v4309_v19, 0.0  ;;  %14692 = vst [vmem:[#allocation28_spill] sm:$0xff] %v12795_v2  ;;  %v14696_v47 = vrot.slane %v12766_v60, 1  ;;  %vm14697_vm4 = vmmov %vm14677_vm0 }
 0x3c4   : > { %v4363_v17 = vrot.slane %v12775_v49, 7  ;;  %v12803_v19 = vpack.c.bf16 %v12781_v29, %v12795_v2  ;;  %v4443_v22 = vrot.slane %v12775_v49, 1  ;;  %vm14698_vm0 = vmmov %vm14676_vm1 }
 0x3c5   : > { %v4361_v33 = vrot.slane %v12789_v6, 7  ;;  %v4441_v4 = vrot.slane %v12789_v6, 1  ;;  %v8786_v23 = vpop.f32.mrb[204].mxu1  ;;  %v12807_v44 = vsel %vm14676_vm1, %v4359_v27, %v4360_v34  ;;  %v12813_v9 = vpack.c.bf16 %v12757_v61, %v12789_v6  ;;  %vm14701_vm1 = vmmov %vm14697_vm4 }
 0x3c6   : > { %v4330_v36 = vadd.f32 %v8786_v23, %v12625_v3  ;;  %v4321_v7 = vpop.f32.mrb[205].mxu1  ;;  %v12817_v41 = vsel %vm14694_vm5, %v4362_v24, %v4363_v17  ;;  %vm14703_vm5 = vmmov %vm14701_vm1 }
 0x3c7   : > { %14693 = vst [vmem:[#allocation48_spill] sm:$0xff] %v12813_v9  ;;  %v4322_v62 = vadd.f32 %v4321_v7, %v12619_v1  ;;  %v8787_v58 = vpop.f32.mrb[206].mxu1  ;;  %v12822_v27 = vsel %vm14695_vm10, %v4360_v34, %v4361_v33  ;;  %v12828_v23 = vsel %vm14697_vm4, %v14696_v47, %v4441_v4  ;;  %v12832_v3 = vsel %vm14698_vm0, %v4361_v33, %v4362_v24  ;;  %vm14705_vm10 = vmmov %vm14698_vm0 }
 0x3c8   : > { %14699 = vst [vmem:[#allocation35_spill] sm:$0xff] %v12832_v3  ;;  %v12835_v30 = vmax.f32 %v4330_v36, 0.0  ;;  %v4333_v1 = vadd.f32 %v8787_v58, %v12627_v5  ;;  %v4324_v7 = vpop.f32.mrb[207].mxu1  ;;  %v12847_v33 = vpack.c.bf16 %v12832_v3, %v12822_v27  ;;  %v12855_v58 = vsel %vm14701_vm1, %v4442_v8, %v4443_v22  ;;  %vm14707_vm4 = vmmov %vm14698_vm0 }
 0x3c9   : > { %v12840_v59 = vmax.f32 %v4322_v62, 0.0  ;;  %v4325_v52 = vadd.f32 %v4324_v7, %v12621_v42  ;;  %vm14710_vm0 = vmmov %vm14701_vm1 }
 0x3ca   : > { %14700 = vst [vmem:[#allocation95_spill] sm:$0xff] %v12847_v33  ;;  %v4366_v24 = vrot.slane %v12835_v30, 7  ;;  %v4446_v36 = vrot.slane %v12835_v30, 1  ;;  %v12851_v5 = vmax.f32 %v4333_v1, 0.0  ;;  %v12869_v1 = vsel %vm14703_vm5, %v4441_v4, %v4442_v8  ;;  %vm14711_vm1 = vmmov %vm14707_vm4 }
 0x3cb   : > { %v4364_v62 = vrot.slane %v12840_v59, 7  ;;  %v4444_v42 = vrot.slane %v12840_v59, 1  ;;  %v12859_v7 = vmax.f32 %v4325_v52, 0.0  ;;  %v12863_v47 = vpack.c.bf16 %v12840_v59, %v12775_v49  ;;  %vm14712_vm5 = vmmov %vm14710_vm0 }
 0x3cc   : > { %v4367_v34 = vrot.slane %v12851_v5, 7  ;;  %v4447_v33 = vrot.slane %v12851_v5, 1  ;;  %v12877_v9 = vpack.c.bf16 %v12855_v58, %v12869_v1 }
 0x3cd   : > { %14702 = vst [vmem:[#allocation27_spill] sm:$0xff] %v12863_v47  ;;  %v4365_v3 = vrot.slane %v12859_v7, 7  ;;  %v4445_v52 = vrot.slane %v12859_v7, 1  ;;  %v12881_v47 = vsel %vm14705_vm10, %v4363_v17, %v4364_v62  ;;  %v12893_v51 = vpack.c.bf16 %v12835_v30, %v12859_v7  ;;  %vm14714_vm10 = vmmov %vm14711_vm1 }
 0x3ce   : > { %14704 = vst [vmem:[#allocation53_spill] sm:$0xff] %v12877_v9  ;;  %v4383_v8 = vsel %vm14707_vm4, %v4367_v34, %v14706_v20  ;;  %v12889_v4 = vpack.c.bf16 %v12881_v47, %v12817_v41  ;;  %v12897_v12 = vsel %vm14710_vm0, %v4443_v22, %v4444_v42  ;;  %v9300_v20 = vld [vmem:[%s13922_s7 + $0x100] sm:$0xff]   ;;  %v9301_v22 = vld [vmem:[%s13922_s7 + $0x148] sm:$0xff]   ;;  %vm14715_vm4 = vmmov %vm14711_vm1  ;;  %vm14716_vm0 = vnez %v14596_v18 }
 0x3cf   : > { %14709 = vst [vmem:[#allocation66_spill] sm:$0xff] %v12893_v51  ;;  %v7496_v17 = vpack.c.bf16 %v4383_v8, %v14251_v14  ;;  %v7520_v2 = vpack.c.bf16 %v12679_v39, %v4383_v8  ;;  %v12906_v9 = vsel %vm14711_vm1, %v4364_v62, %v4365_v3  ;;  %v9310_v39 = vld [vmem:[%s13922_s7 + $0x180] sm:$0xff]   ;;  %v12926_v62 = vsel %vm14714_vm10, %v4366_v24, %v4367_v34  ;;  %v9311_v8 = vld [vmem:[%s13922_s7 + $0x1c8] sm:$0xff]   ;;  %vm14718_vm10 = vmmov %vm14712_vm5 }
 0x3d0   : > { %14708 = vst [vmem:[#allocation40_spill] sm:$0xff] %v12889_v4  ;;  %v12910_v4 = vsel %vm14712_vm5, %v4444_v42, %v4445_v52  ;;  %v12930_v42 = vsel %vm14715_vm4, %v4365_v3, %v4366_v24  ;;  %vm14717_vm1 = vnez %v14570_v21  ;;  %v12951_v18 = vsel %vm14712_vm5, %v4446_v36, %v4447_v33  ;;  %v9302_v21 = vld [vmem:[%s13922_s7 + $0x108] sm:$0xff]   ;;  %vm14723_vm4 = vmmov %vm14712_vm5 }
 0x3d1   : > { %v12922_v51 = vpack.c.bf16 %v12910_v4, %v12897_v12  ;;  %7497 = vmatmul.mubr.msk.bf16.vlgmr.msra.gmra.mrb[160].mxu0 %vm14716_vm0, %v7496_v17  ;;  %7521 = vmatprep.mubr.msk.bf16.mxu1 %vm10917_vm13, %v7520_v2  ;;  %v12943_v34 = vpack.c.bf16 %v12930_v42, %v12906_v9  ;;  %v12955_v2 = vsel %vm14718_vm10, %v4445_v52, %v4446_v36  ;;  %v14721_v36 = vrot.slane %v12766_v60, 1  ;;  %vm14725_vm0 = vmmov %vm14723_vm4 }
 0x3d2   : > { %5239 = vmatprep.mubr.bf16.mxu0 %v12657_v45  ;;  %7524 = vmatmul.mubr.msk.bf16.vlgmr.msra.gmra.mrb[208].mxu1 %vm14717_vm1, %v12785_v0  ;;  %v14719_v24 = vpack.c.bf16 %v12662_v35, %v12683_v63  ;;  %v12969_v0 = vpack.c.bf16 %v12951_v18, %v12955_v2  ;;  %v14722_v52 = vrot.slane %v12702_v57, 1  ;;  %v9303_v63 = vld [vmem:[%s13922_s7 + $0x150] sm:$0xff]  }
 0x3d3   : > { %14713 = vst [vmem:[#allocation56_spill] sm:$0xff] %v12922_v51  ;;  %v7562_v51 = vpack.c.bf16 %v12926_v62, %v12930_v42  ;;  %8469 = vmatpush3.bf16.msra.mxu0 %v9300_v20  ;;  %8533 = vmatpush3.bf16.msra.mxu1 %v9310_v39  ;;  %v9312_v20 = vld [vmem:[%s13922_s7 + $0x188] sm:$0xff]   ;;  %v9304_v35 = vld [vmem:[%s13922_s7 + $0x110] sm:$0xff]  }
 0x3d4   : > { %7527 = vmatprep.mubr.msk.bf16.mxu1 %vm10957_vm15, %v14719_v24  ;;  %14720 = vst [vmem:[#allocation49_spill] sm:$0xff] %v12969_v0  ;;  %v12977_v17 = vsel %vm14723_vm4, %v14722_v52, %v14721_v36  ;;  %8470 = vmatprep.subr.bf16.mxu0 %v9301_v22  ;;  %v9315_v22 = vld [vmem:[%s13922_s7 + $0x1d0] sm:$0xff]   ;;  %v9305_v36 = vld [vmem:[%s13922_s7 + $0x158] sm:$0xff]   ;;  %v9338_v42 = vld [vmem:[%s13922_s7 + $0x208] sm:$0xff]   ;;  %v4591_v24 = vpack.c.bf16 %v14251_v14, %v12851_v5 }
 0x3d5   : > { %8534 = vmatprep.subr.bf16.mxu1 %v9311_v8  ;;  %v14724_v8 = vrot.slane %v12634_v37, 1  ;;  %v9318_v52 = vld [vmem:[%s13922_s7 + $0x198] sm:$0xff]   ;;  %v7625_v25 = vpack.c.bf16 %v14251_v14, %v12977_v17 }
 0x3d7   : > { %v13008_v3 = vsel %vm14725_vm0, %v4447_v33, %v14724_v8  ;;  %8471 = vmatpush3.bf16.msra.mxu0 %v9302_v21  ;;  %8535 = vmatpush3.bf16.msra.mxu1 %v9312_v20  ;;  %v9316_v33 = vld [vmem:[%s13922_s7 + $0x190] sm:$0xff]   ;;  %v9317_v21 = vld [vmem:[%s13922_s7 + $0x1d8] sm:$0xff]   ;;  %v9307_v8 = vld [vmem:[%s13922_s7 + $0x160] sm:$0xff]  }
 0x3d8   : > { %8472 = vmatprep.subr.bf16.mxu0 %v9303_v63  ;;  %8536 = vmatprep.subr.bf16.mxu1 %v9315_v22  ;;  %v14726_v63 = vpack.c.bf16 %v12747_v31, %v12725_v56  ;;  %v9306_v22 = vld [vmem:[%s13922_s7 + $0x118] sm:$0xff]   ;;  %v9321_v31 = vld [vmem:[%s13922_s7 + $0x1e0] sm:$0xff]  }
 0x3d9   : > { %7500 = vmatmul.mubr.msk.bf16.gmra.mrb[164].mxu0 %vm10957_vm15, %v12695_v28  ;;  %v9308_v56 = vld [vmem:[%s13922_s7 + $0x120] sm:$0xff]   ;;  %v9380_v20 = vld [vmem:[%s13922_s7 + $0x238] sm:$0xff]  }
 0x3da   : > { %5247 = vmatprep.mubr.bf16.mxu0 %v12714_v15  ;;  %7530 = vmatmul.mubr.msk.bf16.gmra.mrb[212].mxu1 %vm11098_vm9, %v12706_v10 }
 0x3db   : > { %7533 = vmatprep.mubr.msk.bf16.mxu1 %vm11119_vm7, %v14726_v63  ;;  %8473 = vmatpush3.bf16.msra.mxu0 %v9304_v35  ;;  %v9313_v35 = vld [vmem:[%s13922_s7 + $0x168] sm:$0xff]  }
 0x3dc   : > { %8474 = vmatprep.subr.bf16.mxu0 %v9305_v36  ;;  %8537 = vmatpush3.bf16.msra.mxu1 %v9316_v33  ;;  %v9322_v36 = vld [vmem:[%s13922_s7 + $0x1a0] sm:$0xff]   ;;  %v9323_v33 = vld [vmem:[%s13922_s7 + $0x1e8] sm:$0xff]  }
 0x3dd   : > { %8538 = vmatprep.subr.bf16.mxu1 %v9317_v21  ;;  %v14729_v21 = vld [vmem:[#allocation118_spill] sm:$0xff]  ;;  %v9314_v63 = vld [vmem:[%s13922_s7 + $0x128] sm:$0xff]  }
 0x3de   : > { %vm14730_vm1 = vnez %v14729_v21  ;;  %v9326_v21 = vld [vmem:[%s13922_s7 + $0x138] sm:$0xff]  }
 0x3df   : > { %8475 = vmatpush3.bf16.msra.mxu0 %v9306_v22  ;;  %v9319_v22 = vld [vmem:[%s13922_s7 + $0x170] sm:$0xff]  }
 0x3e0   : > { %8476 = vmatprep.subr.bf16.mxu0 %v9307_v8  ;;  %8539 = vmatpush3.bf16.msra.mxu1 %v9318_v52  ;;  %v14728_v52 = vpack.c.bf16 %v12742_v46, %v12755_v26  ;;  %v9324_v8 = vld [vmem:[%s13922_s7 + $0x1a8] sm:$0xff]   ;;  %v9327_v26 = vld [vmem:[%s13922_s7 + $0x1f0] sm:$0xff]  }
 0x3e1   : > { %7503 = vmatmul.mubr.msk.bf16.gmra.mrb[168].mxu0 %vm11119_vm7, %v12734_v13  ;;  %8540 = vmatprep.subr.bf16.mxu1 %v9321_v31  ;;  %v9320_v31 = vld [vmem:[%s13922_s7 + $0x130] sm:$0xff]  }
 0x3e2   : > { %5255 = vmatprep.mubr.bf16.mxu0 %v12729_v11  ;;  %7536 = vmatmul.mubr.msk.bf16.gmra.mrb[216].mxu1 %vm11240_vm8, %v12764_v55 }
 0x3e3   : > { %7539 = vmatprep.mubr.msk.bf16.mxu1 %vm14730_vm1, %v14728_v52  ;;  %8477 = vmatpush3.bf16.msra.mxu0 %v9308_v56  ;;  %v4428_v56 = vpack.c.bf16 %v12766_v60, %v14251_v14  ;;  %v14731_v52 = vpack.c.bf16 %v12822_v27, %v12807_v44  ;;  %v9334_v27 = vld [vmem:[%s13924_s9 + $0x4] ss:$12 sps:$4 sm:$0xff]  }
 0x3e4   : > { %8478 = vmatprep.subr.bf16.mxu0 %v9313_v35  ;;  %8541 = vmatpush3.bf16.msra.mxu1 %v9322_v36  ;;  %v9325_v35 = vld [vmem:[%s13922_s7 + $0x178] sm:$0xff]   ;;  %v9328_v36 = vld [vmem:[%s13922_s7 + $0x1b0] sm:$0xff]  }
 0x3e5   : > { %8542 = vmatprep.subr.bf16.mxu1 %v9323_v33  ;;  %v9329_v33 = vld [vmem:[%s13922_s7 + $0x1f8] sm:$0xff]  }
 0x3e7   : > { %8479 = vmatpush3.bf16.msra.mxu0 %v9314_v63  ;;  %v9372_v63 = vld [vmem:[%s13924_s9 + $0x10c] ss:$12 sps:$4 sm:$0xff]  }
 0x3e8   : > { %8480 = vmatprep.subr.bf16.mxu0 %v9319_v22  ;;  %8543 = vmatpush3.bf16.msra.mxu1 %v9324_v8  ;;  %v9330_v22 = vld [vmem:[%s13922_s7 + $0x1b8] sm:$0xff]   ;;  %v9331_v8 = vld [vmem:[%s13922_s7 + $0x200] sm:$0xff]  }
 0x3e9   : > { %7506 = vmatmul.mubr.msk.bf16.gmra.mrb[172].mxu0 %vm14730_vm1, %v12773_v53  ;;  %8544 = vmatprep.subr.bf16.mxu1 %v9327_v26  ;;  %v7508_v26 = vpack.c.bf16 %v12807_v44, %v14251_v14  ;;  %v14741_v44 = vld [vmem:[#allocation95_spill] sm:$0xff]  ;;  %vm14759_vm1 = vnez %v14758_v38 }
 0x3ea   : > { %5263 = vmatprep.mubr.bf16.mxu0 %v4428_v56  ;;  %7542 = vmatmul.mubr.msk.bf16.gmra.mrb[220].mxu1 %vm14592_vm2, %v12803_v19  ;;  %v14733_v56 = vld [vmem:[#allocation36_spill] sm:$0xff] }
 0x3eb   : > { %7545 = vmatprep.mubr.msk.bf16.mxu1 %vm14543_vm3, %v14731_v52  ;;  %8481 = vmatpush3.bf16.msra.mxu0 %v9320_v31  ;;  %v7547_v31 = vpack.c.bf16 %v12828_v23, %v14251_v14  ;;  %vm14734_vm5 = vnez %v14733_v56  ;;  %v14748_v56 = vld [vmem:[#allocation66_spill] sm:$0xff]  ;;  %v9390_v38 = vld [vmem:[%s13924_s9 + $0x20] ss:$12 sps:$4 sm:$0xff]  }
 0x3ec   : > { %8482 = vmatprep.subr.bf16.mxu0 %v9325_v35  ;;  %8545 = vmatpush3.bf16.msra.mxu1 %v9328_v36  ;;  %v14735_v35 = vld [vmem:[#allocation48_spill] sm:$0xff]  ;;  %v14736_v36 = vld [vmem:[#allocation43_spill] sm:$0xff] }
 0x3ed   : > { %8546 = vmatprep.subr.bf16.mxu1 %v9329_v33  ;;  %vm14737_vm10 = vnez %v14736_v36  ;;  %v14738_v33 = vld [vmem:[#allocation35_spill] sm:$0xff]  ;;  %v14749_v36 = vld [vmem:[#allocation56_spill] sm:$0xff] }
 0x3ee   : > { %v14739_v52 = vpack.c.bf16 %v12817_v41, %v14738_v33  ;;  %v14747_v41 = vld [vmem:[#allocation40_spill] sm:$0xff]  ;;  %v7637_v33 = vpack.c.bf16 %v14251_v14, %v13008_v3 }
 0x3ef   : > { %8483 = vmatpush3.bf16.msra.mxu0 %v9326_v21  ;;  %v14742_v21 = vld [vmem:[#allocation27_spill] sm:$0xff] }
 0x3f0   : > { %8547 = vmatpush3.bf16.msra.mxu1 %v9330_v22  ;;  %8788 = vmatprep.subr.bf16.mxu0 %v9331_v8  ;;  %v14743_v22 = vld [vmem:[#allocation53_spill] sm:$0xff] }
 0x3f1   : > { %7509 = vmatmul.mubr.msk.bf16.gmra.mrb[176].mxu0 %vm14734_vm5, %v7508_v26  ;;  %6221 = vmatprep.subr.bf16.mxu1 %v9334_v27  ;;  %v14745_v27 = vpack.c.bf16 %v12906_v9, %v12881_v47  ;;  %v14753_v9 = vld [vmem:[#allocation54_spill] sm:$0xff]  ;;  %v14755_v47 = vld [vmem:[#allocation29_spill] sm:$0xff] }
 0x3f2   : > { %5271 = vmatprep.mubr.bf16.mxu0 %v14735_v35  ;;  %7548 = vmatmul.mubr.msk.bf16.gmra.mrb[224].mxu1 %vm14737_vm10, %v7547_v31  ;;  %vm14754_vm0 = vnez %v14753_v9  ;;  %v9381_v31 = vld [vmem:[%s13924_s9 + $0x150] ss:$12 sps:$4 sm:$0xff]   ;;  %v9400_v26 = vld [vmem:[%s13924_s9 + $0x98] ss:$12 sps:$4 sm:$0xff]  }
 0x3f3   : > { %7551 = vmatprep.mubr.msk.bf16.mxu1 %vm14603_vm11, %v14739_v52  ;;  %v14751_v52 = vld [vmem:[#allocation52_spill] sm:$0xff]  ;;  %v14786_v9 = vld [vmem:[#allocation65_spill] sm:$0xff] }
 0x3f4   : > { %vm14752_vm4 = vnez %v14751_v52  ;;  %v14760_v52 = vld [vmem:[#allocation32_spill] sm:$0xff] }
 0x3f9   : > { %7512 = vmatmul.mubr.msk.bf16.gmra.mrb[180].mxu0 %vm14603_vm11, %v14741_v44 }
 0x3fa   : > { %5279 = vmatprep.mubr.bf16.mxu0 %v14742_v21  ;;  %7554 = vmatmul.mubr.msk.bf16.gmra.mrb[228].mxu1 %vm11525_vm12, %v14743_v22 }
 0x3fb   : > { %7557 = vmatprep.mubr.msk.bf16.mxu1 %vm14558_vm6, %v14745_v27  ;;  %v14756_v27 = vld [vmem:[#allocation85_spill] sm:$0xff] }
 0x3fc   : > { %v14757_v39 = vpack.c.bf16 %v14755_v47, %v14756_v27  ;;  %v9337_v47 = vld [vmem:[%s13924_s9 + $0x1c] ss:$12 sps:$4 sm:$0xff]  }
 0x3fd   : > { %v14762_v27 = vld [vmem:[#allocation20_spill] sm:$0xff] }
 0x401   : > { %7515 = vmatmul.mubr.msk.bf16.gmra.mrb[184].mxu0 %vm14558_vm6, %v14747_v41 }
 0x402   : > { %5287 = vmatprep.mubr.bf16.mxu0 %v14748_v56  ;;  %7560 = vmatmul.mubr.msk.bf16.gmra.mrb[232].mxu1 %vm11549_vm14, %v14749_v36  ;;  %v14761_v36 = vpack.c.bf16 %v14760_v52, %v12634_v37  ;;  %v9335_v37 = vld [vmem:[%s13924_s9 + $0x18] ss:$12 sps:$4 sm:$0xff]  }
 0x403   : > { %7563 = vmatprep.mubr.msk.bf16.mxu1 %vm14752_vm4, %v7562_v51  ;;  %v9332_v51 = vld [vmem:[%s13924_s9] ss:$12 sps:$4 sm:$0xff]  }
 0x404   : > { %v14769_v52 = vld [vmem:[#allocation19_spill] sm:$0xff] }
 0x409   : > { %7518 = vmatmul.mubr.msk.bf16.gmra.mrb[188].mxu0 %vm14752_vm4, %v12943_v34 }
 0x40a   : > { %7566 = vmatmul.mubr.msk.bf16.gmra.mrb[236].mxu1 %vm14754_vm0, %v12969_v0  ;;  %7569 = vmatprep.mubr.msk.bf16.mxu0 %vm14759_vm1, %v14757_v39  ;;  %v14763_v39 = vld [vmem:[#allocation25_spill] sm:$0xff] }
 0x40b   : > { %5522 = vmatprep.mubr.bf16.mxu1 %v12657_v45  ;;  %v14764_v0 = vpack.c.bf16 %v14762_v27, %v14763_v39  ;;  %v9345_v45 = vld [vmem:[%s13922_s7 + $0x210] sm:$0xff]   ;;  %v9359_v39 = vld [vmem:[%s13922_s7 + $0x220] sm:$0xff]  }
 0x40c   : > { %v9342_v27 = vld [vmem:[%s13924_s9 + $0x48] ss:$12 sps:$4 sm:$0xff]  }
 0x411   : > { %5426 = vmatmul.mubr.bf16.vlgmr.msra.gmra.mrb[192].mxu0 %v14761_v36 }
 0x412   : > { %7572 = vmatprep.mubr.msk.bf16.mxu0 %vm11098_vm9, %v14764_v0  ;;  %7593 = vmatmul.mubr.msk.bf16.vlgmr.msra.gmra.mrb[240].mxu1 %vm10917_vm13, %v12695_v28  ;;  %v9341_v0 = vld [vmem:[%s13924_s9 + $0x34] ss:$12 sps:$4 sm:$0xff]   ;;  %v9352_v28 = vld [vmem:[%s13922_s7 + $0x218] sm:$0xff]  }
 0x413   : > { %8789 = vmatpush3.bf16.msra.mxu0 %v9331_v8  ;;  %5530 = vmatprep.mubr.bf16.mxu1 %v12714_v15  ;;  %v14765_v15 = vld [vmem:[#allocation11_spill] sm:$0xff]  ;;  %v14766_v8 = vld [vmem:[#allocation13_spill] sm:$0xff] }
 0x414   : > { %6222 = vmatpush1.bf16.msra.mxu1 %v9332_v51  ;;  %8790 = vmatprep.subr.bf16.mxu0 %v9338_v42  ;;  %v14767_v36 = vpack.c.bf16 %v14765_v15, %v14766_v8  ;;  %v9344_v51 = vld [vmem:[%s13924_s9 + $0x4c] ss:$12 sps:$4 sm:$0xff]   ;;  %v14775_v8 = vld [vmem:[#allocation57_spill] sm:$0xff] }
 0x415   : > { %6223 = vmatprep.subr.bf16.mxu1 %v9337_v47  ;;  %v9358_v15 = vld [vmem:[%s13924_s9 + $0xac] ss:$12 sps:$4 sm:$0xff]   ;;  %vm14776_vm13 = vnez %v14775_v8 }
 0x416   : > { %v9406_v8 = vld [vmem:[%s13924_s9 + $0x198] ss:$12 sps:$4 sm:$0xff]  }
 0x417   : > { %8791 = vmatpush3.bf16.msra.mxu0 %v9338_v42  ;;  %v14768_v42 = vld [vmem:[#allocation28_spill] sm:$0xff] }
 0x418   : > { %6224 = vmatpush1.bf16.msra.mxu1 %v9335_v37  ;;  %8792 = vmatprep.subr.bf16.mxu0 %v9345_v45  ;;  %v14770_v47 = vpack.c.bf16 %v14768_v42, %v14769_v52  ;;  %v9348_v37 = vld [vmem:[%s13924_s9 + $0x64] ss:$12 sps:$4 sm:$0xff]   ;;  %v14780_v42 = vpack.c.bf16 %v12897_v12, %v12855_v58  ;;  %v14781_v58 = vpack.c.bf16 %v12775_v49, %v12757_v61  ;;  %v9370_v61 = vld [vmem:[%s13924_s9 + $0x108] ss:$12 sps:$4 sm:$0xff]   ;;  %v9389_v52 = vld [vmem:[%s13924_s9 + $0xe0] ss:$12 sps:$4 sm:$0xff]  }
 0x419   : > { %5434 = vmatmul.mubr.bf16.gmra.mrb[196].mxu0 %v14767_v36  ;;  %6225 = vmatprep.subr.bf16.mxu1 %v9341_v0  ;;  %v9351_v0 = vld [vmem:[%s13924_s9 + $0x7c] ss:$12 sps:$4 sm:$0xff]   ;;  %v9376_v49 = vld [vmem:[%s13924_s9 + $0x124] ss:$12 sps:$4 sm:$0xff]  }
 0x41a   : > { %7575 = vmatprep.mubr.msk.bf16.mxu0 %vm11240_vm8, %v14770_v47  ;;  %7596 = vmatmul.mubr.msk.bf16.gmra.mrb[244].mxu1 %vm10957_vm15, %v12734_v13  ;;  %v9366_v13 = vld [vmem:[%s13922_s7 + $0x228] sm:$0xff]   ;;  %v9367_v12 = vld [vmem:[%s13924_s9 + $0xf0] ss:$12 sps:$4 sm:$0xff]   ;;  %v9391_v47 = vld [vmem:[%s13924_s9 + $0xf8] ss:$12 sps:$4 sm:$0xff]  }
 0x41b   : > { %5538 = vmatprep.mubr.bf16.mxu1 %v12729_v11  ;;  %8793 = vmatpush3.bf16.msra.mxu0 %v9345_v45  ;;  %v14771_v11 = vpack.c.bf16 %v12710_v50, %v12690_v48  ;;  %v4587_v45 = vpack.c.bf16 %v14251_v14, %v12702_v57  ;;  %v9349_v48 = vld [vmem:[%s13924_s9 + $0x78] ss:$12 sps:$4 sm:$0xff]   ;;  %v9373_v50 = vld [vmem:[%s13922_s7 + $0x230] sm:$0xff]   ;;  %v14777_v36 = vld [vmem:[#allocation68_spill] sm:$0xff] }
 0x41c   : > { %6226 = vmatpush1.bf16.msra.mxu1 %v9339_v43  ;;  %8794 = vmatprep.subr.bf16.mxu0 %v9352_v28  ;;  %v14772_v43 = vpack.c.bf16 %v12977_v17, %v12781_v29  ;;  %v9353_v29 = vld [vmem:[%s13924_s9 + $0x90] ss:$12 sps:$4 sm:$0xff]   ;;  %vm14778_vm15 = vnez %v14777_v36  ;;  %v9395_v17 = vld [vmem:[%s13924_s9 + $0x128] ss:$12 sps:$4 sm:$0xff]  }
 0x41d   : > { %6227 = vmatprep.subr.bf16.mxu1 %v9344_v51  ;;  %v9365_v51 = vld [vmem:[%s13924_s9 + $0xdc] ss:$12 sps:$4 sm:$0xff]  }
 0x41e   : > { %v9408_v36 = vld [vmem:[%s13924_s9 + $0x19c] ss:$12 sps:$4 sm:$0xff]  }
 0x41f   : > { %8795 = vmatpush3.bf16.msra.mxu0 %v9352_v28  ;;  %v14773_v28 = vpack.c.bf16 %v12702_v57, %v12685_v40  ;;  %v9356_v40 = vld [vmem:[%s13924_s9 + $0xa8] ss:$12 sps:$4 sm:$0xff]  }
 0x420   : > { %6228 = vmatpush1.bf16.msra.mxu1 %v9342_v27  ;;  %8796 = vmatprep.subr.bf16.mxu0 %v9359_v39  ;;  %v9387_v57 = vld [vmem:[%s13924_s9 + $0xc8] ss:$12 sps:$4 sm:$0xff]   ;;  %v14790_v27 = vld [vmem:[#allocation70_spill] sm:$0xff] }
 0x421   : > { %5442 = vmatmul.mubr.bf16.gmra.mrb[200].mxu0 %v14771_v11  ;;  %6229 = vmatprep.subr.bf16.mxu1 %v9348_v37  ;;  %v14793_v37 = vld [vmem:[#allocation14_spill] sm:$0xff]  ;;  %v14795_v11 = vld [vmem:[#allocation56_spill] sm:$0xff] }
 0x422   : > { %7578 = vmatprep.mubr.msk.bf16.mxu0 %vm14592_vm2, %v14772_v43  ;;  %7599 = vmatmul.mubr.msk.bf16.gmra.mrb[248].mxu1 %vm11119_vm7, %v12773_v53  ;;  %v7601_v53 = vpack.c.bf16 %v14251_v14, %v12742_v46  ;;  %v14774_v46 = vpack.c.bf16 %v12869_v1, %v12828_v23  ;;  %v9362_v23 = vld [vmem:[%s13924_s9 + $0xc4] ss:$12 sps:$4 sm:$0xff]   ;;  %v9360_v1 = vld [vmem:[%s13924_s9 + $0xc0] ss:$12 sps:$4 sm:$0xff]   ;;  %vm14787_vm7 = vnez %v14786_v9  ;;  %v14797_v43 = vld [vmem:[#allocation22_spill] sm:$0xff] }
 0x423   : > { %5546 = vmatprep.mubr.bf16.mxu1 %v4587_v45  ;;  %8797 = vmatpush3.bf16.msra.mxu0 %v9359_v39  ;;  %v9394_v39 = vld [vmem:[%s13924_s9 + $0x50] ss:$12 sps:$4 sm:$0xff]  }
 0x424   : > { %6230 = vmatpush1.bf16.msra.mxu1 %v9346_v54  ;;  %8798 = vmatprep.subr.bf16.mxu0 %v9366_v13  ;;  %v14794_v54 = vld [vmem:[#allocation8_spill] sm:$0xff]  ;;  %v14796_v45 = vld [vmem:[#allocation49_spill] sm:$0xff] }
 0x425   : > { %6231 = vmatprep.subr.bf16.mxu1 %v9351_v0  ;;  %v9398_v0 = vld [vmem:[%s13924_s9 + $0x80] ss:$12 sps:$4 sm:$0xff]  }
 0x427   : > { %8799 = vmatpush3.bf16.msra.mxu0 %v9366_v13  ;;  %v9396_v13 = vld [vmem:[%s13924_s9 + $0x68] ss:$12 sps:$4 sm:$0xff]  }
 0x428   : > { %6232 = vmatpush1.bf16.msra.mxu1 %v9349_v48  ;;  %8800 = vmatprep.subr.bf16.mxu0 %v9373_v50  ;;  %v9399_v48 = vld [vmem:[%s13924_s9 + $0x158] ss:$12 sps:$4 sm:$0xff]  }
 0x429   : > { %5450 = vmatmul.mubr.bf16.gmra.mrb[204].mxu0 %v14773_v28  ;;  %6233 = vmatprep.subr.bf16.mxu1 %v9355_v16  ;;  %v9401_v16 = vld [vmem:[%s13924_s9 + $0x170] ss:$12 sps:$4 sm:$0xff]  }
 0x42a   : > { %7581 = vmatprep.mubr.msk.bf16.mxu0 %vm14776_vm13, %v14774_v46  ;;  %7602 = vmatmul.mubr.msk.bf16.gmra.mrb[252].mxu1 %vm14778_vm15, %v7601_v53  ;;  %v14799_v53 = vld [vmem:[#allocation75_spill] sm:$0xff]  ;;  %v14802_v28 = vld [vmem:[#allocation17_spill] sm:$0xff] }
 0x42b   : > { %5554 = vmatprep.mubr.bf16.mxu1 %v14735_v35  ;;  %8801 = vmatpush3.bf16.msra.mxu0 %v9373_v50  ;;  %v14779_v35 = vpack.c.bf16 %v12789_v6, %v12766_v60  ;;  %v9363_v60 = vld [vmem:[%s13924_s9 + $0xd8] ss:$12 sps:$4 sm:$0xff]   ;;  %v9369_v6 = vld [vmem:[%s13924_s9 + $0xf4] ss:$12 sps:$4 sm:$0xff]  }
 0x42c   : > { %6234 = vmatpush1.bf16.msra.mxu1 %v9353_v29  ;;  %8802 = vmatprep.subr.bf16.mxu0 %v9380_v20  ;;  %v14798_v50 = vld [vmem:[#allocation10_spill] sm:$0xff]  ;;  %v14804_v46 = vld [vmem:[#allocation23_spill] sm:$0xff] }
 0x42d   : > { %6235 = vmatprep.subr.bf16.mxu1 %v9358_v15  ;;  %v9402_v29 = vld [vmem:[%s13924_s9 + $0xb0] ss:$12 sps:$4 sm:$0xff]  }
 0x42e   : > { %v14803_v15 = vld [vmem:[#allocation41_spill] sm:$0xff] }
 0x42f   : > { %8803 = vmatpush3.bf16.msra.mxu0 %v9380_v20  ;;  %v14801_v20 = vld [vmem:[#allocation30_spill] sm:$0xff] }
 0x430   : > { %6236 = vmatpush1.bf16.msra.mxu1 %v9356_v40  ;;  %8612 = vmatprep.subr.bf16.mxu0 %v9387_v57  ;;  %v14805_v40 = vld [vmem:[#allocation51_spill] sm:$0xff]  ;;  %v14806_v57 = vld [vmem:[#allocation21_spill] sm:$0xff] }
 0x431   : > { %5458 = vmatmul.mubr.bf16.gmra.mrb[208].mxu0 %v14779_v35  ;;  %6237 = vmatprep.subr.bf16.mxu1 %v9362_v23  ;;  %v9409_v23 = vld [vmem:[%s13924_s9 + $0x1b0] ss:$12 sps:$4 sm:$0xff]   ;;  %v14807_v35 = vld [vmem:[#allocation63_spill] sm:$0xff] }
 0x432   : > { %7584 = vmatprep.mubr.msk.bf16.mxu0 %vm11525_vm12, %v14780_v42  ;;  %7605 = vmatmul.mubr.msk.bf16.gmra.mrb[0].mxu1 %vm14543_vm3, %v14741_v44  ;;  %v14782_v44 = vpack.c.bf16 %v12955_v2, %v12910_v4  ;;  %v9374_v4 = vld [vmem:[%s13924_s9 + $0x120] ss:$12 sps:$4 sm:$0xff]   ;;  %v14783_v2 = vpack.c.bf16 %v12859_v7, %v12840_v59  ;;  %v9377_v59 = vld [vmem:[%s13924_s9 + $0x138] ss:$12 sps:$4 sm:$0xff]   ;;  %v9412_v42 = vld [vmem:[%s13924_s9 + $0x1c8] ss:$12 sps:$4 sm:$0xff]  }
 0x433   : > { %5562 = vmatprep.mubr.bf16.mxu1 %v14742_v21  ;;  %v9379_v21 = vld [vmem:[%s13924_s9 + $0x13c] ss:$12 sps:$4 sm:$0xff]   ;;  %v9383_v7 = vld [vmem:[%s13924_s9 + $0x154] ss:$12 sps:$4 sm:$0xff]  }
 0x434   : > { %6238 = vmatpush1.bf16.msra.mxu1 %v9360_v1  ;;  %v9411_v1 = vld [vmem:[%s13924_s9 + $0x1b4] ss:$12 sps:$4 sm:$0xff]  }
 0x435   : > { %6239 = vmatprep.subr.bf16.mxu1 %v9365_v51  ;;  %v14808_v51 = vld [vmem:[#allocation81_spill] sm:$0xff] }
 0x438   : > { %6240 = vmatpush1.bf16.msra.mxu1 %v9363_v60  ;;  %v9414_v60 = vld [vmem:[%s13924_s9 + $0x1cc] ss:$12 sps:$4 sm:$0xff]  }
 0x439   : > { %5466 = vmatmul.mubr.bf16.gmra.mrb[212].mxu0 %v14781_v58  ;;  %6241 = vmatprep.subr.bf16.mxu1 %v9369_v6  ;;  %v14809_v6 = vld [vmem:[#allocation76_spill] sm:$0xff] }
 0x43a   : > { %7587 = vmatprep.mubr.msk.bf16.mxu0 %vm11549_vm14, %v14782_v44  ;;  %7608 = vmatmul.mubr.msk.bf16.gmra.mrb[4].mxu1 %vm14603_vm11, %v14747_v41  ;;  %v14784_v41 = vpack.c.bf16 %v13008_v3, %v12951_v18  ;;  %v7613_v18 = vpack.c.bf16 %v14251_v14, %v12926_v62  ;;  %v14788_v62 = vld [vmem:[#allocation16_spill] sm:$0xff]  ;;  %v9405_v3 = vld [vmem:[%s13924_s9 + $0x184] ss:$12 sps:$4 sm:$0xff]  }
 0x43b   : > { %5570 = vmatprep.mubr.bf16.mxu1 %v14748_v56  ;;  %v9386_v56 = vld [vmem:[%s13924_s9 + $0x16c] ss:$12 sps:$4 sm:$0xff]   ;;  %v9418_v44 = vld [vmem:[%s13924_s9 + $0x188] ss:$12 sps:$4 sm:$0xff]  }
 0x43c   : > { %6242 = vmatpush1.bf16.msra.mxu1 %v9367_v12  ;;  %v9403_v14 = vld [vmem:[%s13924_s9 + $0x180] ss:$12 sps:$4 sm:$0xff]   ;;  %v14810_v12 = vmov 0  }
 0x43d   : > { %6243 = vmatprep.subr.bf16.mxu1 %v9372_v63  ;;  %v9415_v58 = vld [vmem:[%s13924_s9 + $0x1e0] ss:$12 sps:$4 sm:$0xff]   ;;  %v9417_v63 = vld [vmem:[%s13924_s9 + $0x1e4] ss:$12 sps:$4 sm:$0xff]  }
 0x440   : > { %6244 = vmatpush1.bf16.msra.mxu1 %v9370_v61  ;;  %v9419_v61 = vld [vmem:[%s13924_s9 + $0x1a0] ss:$12 sps:$4 sm:$0xff]  }
 0x441   : > { %5474 = vmatmul.mubr.bf16.gmra.mrb[216].mxu0 %v14783_v2  ;;  %6245 = vmatprep.subr.bf16.mxu1 %v9376_v49  ;;  %v9420_v49 = vld [vmem:[%s13924_s9 + $0x1f8] ss:$12 sps:$4 sm:$0xff]  }
 0x442   : > { %7590 = vmatprep.mubr.msk.bf16.mxu0 %vm14754_vm0, %v14784_v41  ;;  %7611 = vmatmul.mubr.msk.bf16.gmra.mrb[8].mxu1 %vm14558_vm6, %v12943_v34  ;;  %v14785_v34 = vpack.c.bf16 %v12851_v5, %v12835_v30  ;;  %v9384_v30 = vld [vmem:[%s13924_s9 + $0x168] ss:$12 sps:$4 sm:$0xff]   ;;  %v9423_v2 = vld [vmem:[%s13924_s9 + $0x1b8] ss:$12 sps:$4 sm:$0xff]  }
 0x443   : > { %5578 = vmatprep.mubr.bf16.mxu1 %v4591_v24  ;;  %v9388_v5 = vld [vmem:[%s13924_s9 + $0x8] ss:$12 sps:$4 sm:$0xff]   ;;  %v9424_v24 = vld [vmem:[%s13924_s9 + $0x1d0] ss:$12 sps:$4 sm:$0xff]  }
 0x444   : > { %6246 = vmatpush1.bf16.msra.mxu1 %v9374_v4  ;;  %v9422_v4 = vld [vmem:[%s13924_s9 + $0x1fc] ss:$12 sps:$4 sm:$0xff]   ;;  %v9427_v41 = vld [vmem:[%s13924_s9 + $0x214] ss:$12 sps:$4 sm:$0xff]  }
 0x445   : > { %6247 = vmatprep.subr.bf16.mxu1 %v9379_v21  ;;  %v9425_v21 = vld [vmem:[%s13924_s9 + $0x210] ss:$12 sps:$4 sm:$0xff]  }
 0x448   : > { %6248 = vmatpush1.bf16.msra.mxu1 %v9377_v59  ;;  %v9428_v59 = vld [vmem:[%s13924_s9 + $0x1e8] ss:$12 sps:$4 sm:$0xff]  }
 0x449   : > { %5482 = vmatmul.mubr.bf16.gmra.mrb[220].mxu0 %v14785_v34  ;;  %6249 = vmatprep.subr.bf16.mxu1 %v9383_v7  ;;  %v9429_v7 = vld [vmem:[%s13924_s9 + $0x200] ss:$12 sps:$4 sm:$0xff]  }
 0x44a   : > { %7614 = vmatmul.mubr.msk.bf16.gmra.mrb[12].mxu1 %vm14787_vm7, %v7613_v18  ;;  %8804 = vmatprep.mubr.msk.bf16.mxu0 %vm14759_vm1, %v12706_v10  ;;  %v14789_v10 = vld [vmem:[#allocation9_spill] sm:$0xff] }
 0x44b   : > { %6253 = vmatprep.mubr.bf16.mxu1 %v14788_v62 }
 0x44c   : > { %6250 = vmatpush1.bf16.msra.mxu1 %v9381_v31  ;;  %v13550_v31 = vld [vmem:[%s13923_s8] ss:$0 sm:$0xff] }
 0x44d   : > { %6251 = vmatprep.subr.bf16.mxu1 %v9386_v56 }
 0x450   : > { %6252 = vmatpush1.bf16.msra.mxu1 %v9384_v30 }
 0x451   : > { %8805 = vmatmul.mubr.msk.bf16.vlgmr.msra.gmra.mrb[224].mxu0 %vm11098_vm9, %v12764_v55  ;;  %v9393_v55 = vld [vmem:[%s13924_s9 + $0x110] ss:$12 sps:$4 sm:$0xff]   ;;  %6334 = vmatprep.subr.bf16.mxu1 %v9405_v3 }
 0x452   : > { %8808 = vmatprep.mubr.msk.bf16.mxu0 %vm11240_vm8, %v12803_v19  ;;  %8613 = vmatpush3.bf16.msra.mxu0 %v9388_v5  ;;  %v14791_v19 = vld [vmem:[#allocation67_spill] sm:$0xff] }
 0x453   : > { %6254 = vmatmul.mubr.bf16.vlgmr.msra.gmra.mrb[16].mxu1 %v14789_v10  ;;  %8614 = vmatprep.subr.bf16.mxu0 %v9389_v52  ;;  %vm14792_vm9 = vnez %v14791_v19  ;;  %v9430_v19 = vld [vmem:[%s13924_s9 + $0x228] ss:$12 sps:$4 sm:$0xff]  }
 0x454   : > { %6263 = vmatprep.mubr.bf16.mxu1 %v14790_v27  ;;  %6335 = vmatpush1.bf16.msra.mxu1 %v9403_v14 }
 0x455   : > { %6336 = vmatprep.subr.bf16.mxu1 %v9408_v36 }
 0x456   : > { %8615 = vmatpush3.bf16.msra.mxu0 %v9390_v38 }
 0x457   : > { %8616 = vmatprep.subr.bf16.mxu0 %v9391_v47 }
 0x458   : > { %6337 = vmatpush1.bf16.msra.mxu1 %v9406_v8 }
 0x459   : > { %8809 = vmatmul.mubr.msk.bf16.gmra.mrb[228].mxu0 %vm14792_vm9, %v7625_v25  ;;  %6338 = vmatprep.subr.bf16.mxu1 %v9411_v1 }
 0x45a   : > { %8812 = vmatprep.mubr.msk.bf16.mxu0 %vm14776_vm13, %v14743_v22  ;;  %8617 = vmatpush3.bf16.msra.mxu0 %v9392_v32  ;;  %v9397_v22 = vld [vmem:[%s13924_s9 + $0x140] ss:$12 sps:$4 sm:$0xff]  }
 0x45b   : > { %6264 = vmatmul.mubr.bf16.gmra.mrb[20].mxu1 %v14793_v37  ;;  %8618 = vmatprep.subr.bf16.mxu0 %v9393_v55 }
 0x45c   : > { %6273 = vmatprep.mubr.bf16.mxu1 %v14794_v54  ;;  %6339 = vmatpush1.bf16.msra.mxu1 %v9409_v23 }
 0x45d   : > { %6340 = vmatprep.subr.bf16.mxu1 %v9414_v60 }
 0x45e   : > { %8619 = vmatpush3.bf16.msra.mxu0 %v9394_v39  ;;  %v9432_v39 = vld [vmem:[%s13924_s9 + $0x22c] ss:$12 sps:$4 sm:$0xff]  }
 0x45f   : > { %8620 = vmatprep.subr.bf16.mxu0 %v9395_v17 }
 0x460   : > { %6341 = vmatpush1.bf16.msra.mxu1 %v9412_v42 }
 0x461   : > { %8813 = vmatmul.mubr.msk.bf16.gmra.mrb[232].mxu0 %vm11525_vm12, %v14795_v11  ;;  %6342 = vmatprep.subr.bf16.mxu1 %v9417_v63 }
 0x462   : > { %8816 = vmatprep.mubr.msk.bf16.mxu0 %vm11549_vm14, %v14796_v45  ;;  %8621 = vmatpush3.bf16.msra.mxu0 %v9396_v13  ;;  %vm14800_vm14 = vnez %v14799_v53  ;;  %v9434_v13 = vld [vmem:[%s13924_s9 + $0x230] ss:$12 sps:$4 sm:$0xff]  }
 0x463   : > { %6274 = vmatmul.mubr.bf16.gmra.mrb[24].mxu1 %v14797_v43  ;;  %8622 = vmatprep.subr.bf16.mxu0 %v9397_v22 }
 0x464   : > { %6283 = vmatprep.mubr.bf16.mxu1 %v14798_v50  ;;  %6343 = vmatpush1.bf16.msra.mxu1 %v9415_v58 }
 0x465   : > { %6344 = vmatprep.subr.bf16.mxu1 %v9422_v4 }
 0x466   : > { %8623 = vmatpush3.bf16.msra.mxu0 %v9398_v0 }
 0x467   : > { %8624 = vmatprep.subr.bf16.mxu0 %v9399_v48 }
 0x468   : > { %6345 = vmatpush1.bf16.msra.mxu1 %v9420_v49 }
 0x469   : > { %8817 = vmatmul.mubr.msk.bf16.gmra.mrb[236].mxu0 %vm14800_vm14, %v7637_v33  ;;  %6346 = vmatprep.subr.bf16.mxu1 %v9427_v41 }
 0x46a   : > { %8625 = vmatpush3.bf16.msra.mxu0 %v9400_v26  ;;  %6479 = vmatprep.mubr.bf16.mxu0 %v14788_v62 }
 0x46b   : > { %6284 = vmatmul.mubr.bf16.gmra.mrb[28].mxu1 %v14801_v20  ;;  %8626 = vmatprep.subr.bf16.mxu0 %v9401_v16 }
 0x46c   : > { %6293 = vmatprep.mubr.bf16.mxu1 %v14802_v28  ;;  %6347 = vmatpush1.bf16.msra.mxu1 %v9425_v21 }
 0x46d   : > { %6348 = vmatprep.subr.bf16.mxu1 %v9432_v39 }
 0x46e   : > { %8627 = vmatpush3.bf16.msra.mxu0 %v9402_v29 }
 0x46f   : > { %8820 = vmatprep.subr.bf16.mxu0 %v9418_v44 }
 0x470   : > { %6349 = vmatpush1.bf16.msra.mxu1 %v9430_v19 }
 0x471   : > { %6480 = vmatmul.mubr.bf16.vlgmr.msra.gmra.mrb[240].mxu0 %v14789_v10 }
 0x472   : > { %6487 = vmatprep.mubr.bf16.mxu0 %v14790_v27  ;;  %8821 = vmatpush3.bf16.msra.mxu0 %v9418_v44 }
 0x473   : > { %6294 = vmatmul.mubr.bf16.gmra.mrb[32].mxu1 %v14803_v15  ;;  %8822 = vmatprep.subr.bf16.mxu0 %v9419_v61 }
 0x474   : > { %6303 = vmatprep.mubr.bf16.mxu1 %v14804_v46 }
 0x476   : > { %8823 = vmatpush3.bf16.msra.mxu0 %v9419_v61 }
 0x477   : > { %8824 = vmatprep.subr.bf16.mxu0 %v9423_v2 }
 0x479   : > { %6488 = vmatmul.mubr.bf16.gmra.mrb[244].mxu0 %v14793_v37 }
 0x47a   : > { %6495 = vmatprep.mubr.bf16.mxu0 %v14794_v54  ;;  %8825 = vmatpush3.bf16.msra.mxu0 %v9423_v2  ;;  %v9433_v54 = vld [vmem:[%s13924_s9 + $0x218] ss:$12 sps:$4 sm:$0xff]  }
 0x47b   : > { %6304 = vmatmul.mubr.bf16.gmra.mrb[36].mxu1 %v14805_v40  ;;  %8826 = vmatprep.subr.bf16.mxu0 %v9424_v24 }
 0x47c   : > { %6313 = vmatprep.mubr.bf16.mxu1 %v14806_v57 }
 0x47e   : > { %8827 = vmatpush3.bf16.msra.mxu0 %v9424_v24 }
 0x47f   : > { %8828 = vmatprep.subr.bf16.mxu0 %v9428_v59 }
 0x481   : > { %6496 = vmatmul.mubr.bf16.gmra.mrb[248].mxu0 %v14797_v43 }
 0x482   : > { %6503 = vmatprep.mubr.bf16.mxu0 %v14798_v50  ;;  %8829 = vmatpush3.bf16.msra.mxu0 %v9428_v59 }
 0x483   : > { %6314 = vmatmul.mubr.bf16.gmra.mrb[40].mxu1 %v14807_v35  ;;  %8830 = vmatprep.subr.bf16.mxu0 %v9429_v7 }
 0x484   : > { %6323 = vmatprep.mubr.bf16.mxu1 %v14808_v51 }
 0x486   : > { %8831 = vmatpush3.bf16.msra.mxu0 %v9429_v7 }
 0x487   : > { %8832 = vmatprep.subr.bf16.mxu0 %v9433_v54 }
 0x489   : > { %6504 = vmatmul.mubr.bf16.gmra.mrb[252].mxu0 %v14801_v20 }
 0x48a   : > { %6511 = vmatprep.mubr.bf16.mxu0 %v14802_v28  ;;  %8833 = vmatpush3.bf16.msra.mxu0 %v9433_v54 }
 0x48b   : > { %6324 = vmatmul.mubr.bf16.gmra.mrb[44].mxu1 %v14809_v6  ;;  %8834 = vmatprep.subr.bf16.mxu0 %v9434_v13 }
 0x48c   : > { %6366 = vmatprep.mubr.bf16.mxu1 %v14810_v12 }
 0x48e   : > { %8835 = vmatpush3.bf16.msra.mxu0 %v9434_v13 }
 0x491   : > { %6512 = vmatmul.mubr.bf16.gmra.mrb[0].mxu0 %v14803_v15 }
 0x492   : > { %6519 = vmatprep.mubr.bf16.mxu0 %v14804_v46 }
 0x499   : > { %6520 = vmatmul.mubr.bf16.gmra.mrb[4].mxu0 %v14805_v40 }
 0x49a   : > { %6527 = vmatprep.mubr.bf16.mxu0 %v14806_v57 }
 0x4a1   : > { %6528 = vmatmul.mubr.bf16.gmra.mrb[8].mxu0 %v14807_v35 }
 0x4a2   : > { %6535 = vmatprep.mubr.bf16.mxu0 %v14808_v51 }
 0x4a4   : > { %v8356_v18 = vpop.f32.mrb[160].mxu0 }
 0x4a5   : > { %v8357_v34 = vpop.f32.mrb[161].mxu0  ;;  %v8420_v56 = vpop.f32.mrb[208].mxu1 }
 0x4a6   : > { %v8358_v9 = vadd.f32 %v8357_v34, %v8356_v18  ;;  %v8359_v62 = vpop.f32.mrb[162].mxu0  ;;  %v8421_v30 = vpop.f32.mrb[209].mxu1 }
 0x4a7   : > { %v8422_v5 = vadd.f32 %v8421_v30, %v8420_v56  ;;  %v8360_v52 = vpop.f32.mrb[163].mxu0  ;;  %v8423_v38 = vpop.f32.mrb[210].mxu1 }
 0x4a8   : > { %v5234_v10 = vadd.f32 %v8358_v9, %v13550_v31  ;;  %v8361_v47 = vadd.f32 %v8360_v52, %v8359_v62  ;;  %v8424_v27 = vpop.f32.mrb[211].mxu1 }
 0x4a9   : > { %v8425_v32 = vadd.f32 %v8424_v27, %v8423_v38  ;;  %6536 = vmatmul.mubr.bf16.gmra.mrb[12].mxu0 %v14809_v6 }
 0x4aa   : > { %v13554_v25 = vadd.f32 %v8422_v5, %v5234_v10  ;;  %v5237_v55 = vadd.f32 %v8361_v47, %v13550_v31 }
 0x4ac   : > { %v13563_v37 = vadd.f32 %v8425_v32, %v5237_v55  ;;  %v8362_v17 = vpop.f32.mrb[164].mxu0 }
 0x4ad   : > { %v8363_v22 = vpop.f32.mrb[165].mxu0  ;;  %v8426_v11 = vpop.f32.mrb[212].mxu1 }
 0x4ae   : > { %v8364_v45 = vadd.f32 %v8363_v22, %v8362_v17  ;;  %v8365_v0 = vpop.f32.mrb[166].mxu0  ;;  %v8427_v43 = vpop.f32.mrb[213].mxu1 }
 0x4af   : > { %v8428_v48 = vadd.f32 %v8427_v43, %v8426_v11  ;;  %v8366_v50 = vpop.f32.mrb[167].mxu0  ;;  %v8429_v26 = vpop.f32.mrb[214].mxu1 }
 0x4b0   : > { %v5242_v33 = vadd.f32 %v8364_v45, %v13550_v31  ;;  %v8367_v16 = vadd.f32 %v8366_v50, %v8365_v0  ;;  %v8430_v53 = vpop.f32.mrb[215].mxu1 }
 0x4b1   : > { %v8431_v29 = vadd.f32 %v8430_v53, %v8429_v26 }
 0x4b2   : > { %v13572_v20 = vadd.f32 %v8428_v48, %v5242_v33  ;;  %v5245_v28 = vadd.f32 %v8367_v16, %v13550_v31 }
 0x4b4   : > { %v13575_v14 = vadd.f32 %v8431_v29, %v5245_v28  ;;  %v8368_v3 = vpop.f32.mrb[168].mxu0 }
 0x4b5   : > { %v8369_v15 = vpop.f32.mrb[169].mxu0  ;;  %v8432_v46 = vpop.f32.mrb[216].mxu1 }
 0x4b6   : > { %v8370_v8 = vadd.f32 %v8369_v15, %v8368_v3  ;;  %v8371_v36 = vpop.f32.mrb[170].mxu0  ;;  %v8433_v40 = vpop.f32.mrb[217].mxu1 }
 0x4b7   : > { %v8434_v57 = vadd.f32 %v8433_v40, %v8432_v46  ;;  %v8372_v23 = vpop.f32.mrb[171].mxu0  ;;  %v8435_v1 = vpop.f32.mrb[218].mxu1 }
 0x4b8   : > { %v5250_v35 = vadd.f32 %v8370_v8, %v13550_v31  ;;  %v8373_v51 = vadd.f32 %v8372_v23, %v8371_v36  ;;  %v8436_v42 = vpop.f32.mrb[219].mxu1 }
 0x4b9   : > { %v8437_v60 = vadd.f32 %v8436_v42, %v8435_v1 }
 0x4ba   : > { %v13578_v6 = vadd.f32 %v8434_v57, %v5250_v35  ;;  %v5253_v58 = vadd.f32 %v8373_v51, %v13550_v31 }
 0x4bc   : > { %v13581_v63 = vadd.f32 %v8437_v60, %v5253_v58  ;;  %v8374_v44 = vpop.f32.mrb[172].mxu0 }
 0x4bd   : > { %v8375_v61 = vpop.f32.mrb[173].mxu0  ;;  %v8438_v49 = vpop.f32.mrb[220].mxu1 }
 0x4be   : > { %v8376_v4 = vadd.f32 %v8375_v61, %v8374_v44  ;;  %v8377_v2 = vpop.f32.mrb[174].mxu0  ;;  %v8439_v24 = vpop.f32.mrb[221].mxu1 }
 0x4bf   : > { %v8440_v21 = vadd.f32 %v8439_v24, %v8438_v49  ;;  %v8378_v41 = vpop.f32.mrb[175].mxu0  ;;  %v8441_v59 = vpop.f32.mrb[222].mxu1 }
 0x4c0   : > { %v5258_v7 = vadd.f32 %v8376_v4, %v13550_v31  ;;  %v8379_v18 = vadd.f32 %v8378_v41, %v8377_v2  ;;  %v8442_v34 = vpop.f32.mrb[223].mxu1 }
 0x4c1   : > { %v8443_v56 = vadd.f32 %v8442_v34, %v8441_v59 }
 0x4c2   : > { %v13584_v9 = vadd.f32 %v8440_v21, %v5258_v7  ;;  %v5261_v62 = vadd.f32 %v8379_v18, %v13550_v31 }
 0x4c4   : > { %v13587_v30 = vadd.f32 %v8443_v56, %v5261_v62  ;;  %v8380_v5 = vpop.f32.mrb[176].mxu0 }
 0x4c5   : > { %v8381_v52 = vpop.f32.mrb[177].mxu0  ;;  %v8444_v38 = vpop.f32.mrb[224].mxu1 }
 0x4c6   : > { %v8382_v10 = vadd.f32 %v8381_v52, %v8380_v5  ;;  %v8383_v47 = vpop.f32.mrb[178].mxu0  ;;  %v8445_v27 = vpop.f32.mrb[225].mxu1 }
 0x4c7   : > { %v8446_v32 = vadd.f32 %v8445_v27, %v8444_v38  ;;  %v8384_v55 = vpop.f32.mrb[179].mxu0  ;;  %v8447_v19 = vpop.f32.mrb[226].mxu1 }
 0x4c8   : > { %v5266_v39 = vadd.f32 %v8382_v10, %v13550_v31  ;;  %v8385_v17 = vadd.f32 %v8384_v55, %v8383_v47  ;;  %v8448_v54 = vpop.f32.mrb[227].mxu1 }
 0x4c9   : > { %v8449_v13 = vadd.f32 %v8448_v54, %v8447_v19 }
 0x4ca   : > { %v13590_v22 = vadd.f32 %v8446_v32, %v5266_v39  ;;  %v5269_v11 = vadd.f32 %v8385_v17, %v13550_v31 }
 0x4cc   : > { %v13593_v45 = vadd.f32 %v8449_v13, %v5269_v11  ;;  %v8386_v0 = vpop.f32.mrb[180].mxu0 }
 0x4cd   : > { %v8387_v43 = vpop.f32.mrb[181].mxu0  ;;  %v8450_v48 = vpop.f32.mrb[228].mxu1 }
 0x4ce   : > { %v8388_v50 = vadd.f32 %v8387_v43, %v8386_v0  ;;  %v8389_v26 = vpop.f32.mrb[182].mxu0  ;;  %v8451_v33 = vpop.f32.mrb[229].mxu1 }
 0x4cf   : > { %v8452_v16 = vadd.f32 %v8451_v33, %v8450_v48  ;;  %v8390_v53 = vpop.f32.mrb[183].mxu0  ;;  %v8453_v29 = vpop.f32.mrb[230].mxu1 }
 0x4d0   : > { %v5274_v28 = vadd.f32 %v8388_v50, %v13550_v31  ;;  %v8391_v3 = vadd.f32 %v8390_v53, %v8389_v26  ;;  %v8454_v15 = vpop.f32.mrb[231].mxu1 }
 0x4d1   : > { %v8455_v46 = vadd.f32 %v8454_v15, %v8453_v29 }
 0x4d2   : > { %v13596_v8 = vadd.f32 %v8452_v16, %v5274_v28  ;;  %v5277_v36 = vadd.f32 %v8391_v3, %v13550_v31 }
 0x4d4   : > { %v13599_v40 = vadd.f32 %v8455_v46, %v5277_v36  ;;  %v8392_v57 = vpop.f32.mrb[184].mxu0 }
 0x4d5   : > { %v8393_v23 = vpop.f32.mrb[185].mxu0  ;;  %v8456_v1 = vpop.f32.mrb[232].mxu1 }
 0x4d6   : > { %v8394_v35 = vadd.f32 %v8393_v23, %v8392_v57  ;;  %v8395_v51 = vpop.f32.mrb[186].mxu0  ;;  %v8457_v42 = vpop.f32.mrb[233].mxu1 }
 0x4d7   : > { %v8458_v60 = vadd.f32 %v8457_v42, %v8456_v1  ;;  %v8396_v58 = vpop.f32.mrb[187].mxu0  ;;  %v8459_v44 = vpop.f32.mrb[234].mxu1 }
 0x4d8   : > { %v5282_v61 = vadd.f32 %v8394_v35, %v13550_v31  ;;  %v8397_v49 = vadd.f32 %v8396_v58, %v8395_v51  ;;  %v8460_v4 = vpop.f32.mrb[235].mxu1 }
 0x4d9   : > { %v8461_v2 = vadd.f32 %v8460_v4, %v8459_v44 }
 0x4da   : > { %v13602_v24 = vadd.f32 %v8458_v60, %v5282_v61  ;;  %v5285_v21 = vadd.f32 %v8397_v49, %v13550_v31 }
 0x4dc   : > { %v13605_v41 = vadd.f32 %v8461_v2, %v5285_v21  ;;  %v8398_v59 = vpop.f32.mrb[188].mxu0 }
 0x4dd   : > { %v8399_v7 = vpop.f32.mrb[189].mxu0  ;;  %v8462_v18 = vpop.f32.mrb[236].mxu1 }
 0x4de   : > { %v8400_v34 = vadd.f32 %v8399_v7, %v8398_v59  ;;  %v8401_v56 = vpop.f32.mrb[190].mxu0  ;;  %v8463_v62 = vpop.f32.mrb[237].mxu1 }
 0x4df   : > { %v8464_v5 = vadd.f32 %v8463_v62, %v8462_v18  ;;  %v8402_v52 = vpop.f32.mrb[191].mxu0  ;;  %v8465_v38 = vpop.f32.mrb[238].mxu1 }
 0x4e0   : > { %v5290_v10 = vadd.f32 %v8400_v34, %v13550_v31  ;;  %v8403_v47 = vadd.f32 %v8402_v52, %v8401_v56  ;;  %v8466_v27 = vpop.f32.mrb[239].mxu1 }
 0x4e1   : > { %v8467_v32 = vadd.f32 %v8466_v27, %v8465_v38 }
 0x4e2   : > { %v13608_v55 = vadd.f32 %v8464_v5, %v5290_v10  ;;  %v5293_v19 = vadd.f32 %v8403_v47, %v13550_v31 }
 0x4e4   : > { %v13611_v39 = vadd.f32 %v8467_v32, %v5293_v19  ;;  %v8484_v17 = vpop.f32.mrb[192].mxu0 }
 0x4e5   : > { %v8485_v54 = vpop.f32.mrb[193].mxu0  ;;  %v8548_v13 = vpop.f32.mrb[240].mxu1 }
 0x4e6   : > { %v8486_v11 = vadd.f32 %v8485_v54, %v8484_v17  ;;  %v8487_v0 = vpop.f32.mrb[194].mxu0  ;;  %v8549_v43 = vpop.f32.mrb[241].mxu1 }
 0x4e7   : > { %v8550_v48 = vadd.f32 %v8549_v43, %v8548_v13  ;;  %v8488_v50 = vpop.f32.mrb[195].mxu0  ;;  %v8551_v26 = vpop.f32.mrb[242].mxu1 }
 0x4e8   : > { %v5428_v33 = vadd.f32 %v8486_v11, %v13554_v25  ;;  %v8489_v16 = vadd.f32 %v8488_v50, %v8487_v0  ;;  %v8552_v53 = vpop.f32.mrb[243].mxu1 }
 0x4e9   : > { %v8553_v29 = vadd.f32 %v8552_v53, %v8551_v26 }
 0x4ea   : > { %v5431_v28 = vadd.f32 %v8489_v16, %v13563_v37  ;;  %v13615_v3 = vadd.f32 %v8550_v48, %v5428_v33 }
 0x4ec   : > { %v8490_v31 = vpop.f32.mrb[196].mxu0  ;;  %v13617_v15 = vadd.f32 %v8553_v29, %v5431_v28 }
 0x4ed   : > { %v8491_v46 = vpop.f32.mrb[197].mxu0  ;;  %v8554_v36 = vpop.f32.mrb[244].mxu1 }
 0x4ee   : > { %v8492_v57 = vadd.f32 %v8491_v46, %v8490_v31  ;;  %v8493_v23 = vpop.f32.mrb[198].mxu0  ;;  %v8555_v1 = vpop.f32.mrb[245].mxu1 }
 0x4ef   : > { %v8556_v35 = vadd.f32 %v8555_v1, %v8554_v36  ;;  %v8494_v51 = vpop.f32.mrb[199].mxu0  ;;  %v8557_v42 = vpop.f32.mrb[246].mxu1 }
 0x4f0   : > { %v5436_v25 = vadd.f32 %v8492_v57, %v13572_v20  ;;  %v8495_v60 = vadd.f32 %v8494_v51, %v8493_v23  ;;  %v8558_v58 = vpop.f32.mrb[247].mxu1 }
 0x4f1   : > { %v8559_v44 = vadd.f32 %v8558_v58, %v8557_v42 }
 0x4f2   : > { %v5439_v37 = vadd.f32 %v8495_v60, %v13575_v14  ;;  %v13621_v61 = vadd.f32 %v8556_v35, %v5436_v25 }
 0x4f4   : > { %v8496_v49 = vpop.f32.mrb[200].mxu0  ;;  %v13623_v4 = vadd.f32 %v8559_v44, %v5439_v37 }
 0x4f5   : > { %v8497_v2 = vpop.f32.mrb[201].mxu0  ;;  %v8560_v21 = vpop.f32.mrb[248].mxu1 }
 0x4f6   : > { %v8498_v59 = vadd.f32 %v8497_v2, %v8496_v49  ;;  %v8499_v7 = vpop.f32.mrb[202].mxu0  ;;  %v8561_v18 = vpop.f32.mrb[249].mxu1 }
 0x4f7   : > { %v8562_v34 = vadd.f32 %v8561_v18, %v8560_v21  ;;  %v8500_v56 = vpop.f32.mrb[203].mxu0  ;;  %v8563_v62 = vpop.f32.mrb[250].mxu1 }
 0x4f8   : > { %v5444_v20 = vadd.f32 %v8498_v59, %v13578_v6  ;;  %v8501_v5 = vadd.f32 %v8500_v56, %v8499_v7  ;;  %v8564_v52 = vpop.f32.mrb[251].mxu1 }
 0x4f9   : > { %v8565_v38 = vadd.f32 %v8564_v52, %v8563_v62 }
 0x4fa   : > { %v5447_v14 = vadd.f32 %v8501_v5, %v13581_v63  ;;  %v13627_v10 = vadd.f32 %v8562_v34, %v5444_v20 }
 0x4fc   : > { %v8502_v47 = vpop.f32.mrb[204].mxu0  ;;  %v13629_v27 = vadd.f32 %v8565_v38, %v5447_v14 }
 0x4fd   : > { %v8503_v32 = vpop.f32.mrb[205].mxu0  ;;  %v8566_v19 = vpop.f32.mrb[252].mxu1 }
 0x4fe   : > { %v8504_v17 = vadd.f32 %v8503_v32, %v8502_v47  ;;  %v8505_v54 = vpop.f32.mrb[206].mxu0  ;;  %v8567_v13 = vpop.f32.mrb[253].mxu1 }
 0x4ff   : > { %v8568_v11 = vadd.f32 %v8567_v13, %v8566_v19  ;;  %v8506_v0 = vpop.f32.mrb[207].mxu0  ;;  %v8569_v43 = vpop.f32.mrb[254].mxu1 }
 0x500   : > { %v5452_v6 = vadd.f32 %v8504_v17, %v13584_v9  ;;  %v8507_v48 = vadd.f32 %v8506_v0, %v8505_v54  ;;  %v8570_v50 = vpop.f32.mrb[255].mxu1 }
 0x501   : > { %v8571_v26 = vadd.f32 %v8570_v50, %v8569_v43 }
 0x502   : > { %v5455_v63 = vadd.f32 %v8507_v48, %v13587_v30  ;;  %v13633_v33 = vadd.f32 %v8568_v11, %v5452_v6 }
 0x504   : > { %v8508_v16 = vpop.f32.mrb[208].mxu0  ;;  %v13635_v53 = vadd.f32 %v8571_v26, %v5455_v63 }
 0x505   : > { %v8509_v29 = vpop.f32.mrb[209].mxu0  ;;  %v8572_v28 = vpop.f32.mrb[0].mxu1 }
 0x506   : > { %v8510_v31 = vadd.f32 %v8509_v29, %v8508_v16  ;;  %v8511_v46 = vpop.f32.mrb[210].mxu0  ;;  %v8573_v36 = vpop.f32.mrb[1].mxu1 }
 0x507   : > { %v8574_v57 = vadd.f32 %v8573_v36, %v8572_v28  ;;  %v8512_v23 = vpop.f32.mrb[211].mxu0  ;;  %v8575_v1 = vpop.f32.mrb[2].mxu1 }
 0x508   : > { %v5460_v9 = vadd.f32 %v8510_v31, %v13590_v22  ;;  %v8513_v35 = vadd.f32 %v8512_v23, %v8511_v46  ;;  %v8576_v51 = vpop.f32.mrb[3].mxu1 }
 0x509   : > { %v8577_v42 = vadd.f32 %v8576_v51, %v8575_v1 }
 0x50a   : > { %v5463_v30 = vadd.f32 %v8513_v35, %v13593_v45  ;;  %v13639_v25 = vadd.f32 %v8574_v57, %v5460_v9 }
 0x50c   : > { %v8514_v60 = vpop.f32.mrb[212].mxu0  ;;  %v13641_v58 = vadd.f32 %v8577_v42, %v5463_v30 }
 0x50d   : > { %v8515_v44 = vpop.f32.mrb[213].mxu0  ;;  %v8578_v37 = vpop.f32.mrb[4].mxu1 }
 0x50e   : > { %v8516_v49 = vadd.f32 %v8515_v44, %v8514_v60  ;;  %v8517_v2 = vpop.f32.mrb[214].mxu0  ;;  %v8579_v21 = vpop.f32.mrb[5].mxu1 }
 0x50f   : > { %v8580_v59 = vadd.f32 %v8579_v21, %v8578_v37  ;;  %v8518_v7 = vpop.f32.mrb[215].mxu0  ;;  %v8581_v18 = vpop.f32.mrb[6].mxu1 }
 0x510   : > { %v5468_v22 = vadd.f32 %v8516_v49, %v13596_v8  ;;  %v8519_v34 = vadd.f32 %v8518_v7, %v8517_v2  ;;  %v8582_v56 = vpop.f32.mrb[7].mxu1 }
 0x511   : > { %v8583_v62 = vadd.f32 %v8582_v56, %v8581_v18 }
 0x512   : > { %v5471_v45 = vadd.f32 %v8519_v34, %v13599_v40  ;;  %v13645_v20 = vadd.f32 %v8580_v59, %v5468_v22 }
 0x514   : > { %v8520_v5 = vpop.f32.mrb[216].mxu0  ;;  %v13647_v52 = vadd.f32 %v8583_v62, %v5471_v45 }
 0x515   : > { %v8521_v38 = vpop.f32.mrb[217].mxu0  ;;  %v8584_v14 = vpop.f32.mrb[8].mxu1 }
 0x516   : > { %v8522_v47 = vadd.f32 %v8521_v38, %v8520_v5  ;;  %v8523_v32 = vpop.f32.mrb[218].mxu0  ;;  %v8585_v19 = vpop.f32.mrb[9].mxu1 }
 0x517   : > { %v8586_v17 = vadd.f32 %v8585_v19, %v8584_v14  ;;  %v8524_v54 = vpop.f32.mrb[219].mxu0  ;;  %v8587_v13 = vpop.f32.mrb[10].mxu1 }
 0x518   : > { %v5476_v8 = vadd.f32 %v8522_v47, %v13602_v24  ;;  %v8525_v11 = vadd.f32 %v8524_v54, %v8523_v32  ;;  %v8588_v0 = vpop.f32.mrb[11].mxu1 }
 0x519   : > { %v8589_v43 = vadd.f32 %v8588_v0, %v8587_v13 }
 0x51a   : > { %v5479_v40 = vadd.f32 %v8525_v11, %v13605_v41  ;;  %v13651_v6 = vadd.f32 %v8586_v17, %v5476_v8 }
 0x51c   : > { %v8526_v48 = vpop.f32.mrb[220].mxu0  ;;  %v13653_v50 = vadd.f32 %v8589_v43, %v5479_v40 }
 0x51d   : > { %v8527_v26 = vpop.f32.mrb[221].mxu0  ;;  %v8590_v63 = vpop.f32.mrb[12].mxu1 }
 0x51e   : > { %v8528_v16 = vadd.f32 %v8527_v26, %v8526_v48  ;;  %v8529_v29 = vpop.f32.mrb[222].mxu0  ;;  %v8591_v28 = vpop.f32.mrb[13].mxu1 }
 0x51f   : > { %v8592_v31 = vadd.f32 %v8591_v28, %v8590_v63  ;;  %v8530_v46 = vpop.f32.mrb[223].mxu0  ;;  %v8593_v36 = vpop.f32.mrb[14].mxu1 }
 0x520   : > { %v5484_v24 = vadd.f32 %v8528_v16, %v13608_v55  ;;  %v8531_v57 = vadd.f32 %v8530_v46, %v8529_v29  ;;  %v8594_v23 = vpop.f32.mrb[15].mxu1 }
 0x521   : > { %v8595_v1 = vadd.f32 %v8594_v23, %v8593_v36 }
 0x522   : > { %v5487_v41 = vadd.f32 %v8531_v57, %v13611_v39  ;;  %v5581_v9 = vadd.f32 %v8592_v31, %v5484_v24 }
 0x524   : > { %v8806_v35 = vpop.f32.mrb[224].mxu0  ;;  %v5584_v51 = vadd.f32 %v8595_v1, %v5487_v41 }
 0x525   : > { %v5630_v42 = vadd.f32 %v8806_v35, %v13621_v61  ;;  %v5621_v30 = vpop.f32.mrb[225].mxu0 }
 0x526   : > { %v5622_v60 = vadd.f32 %v5621_v30, %v13615_v3  ;;  %v8807_v44 = vpop.f32.mrb[226].mxu0 }
 0x527   : > { %v5633_v37 = vadd.f32 %v8807_v44, %v13623_v4  ;;  %v5624_v49 = vpop.f32.mrb[227].mxu0  ;;  %v5686_v55 = vmax.f32 %v5630_v42, 0.0 }
 0x528   : > { %v5625_v2 = vadd.f32 %v5624_v49, %v13617_v15  ;;  %v5684_v59 = vmax.f32 %v5622_v60, 0.0 }
 0x529   : > { %v5687_v21 = vmax.f32 %v5633_v37, 0.0 }
 0x52a   : > { %v5685_v7 = vmax.f32 %v5625_v2, 0.0 }
 0x52b   : > { %v5705_v18 = vpack.c.bf16 %v5687_v21, %v5686_v55 }
 0x52c   : > { %v5702_v39 = vpack.c.bf16 %v5685_v7, %v5684_v59  ;;  %v8810_v22 = vpop.f32.mrb[228].mxu0 }
 0x52d   : > { %v5646_v34 = vadd.f32 %v8810_v22, %v13633_v33  ;;  %v5637_v56 = vpop.f32.mrb[229].mxu0 }
 0x52e   : > { %v5638_v61 = vadd.f32 %v5637_v56, %v13627_v10  ;;  %v8811_v62 = vpop.f32.mrb[230].mxu0  ;;  %6367 = vmatmul.mubr.bf16.vlgmr.msra.gmra.mrb[16].mxu1 %v5702_v39  ;;  %8836 = vmatprep.mubr.bf16.mxu0 %v5702_v39 }
 0x52f   : > { %v5649_v3 = vadd.f32 %v8811_v62, %v13635_v53  ;;  %v5640_v4 = vpop.f32.mrb[231].mxu0  ;;  %8837 = vmatmul.mubr.bf16.vlgmr.msra.gmra.mrb[16].mxu0 %v5705_v18  ;;  %6376 = vmatprep.mubr.bf16.mxu1 %v14810_v12  ;;  %v5690_v45 = vmax.f32 %v5646_v34, 0.0 }
 0x530   : > { %v5641_v15 = vadd.f32 %v5640_v4, %v13629_v27  ;;  %v5688_v38 = vmax.f32 %v5638_v61, 0.0 }
 0x531   : > { %v5691_v5 = vmax.f32 %v5649_v3, 0.0 }
 0x532   : > { %v5689_v14 = vmax.f32 %v5641_v15, 0.0 }
 0x533   : > { %v5711_v47 = vpack.c.bf16 %v5691_v5, %v5690_v45 }
 0x534   : > { %v5708_v33 = vpack.c.bf16 %v5689_v14, %v5688_v38  ;;  %v8814_v32 = vpop.f32.mrb[232].mxu0 }
 0x535   : > { %v5662_v10 = vadd.f32 %v8814_v32, %v13645_v20  ;;  %v5653_v19 = vpop.f32.mrb[233].mxu0 }
 0x536   : > { %v5654_v17 = vadd.f32 %v5653_v19, %v13639_v25  ;;  %v8815_v54 = vpop.f32.mrb[234].mxu0  ;;  %6377 = vmatmul.mubr.bf16.gmra.mrb[20].mxu1 %v5705_v18  ;;  %8840 = vmatprep.mubr.bf16.mxu0 %v5708_v33 }
 0x537   : > { %v5665_v53 = vadd.f32 %v8815_v54, %v13647_v52  ;;  %v5656_v13 = vpop.f32.mrb[235].mxu0  ;;  %8841 = vmatmul.mubr.bf16.gmra.mrb[20].mxu0 %v5711_v47  ;;  %6386 = vmatprep.mubr.bf16.mxu1 %v14810_v12  ;;  %v5694_v8 = vmax.f32 %v5662_v10, 0.0 }
 0x538   : > { %v5657_v27 = vadd.f32 %v5656_v13, %v13641_v58  ;;  %v5692_v0 = vmax.f32 %v5654_v17, 0.0 }
 0x539   : > { %v5695_v11 = vmax.f32 %v5665_v53, 0.0 }
 0x53a   : > { %v5693_v43 = vmax.f32 %v5657_v27, 0.0 }
 0x53b   : > { %v5717_v40 = vpack.c.bf16 %v5695_v11, %v5694_v8 }
 0x53c   : > { %v5714_v20 = vpack.c.bf16 %v5693_v43, %v5692_v0  ;;  %v8818_v48 = vpop.f32.mrb[236].mxu0 }
 0x53d   : > { %v5678_v26 = vadd.f32 %v8818_v48, %v5581_v9  ;;  %v5669_v25 = vpop.f32.mrb[237].mxu0 }
 0x53e   : > { %v5670_v63 = vadd.f32 %v5669_v25, %v13651_v6  ;;  %v8819_v16 = vpop.f32.mrb[238].mxu0  ;;  %6387 = vmatmul.mubr.bf16.gmra.mrb[24].mxu1 %v5708_v33  ;;  %8844 = vmatprep.mubr.bf16.mxu0 %v5714_v20 }
 0x53f   : > { %v5681_v52 = vadd.f32 %v8819_v16, %v5584_v51  ;;  %v5672_v29 = vpop.f32.mrb[239].mxu0  ;;  %8845 = vmatmul.mubr.bf16.gmra.mrb[24].mxu0 %v5717_v40  ;;  %6396 = vmatprep.mubr.bf16.mxu1 %v14810_v12  ;;  %v5698_v28 = vmax.f32 %v5678_v26, 0.0 }
 0x540   : > { %v5673_v58 = vadd.f32 %v5672_v29, %v13653_v50  ;;  %v5696_v46 = vmax.f32 %v5670_v63, 0.0 }
 0x541   : > { %v5699_v31 = vmax.f32 %v5681_v52, 0.0 }
 0x542   : > { %v5697_v36 = vmax.f32 %v5673_v58, 0.0 }
 0x543   : > { %v5723_v24 = vpack.c.bf16 %v5699_v31, %v5698_v28 }
 0x544   : > { %v5720_v57 = vpack.c.bf16 %v5697_v36, %v5696_v46  ;;  %v8628_v23 = vpop.f32.mrb[240].mxu0 }
 0x545   : > { %v8629_v1 = vpop.f32.mrb[241].mxu0 }
 0x546   : > { %v8630_v41 = vadd.f32 %v8629_v1, %v8628_v23  ;;  %6397 = vmatmul.mubr.bf16.gmra.mrb[28].mxu1 %v5711_v47  ;;  %v8631_v6 = vpop.f32.mrb[242].mxu0  ;;  %8848 = vmatprep.mubr.bf16.mxu0 %v5720_v57 }
 0x547   : > { %v8632_v9 = vpop.f32.mrb[243].mxu0  ;;  %8849 = vmatmul.mubr.bf16.gmra.mrb[28].mxu0 %v5723_v24  ;;  %6406 = vmatprep.mubr.bf16.mxu1 %v14810_v12 }
 0x548   : > { %v8633_v35 = vadd.f32 %v8632_v9, %v8631_v6 }
 0x54c   : > { %v8634_v51 = vpop.f32.mrb[244].mxu0 }
 0x54d   : > { %v8635_v42 = vpop.f32.mrb[245].mxu0 }
 0x54e   : > { %v8636_v50 = vadd.f32 %v8635_v42, %v8634_v51  ;;  %6407 = vmatmul.mubr.bf16.gmra.mrb[32].mxu1 %v5714_v20  ;;  %v8637_v30 = vpop.f32.mrb[246].mxu0  ;;  %v14811_v20 = vld [vmem:[#allocation7_spill] sm:$0xff] }
 0x54f   : > { %v8638_v60 = vpop.f32.mrb[247].mxu0  ;;  %6416 = vmatprep.mubr.bf16.mxu1 %v14810_v12  ;;  %v14812_v48 = vsub.s32 2, %v14811_v20  ;;  %v14813_v25 = vsub.s32 0, %v14811_v20  ;;  %v14814_v16 = vsub.s32 1, %v14811_v20 }
 0x550   : > { %v8639_v44 = vadd.f32 %v8638_v60, %v8637_v30 }
 0x554   : > { %v8640_v37 = vpop.f32.mrb[248].mxu0 }
 0x555   : > { %v8641_v49 = vpop.f32.mrb[249].mxu0 }
 0x556   : > { %v8642_v2 = vadd.f32 %v8641_v49, %v8640_v37  ;;  %6417 = vmatmul.mubr.bf16.gmra.mrb[36].mxu1 %v5717_v40  ;;  %v8643_v55 = vpop.f32.mrb[250].mxu0  ;;  %v5820_v40 = vld [vmem:[%s13925_s10] sm:$0x7] }
 0x557   : > { %v8644_v21 = vpop.f32.mrb[251].mxu0  ;;  %6426 = vmatprep.mubr.bf16.mxu1 %v14810_v12  ;;  %v5833_v26 = vrot.slane %v5820_v40, %v14812_v48  ;;  %v13685_v63 = vrot.slane %v5820_v40, %v14813_v25  ;;  %v13689_v52 = vrot.slane %v5820_v40, %v14814_v16  ;;  %v9442_v25 = vld [vmem:[%s9698_s15 + $0x28] sm:$0xff] }
 0x558   : > { %v8645_v59 = vadd.f32 %v8644_v21, %v8643_v55 }
 0x559   : > { %v6482_v29 = vadd.f32 %v8630_v41, %v5833_v26  ;;  %v6485_v58 = vadd.f32 %v8633_v35, %v5833_v26  ;;  %v6490_v28 = vadd.f32 %v8636_v50, %v5833_v26  ;;  %v6493_v31 = vadd.f32 %v8639_v44, %v5833_v26 }
 0x55a   : > { %v13692_v46 = vadd.f32 %v8642_v2, %v5833_v26  ;;  %v13694_v36 = vadd.f32 %v8645_v59, %v5833_v26 }
 0x55c   : > { %v8646_v7 = vpop.f32.mrb[252].mxu0 }
 0x55d   : > { %v8647_v18 = vpop.f32.mrb[253].mxu0 }
 0x55e   : > { %v8648_v39 = vadd.f32 %v8647_v18, %v8646_v7  ;;  %6427 = vmatmul.mubr.bf16.gmra.mrb[40].mxu1 %v5720_v57  ;;  %v8649_v22 = vpop.f32.mrb[254].mxu0 }
 0x55f   : > { %v8650_v34 = vpop.f32.mrb[255].mxu0  ;;  %6436 = vmatprep.mubr.bf16.mxu1 %v14810_v12 }
 0x560   : > { %v8651_v56 = vadd.f32 %v8650_v34, %v8649_v22  ;;  %v13696_v57 = vadd.f32 %v8648_v39, %v5833_v26 }
 0x562   : > { %v13698_v23 = vadd.f32 %v8651_v56, %v5833_v26 }
 0x564   : > { %v8652_v61 = vpop.f32.mrb[0].mxu0 }
 0x565   : > { %v8653_v62 = vpop.f32.mrb[1].mxu0 }
 0x566   : > { %v8654_v3 = vadd.f32 %v8653_v62, %v8652_v61  ;;  %6437 = vmatmul.mubr.bf16.gmra.mrb[44].mxu1 %v5723_v24  ;;  %v8655_v4 = vpop.f32.mrb[2].mxu0 }
 0x567   : > { %v8656_v15 = vpop.f32.mrb[3].mxu0 }
 0x568   : > { %v8657_v45 = vadd.f32 %v8656_v15, %v8655_v4  ;;  %v13700_v1 = vadd.f32 %v8654_v3, %v5833_v26  ;;  %v9435_v3 = vld [vmem:[%s9698_s15] sm:$0xff] }
 0x56a   : > { %v13702_v6 = vadd.f32 %v8657_v45, %v5833_v26 }
 0x56c   : > { %v8658_v5 = vpop.f32.mrb[4].mxu0 }
 0x56d   : > { %v8659_v38 = vpop.f32.mrb[5].mxu0 }
 0x56e   : > { %v8660_v14 = vadd.f32 %v8659_v38, %v8658_v5  ;;  %v8661_v47 = vpop.f32.mrb[6].mxu0  ;;  %v9436_v38 = vld [vmem:[%s9698_s15 + $0x8] sm:$0xff] }
 0x56f   : > { %v8662_v33 = vpop.f32.mrb[7].mxu0 }
 0x570   : > { %v8663_v32 = vadd.f32 %v8662_v33, %v8661_v47  ;;  %v13705_v51 = vadd.f32 %v8660_v14, %v5833_v26  ;;  %v9437_v47 = vld [vmem:[%s9698_s15 + $0x40] sm:$0xff] }
 0x572   : > { %v13707_v42 = vadd.f32 %v8663_v32, %v5833_v26 }
 0x574   : > { %v8664_v10 = vpop.f32.mrb[8].mxu0 }
 0x575   : > { %v8665_v19 = vpop.f32.mrb[9].mxu0 }
 0x576   : > { %v8666_v17 = vadd.f32 %v8665_v19, %v8664_v10  ;;  %v8667_v54 = vpop.f32.mrb[10].mxu0 }
 0x577   : > { %v8668_v12 = vpop.f32.mrb[11].mxu0 }
 0x578   : > { %v8669_v53 = vadd.f32 %v8668_v12, %v8667_v54  ;;  %v13709_v50 = vadd.f32 %v8666_v17, %v5833_v26  ;;  %v9438_v17 = vld [vmem:[%s9698_s15 + $0x18] sm:$0xff]  ;;  %v9439_v12 = vld [vmem:[%s9698_s15 + $0x10] sm:$0xff] }
 0x57a   : > { %v13718_v2 = vadd.f32 %v8669_v53, %v5833_v26 }
 0x57c   : > { %v8670_v13 = vpop.f32.mrb[12].mxu0 }
 0x57d   : > { %v8671_v27 = vpop.f32.mrb[13].mxu0 }
 0x57e   : > { %v8672_v8 = vadd.f32 %v8671_v27, %v8670_v13  ;;  %v8673_v11 = vpop.f32.mrb[14].mxu0 }
 0x57f   : > { %v8674_v0 = vpop.f32.mrb[15].mxu0 }
 0x580   : > { %v8675_v43 = vadd.f32 %v8674_v0, %v8673_v11  ;;  %v13716_v49 = vadd.f32 %v8672_v8, %v5833_v26  ;;  %v9440_v11 = vld [vmem:[%s9698_s15 + $0x20] sm:$0xff] }
 0x582   : > { %v13721_v39 = vadd.f32 %v8675_v43, %v5833_v26  ;;  %v9441_v43 = vld [vmem:[%s9698_s15 + $0x58] sm:$0xff] }
 0x601   : > { %v6368_v24 = vpop.f32.mrb[16].mxu1 }
 0x602   : > { %v8884_v41 = vadd.f32 %v6368_v24, %v13685_v63  ;;  %v6370_v9 = vpop.f32.mrb[17].mxu1  ;;  %v8838_v35 = vpop.f32.mrb[16].mxu0 }
 0x603   : > { %v8885_v30 = vadd.f32 %v6370_v9, %v13689_v52  ;;  %v6587_v60 = vadd.f32 %v8838_v35, %v6490_v28  ;;  %v6372_v44 = vpop.f32.mrb[18].mxu1  ;;  %v6578_v37 = vpop.f32.mrb[17].mxu0 }
 0x604   : > { %v6641_v55 = vmax.f32 %v8884_v41, 0.0  ;;  %v8886_v21 = vadd.f32 %v6372_v44, %v13685_v63  ;;  %v6579_v59 = vadd.f32 %v6578_v37, %v6482_v29  ;;  %v6374_v7 = vpop.f32.mrb[19].mxu1  ;;  %v8839_v18 = vpop.f32.mrb[18].mxu0 }
 0x605   : > { %v6642_v22 = vmax.f32 %v8885_v30, 0.0  ;;  %v6649_v34 = vmax.f32 %v6587_v60, 0.0  ;;  %v8887_v56 = vadd.f32 %v6374_v7, %v13689_v52  ;;  %v6590_v61 = vadd.f32 %v8839_v18, %v6493_v31  ;;  %v6581_v62 = vpop.f32.mrb[19].mxu0 }
 0x606   : > { %v6689_v4 = vadd.f32 %v9435_v3, %v6641_v55  ;;  %v6644_v15 = vmax.f32 %v8886_v21, 0.0  ;;  %v6643_v45 = vmax.f32 %v6579_v59, 0.0  ;;  %v6582_v5 = vadd.f32 %v6581_v62, %v6485_v58 }
 0x607   : > { %v6690_v14 = vadd.f32 %v9436_v38, %v6642_v22  ;;  %v6697_v33 = vadd.f32 %v9437_v47, %v6649_v34  ;;  %v6645_v32 = vmax.f32 %v8887_v56, 0.0  ;;  %v6652_v10 = vmax.f32 %v6590_v61, 0.0  ;;  %v9443_v56 = vld [vmem:[%s9698_s15 + $0x30] sm:$0xff] }
 0x608   : > { %v6737_v19 = vmax.f32 %v6689_v4, 0.0  ;;  %v6692_v54 = vadd.f32 %v9438_v17, %v6644_v15  ;;  %v6691_v53 = vadd.f32 %v9439_v12, %v6643_v45  ;;  %v6646_v13 = vmax.f32 %v6582_v5, 0.0  ;;  %v9444_v4 = vld [vmem:[%s9698_s15 + $0x38] sm:$0xff]  ;;  %v9445_v45 = vld [vmem:[%s9698_s15 + $0xa0] sm:$0xff] }
 0x609   : > { %v6738_v27 = vmax.f32 %v6690_v14, 0.0  ;;  %v6745_v8 = vmax.f32 %v6697_v33, 0.0  ;;  %v6693_v0 = vadd.f32 %v9440_v11, %v6645_v32  ;;  %v6700_v40 = vadd.f32 %v9441_v43, %v6652_v10  ;;  %v6378_v20 = vpop.f32.mrb[20].mxu1  ;;  %v9447_v32 = vld [vmem:[%s9698_s15 + $0x70] sm:$0xff] }
 0x60a   : > { %6785 = vst [vmem:[%s13732_s29] sm:$0xff] %v6737_v19  ;;  %v6740_v48 = vmax.f32 %v6692_v54, 0.0  ;;  %v6739_v26 = vmax.f32 %v6691_v53, 0.0  ;;  %v6694_v16 = vadd.f32 %v9442_v25, %v6646_v13  ;;  %v8888_v29 = vadd.f32 %v6378_v20, %v13685_v63  ;;  %v6380_v58 = vpop.f32.mrb[21].mxu1  ;;  %v8842_v28 = vpop.f32.mrb[20].mxu0  ;;  %v9449_v53 = vld [vmem:[%s9698_s15 + $0xb8] sm:$0xff] }
 0x60b   : > { %6786 = vst [vmem:[%s13732_s29 + $0x8] sm:$0xff] %v6738_v27  ;;  %6793 = vst [vmem:[%s13732_s29 + $0x40] sm:$0xff] %v6745_v8  ;;  %v6741_v31 = vmax.f32 %v6693_v0, 0.0  ;;  %v6748_v24 = vmax.f32 %v6700_v40, 0.0  ;;  %v8889_v41 = vadd.f32 %v6380_v58, %v13689_v52  ;;  %v6603_v9 = vadd.f32 %v8842_v28, %v13696_v57  ;;  %v6382_v35 = vpop.f32.mrb[22].mxu1  ;;  %v6594_v30 = vpop.f32.mrb[21].mxu0 }
 0x60c   : > { %6788 = vst [vmem:[%s13732_s29 + $0x18] sm:$0xff] %v6740_v48  ;;  %6787 = vst [vmem:[%s13732_s29 + $0x10] sm:$0xff] %v6739_v26  ;;  %v6742_v60 = vmax.f32 %v6694_v16, 0.0  ;;  %v6647_v44 = vmax.f32 %v8888_v29, 0.0  ;;  %v8890_v37 = vadd.f32 %v6382_v35, %v13685_v63  ;;  %v6595_v55 = vadd.f32 %v6594_v30, %v13692_v46  ;;  %v6384_v21 = vpop.f32.mrb[23].mxu1  ;;  %v8843_v59 = vpop.f32.mrb[22].mxu0 }
 0x60d   : > { %6789 = vst [vmem:[%s13732_s29 + $0x20] sm:$0xff] %v6741_v31  ;;  %6796 = vst [vmem:[%s13732_s29 + $0x58] sm:$0xff] %v6748_v24  ;;  %v6648_v7 = vmax.f32 %v8889_v41, 0.0  ;;  %v6661_v57 = vmax.f32 %v6603_v9, 0.0  ;;  %v8891_v18 = vadd.f32 %v6384_v21, %v13689_v52  ;;  %v6606_v22 = vadd.f32 %v8843_v59, %v13698_v23  ;;  %v6597_v34 = vpop.f32.mrb[23].mxu0  ;;  %v9446_v23 = vld [vmem:[%s9698_s15 + $0x48] sm:$0xff] }
 0x60e   : > { %6790 = vst [vmem:[%s13732_s29 + $0x28] sm:$0xff] %v6742_v60  ;;  %v6695_v61 = vadd.f32 %v9443_v56, %v6647_v44  ;;  %v6650_v62 = vmax.f32 %v8890_v37, 0.0  ;;  %v6655_v46 = vmax.f32 %v6595_v55, 0.0  ;;  %v6598_v3 = vadd.f32 %v6597_v34, %v13694_v36  ;;  %v9448_v36 = vld [vmem:[%s9698_s15 + $0x50] sm:$0xff]  ;;  %v9450_v0 = vld [vmem:[%s9698_s15 + $0x88] sm:$0xff]  ;;  %v9451_v21 = vld [vmem:[%s9698_s15 + $0x60] sm:$0xff] }
 0x60f   : > { %v6696_v15 = vadd.f32 %v9444_v4, %v6648_v7  ;;  %v6709_v5 = vadd.f32 %v9445_v45, %v6661_v57  ;;  %v6651_v38 = vmax.f32 %v8891_v18, 0.0  ;;  %v6664_v14 = vmax.f32 %v6606_v22, 0.0  ;;  %v9452_v18 = vld [vmem:[%s9698_s15 + $0x68] sm:$0xff]  ;;  %v9453_v34 = vld [vmem:[%s9698_s15 + $0x100] sm:$0xff]  ;;  %v9455_v4 = vld [vmem:[%s9698_s15 + $0xd0] sm:$0xff] }
 0x610   : > { %v6743_v47 = vmax.f32 %v6695_v61, 0.0  ;;  %v6698_v33 = vadd.f32 %v9446_v23, %v6650_v62  ;;  %v6703_v10 = vadd.f32 %v9447_v32, %v6655_v46  ;;  %v6658_v19 = vmax.f32 %v6598_v3, 0.0 }
 0x611   : > { %v6744_v17 = vmax.f32 %v6696_v15, 0.0  ;;  %v6757_v54 = vmax.f32 %v6709_v5, 0.0  ;;  %v6699_v12 = vadd.f32 %v9448_v36, %v6651_v38  ;;  %v6712_v13 = vadd.f32 %v9449_v53, %v6664_v14  ;;  %v6388_v27 = vpop.f32.mrb[24].mxu1 }
 0x612   : > { %6791 = vst [vmem:[%s13732_s29 + $0x30] sm:$0xff] %v6743_v47  ;;  %v6746_v8 = vmax.f32 %v6698_v33, 0.0  ;;  %v6751_v11 = vmax.f32 %v6703_v10, 0.0  ;;  %v6706_v43 = vadd.f32 %v9450_v0, %v6658_v19  ;;  %v8892_v40 = vadd.f32 %v6388_v27, %v13685_v63  ;;  %v6390_v20 = vpop.f32.mrb[25].mxu1  ;;  %v8846_v48 = vpop.f32.mrb[24].mxu0  ;;  %v9457_v47 = vld [vmem:[%s9698_s15 + $0x118] sm:$0xff] }
 0x613   : > { %6792 = vst [vmem:[%s13732_s29 + $0x38] sm:$0xff] %v6744_v17  ;;  %6805 = vst [vmem:[%s13732_s29 + $0xa0] sm:$0xff] %v6757_v54  ;;  %v6747_v26 = vmax.f32 %v6699_v12, 0.0  ;;  %v6760_v25 = vmax.f32 %v6712_v13, 0.0  ;;  %v8893_v16 = vadd.f32 %v6390_v20, %v13689_v52  ;;  %v6619_v29 = vadd.f32 %v8846_v48, %v13705_v51  ;;  %v6392_v58 = vpop.f32.mrb[26].mxu1  ;;  %v6610_v28 = vpop.f32.mrb[25].mxu0 }
 0x614   : > { %6794 = vst [vmem:[%s13732_s29 + $0x48] sm:$0xff] %v6746_v8  ;;  %6799 = vst [vmem:[%s13732_s29 + $0x70] sm:$0xff] %v6751_v11  ;;  %v6754_v31 = vmax.f32 %v6706_v43, 0.0  ;;  %v6653_v24 = vmax.f32 %v8892_v40, 0.0  ;;  %v8894_v41 = vadd.f32 %v6392_v58, %v13685_v63  ;;  %v6611_v9 = vadd.f32 %v6610_v28, %v13700_v1  ;;  %v6394_v35 = vpop.f32.mrb[27].mxu1  ;;  %v8847_v30 = vpop.f32.mrb[26].mxu0 }
 0x615   : > { %6795 = vst [vmem:[%s13732_s29 + $0x50] sm:$0xff] %v6747_v26  ;;  %6808 = vst [vmem:[%s13732_s29 + $0xb8] sm:$0xff] %v6760_v25  ;;  %v6654_v60 = vmax.f32 %v8893_v16, 0.0  ;;  %v6673_v51 = vmax.f32 %v6619_v29, 0.0  ;;  %v8895_v44 = vadd.f32 %v6394_v35, %v13689_v52  ;;  %v6622_v37 = vadd.f32 %v8847_v30, %v13707_v42  ;;  %v6613_v55 = vpop.f32.mrb[27].mxu0  ;;  %v9454_v42 = vld [vmem:[%s9698_s15 + $0x78] sm:$0xff] }
 0x616   : > { %6802 = vst [vmem:[%s13732_s29 + $0x88] sm:$0xff] %v6754_v31  ;;  %v6701_v59 = vadd.f32 %v9451_v21, %v6653_v24  ;;  %v6656_v7 = vmax.f32 %v8894_v41, 0.0  ;;  %v6667_v1 = vmax.f32 %v6611_v9, 0.0  ;;  %v6614_v57 = vadd.f32 %v6613_v55, %v13702_v6  ;;  %v9456_v6 = vld [vmem:[%s9698_s15 + $0x80] sm:$0xff]  ;;  %v9458_v19 = vld [vmem:[%s9698_s15 + $0xe8] sm:$0xff]  ;;  %v9459_v31 = vld [vmem:[%s9698_s15 + $0x90] sm:$0xff] }
 0x617   : > { %v6702_v22 = vadd.f32 %v9452_v18, %v6654_v60  ;;  %v6721_v56 = vadd.f32 %v9453_v34, %v6673_v51  ;;  %v6657_v61 = vmax.f32 %v8895_v44, 0.0  ;;  %v6676_v62 = vmax.f32 %v6622_v37, 0.0  ;;  %v9460_v35 = vld [vmem:[%s9698_s15 + $0x98] sm:$0xff]  ;;  %v9461_v60 = vld [vmem:[%s9698_s15 + $0x160] sm:$0xff] }
 0x618   : > { %v6749_v46 = vmax.f32 %v6701_v59, 0.0  ;;  %v6704_v3 = vadd.f32 %v9454_v42, %v6656_v7  ;;  %v6715_v15 = vadd.f32 %v9455_v4, %v6667_v1  ;;  %v6670_v45 = vmax.f32 %v6614_v57, 0.0  ;;  %v9463_v59 = vld [vmem:[%s9698_s15 + $0x130] sm:$0xff]  ;;  %v9465_v34 = vld [vmem:[%s9698_s15 + $0x178] sm:$0xff]  ;;  %v9466_v42 = vld [vmem:[%s9698_s15 + $0x148] sm:$0xff] }
 0x619   : > { %v6750_v5 = vmax.f32 %v6702_v22, 0.0  ;;  %v6769_v38 = vmax.f32 %v6721_v56, 0.0  ;;  %v6705_v14 = vadd.f32 %v9456_v6, %v6657_v61  ;;  %v6724_v23 = vadd.f32 %v9457_v47, %v6676_v62  ;;  %v6398_v33 = vpop.f32.mrb[28].mxu1 }
 0x61a   : > { %6797 = vst [vmem:[%s13732_s29 + $0x60] sm:$0xff] %v6749_v46  ;;  %v6752_v32 = vmax.f32 %v6704_v3, 0.0  ;;  %v6763_v10 = vmax.f32 %v6715_v15, 0.0  ;;  %v6718_v17 = vadd.f32 %v9458_v19, %v6670_v45  ;;  %v8896_v54 = vadd.f32 %v6398_v33, %v13685_v63  ;;  %v6400_v36 = vpop.f32.mrb[29].mxu1  ;;  %v8850_v12 = vpop.f32.mrb[28].mxu0  ;;  %v9467_v19 = vld [vmem:[%s9698_s15 + $0xc0] sm:$0xff] }
 0x61b   : > { %6798 = vst [vmem:[%s13732_s29 + $0x68] sm:$0xff] %v6750_v5  ;;  %6817 = vst [vmem:[%s13732_s29 + $0x100] sm:$0xff] %v6769_v38  ;;  %v6753_v53 = vmax.f32 %v6705_v14, 0.0  ;;  %v6772_v13 = vmax.f32 %v6724_v23, 0.0  ;;  %v8897_v27 = vadd.f32 %v6400_v36, %v13689_v52  ;;  %v6635_v8 = vadd.f32 %v8850_v12, %v13716_v49  ;;  %v6402_v11 = vpop.f32.mrb[30].mxu1  ;;  %v6626_v0 = vpop.f32.mrb[29].mxu0 }
 0x61c   : > { %6800 = vst [vmem:[%s13732_s29 + $0x78] sm:$0xff] %v6752_v32  ;;  %6811 = vst [vmem:[%s13732_s29 + $0xd0] sm:$0xff] %v6763_v10  ;;  %v6766_v43 = vmax.f32 %v6718_v17, 0.0  ;;  %v6659_v40 = vmax.f32 %v8896_v54, 0.0  ;;  %v8898_v20 = vadd.f32 %v6402_v11, %v13685_v63  ;;  %v6627_v48 = vadd.f32 %v6626_v0, %v13709_v50  ;;  %v6404_v26 = vpop.f32.mrb[31].mxu1  ;;  %v8851_v25 = vpop.f32.mrb[30].mxu0 }
 0x61d   : > { %6801 = vst [vmem:[%s13732_s29 + $0x80] sm:$0xff] %v6753_v53  ;;  %6820 = vst [vmem:[%s13732_s29 + $0x118] sm:$0xff] %v6772_v13  ;;  %v6660_v16 = vmax.f32 %v8897_v27, 0.0  ;;  %v6685_v49 = vmax.f32 %v6635_v8, 0.0  ;;  %v8899_v29 = vadd.f32 %v6404_v26, %v13689_v52  ;;  %v6638_v58 = vadd.f32 %v8851_v25, %v13721_v39  ;;  %v6629_v28 = vpop.f32.mrb[31].mxu0  ;;  %v9462_v39 = vld [vmem:[%s9698_s15 + $0xa8] sm:$0xff] }
 0x61e   : > { %6814 = vst [vmem:[%s13732_s29 + $0xe8] sm:$0xff] %v6766_v43  ;;  %v6707_v24 = vadd.f32 %v9459_v31, %v6659_v40  ;;  %v6662_v41 = vmax.f32 %v8898_v20, 0.0  ;;  %v6679_v50 = vmax.f32 %v6627_v48, 0.0  ;;  %v6630_v9 = vadd.f32 %v6629_v28, %v13718_v2  ;;  %v9464_v2 = vld [vmem:[%s9698_s15 + $0xb0] sm:$0xff]  ;;  %v9468_v36 = vld [vmem:[%s9698_s15 + $0xc8] sm:$0xff]  ;;  %v9469_v27 = vld [vmem:[%s9698_s15 + $0xd8] sm:$0xff] }
 0x61f   : > { %v6708_v30 = vadd.f32 %v9460_v35, %v6660_v16  ;;  %v6733_v51 = vadd.f32 %v9461_v60, %v6685_v49  ;;  %v6663_v44 = vmax.f32 %v8899_v29, 0.0  ;;  %v6688_v37 = vmax.f32 %v6638_v58, 0.0  ;;  %v9470_v0 = vld [vmem:[%s9698_s15 + $0xe0] sm:$0xff]  ;;  %v9472_v35 = vld [vmem:[%s9698_s15 + $0xf8] sm:$0xff] }
 0x620   : > { %v6755_v55 = vmax.f32 %v6707_v24, 0.0  ;;  %v6710_v21 = vadd.f32 %v9462_v39, %v6662_v41  ;;  %v6727_v7 = vadd.f32 %v9463_v59, %v6679_v50  ;;  %v6682_v1 = vmax.f32 %v6630_v9, 0.0  ;;  %v9471_v41 = vld [vmem:[%s9698_s15 + $0xf0] sm:$0xff] }
 0x621   : > { %v6756_v57 = vmax.f32 %v6708_v30, 0.0  ;;  %v6781_v18 = vmax.f32 %v6733_v51, 0.0  ;;  %v6711_v22 = vadd.f32 %v9464_v2, %v6663_v44  ;;  %v6736_v56 = vadd.f32 %v9465_v34, %v6688_v37  ;;  %v6408_v61 = vpop.f32.mrb[32].mxu1  ;;  %v9473_v44 = vld [vmem:[%s9698_s15 + $0x108] sm:$0xff]  ;;  %v9474_v39 = vld [vmem:[%s9698_s15 + $0x110] sm:$0xff] }
 0x622   : > { %6803 = vst [vmem:[%s13732_s29 + $0x90] sm:$0xff] %v6755_v55  ;;  %v6758_v62 = vmax.f32 %v6710_v21, 0.0  ;;  %v6775_v46 = vmax.f32 %v6727_v7, 0.0  ;;  %v6730_v3 = vadd.f32 %v9466_v42, %v6682_v1  ;;  %v8900_v4 = vadd.f32 %v6408_v61, %v13685_v63  ;;  %v6410_v15 = vpop.f32.mrb[33].mxu1  ;;  %v9475_v42 = vld [vmem:[%s9698_s15 + $0x120] sm:$0xff] }
 0x623   : > { %6804 = vst [vmem:[%s13732_s29 + $0x98] sm:$0xff] %v6756_v57  ;;  %6829 = vst [vmem:[%s13732_s29 + $0x160] sm:$0xff] %v6781_v18  ;;  %v6759_v45 = vmax.f32 %v6711_v22, 0.0  ;;  %v6784_v5 = vmax.f32 %v6736_v56, 0.0  ;;  %v8901_v38 = vadd.f32 %v6410_v15, %v13689_v52  ;;  %v6412_v6 = vpop.f32.mrb[34].mxu1  ;;  %v9476_v15 = vld [vmem:[%s9698_s15 + $0x128] sm:$0xff] }
 0x624   : > { %6806 = vst [vmem:[%s13732_s29 + $0xa8] sm:$0xff] %v6758_v62  ;;  %6823 = vst [vmem:[%s13732_s29 + $0x130] sm:$0xff] %v6775_v46  ;;  %v6778_v14 = vmax.f32 %v6730_v3, 0.0  ;;  %v6665_v47 = vmax.f32 %v8900_v4, 0.0  ;;  %v8902_v23 = vadd.f32 %v6412_v6, %v13685_v63  ;;  %v6414_v33 = vpop.f32.mrb[35].mxu1  ;;  %v9477_v6 = vld [vmem:[%s9698_s15 + $0x138] sm:$0xff] }
 0x625   : > { %6807 = vst [vmem:[%s13732_s29 + $0xb0] sm:$0xff] %v6759_v45  ;;  %6832 = vst [vmem:[%s13732_s29 + $0x178] sm:$0xff] %v6784_v5  ;;  %v6666_v32 = vmax.f32 %v8901_v38, 0.0  ;;  %v8903_v10 = vadd.f32 %v6414_v33, %v13689_v52 }
 0x626   : > { %6826 = vst [vmem:[%s13732_s29 + $0x148] sm:$0xff] %v6778_v14  ;;  %v6713_v17 = vadd.f32 %v9467_v19, %v6665_v47  ;;  %v6668_v54 = vmax.f32 %v8902_v23, 0.0  ;;  %v9478_v23 = vld [vmem:[%s9698_s15 + $0x140] sm:$0xff] }
 0x627   : > { %v6714_v12 = vadd.f32 %v9468_v36, %v6666_v32  ;;  %v6669_v53 = vmax.f32 %v8903_v10, 0.0 }
 0x628   : > { %v6761_v13 = vmax.f32 %v6713_v17, 0.0  ;;  %v6716_v8 = vadd.f32 %v9469_v27, %v6668_v54 }
 0x629   : > { %v6762_v11 = vmax.f32 %v6714_v12, 0.0  ;;  %v6717_v43 = vadd.f32 %v9470_v0, %v6669_v53  ;;  %v6418_v40 = vpop.f32.mrb[36].mxu1  ;;  %v9479_v0 = vld [vmem:[%s9698_s15 + $0x150] sm:$0xff] }
 0x62a   : > { %6809 = vst [vmem:[%s13732_s29 + $0xc0] sm:$0xff] %v6761_v13  ;;  %v6764_v20 = vmax.f32 %v6716_v8, 0.0  ;;  %v8904_v48 = vadd.f32 %v6418_v40, %v13685_v63  ;;  %v6420_v26 = vpop.f32.mrb[37].mxu1 }
 0x62b   : > { %6810 = vst [vmem:[%s13732_s29 + $0xc8] sm:$0xff] %v6762_v11  ;;  %v6765_v25 = vmax.f32 %v6717_v43, 0.0  ;;  %v8905_v16 = vadd.f32 %v6420_v26, %v13689_v52  ;;  %v6422_v49 = vpop.f32.mrb[38].mxu1 }
 0x62c   : > { %6812 = vst [vmem:[%s13732_s29 + $0xd8] sm:$0xff] %v6764_v20  ;;  %v6671_v29 = vmax.f32 %v8904_v48, 0.0  ;;  %v8906_v58 = vadd.f32 %v6422_v49, %v13685_v63  ;;  %v6424_v28 = vpop.f32.mrb[39].mxu1  ;;  %v9480_v20 = vld [vmem:[%s9698_s15 + $0x158] sm:$0xff] }
 0x62d   : > { %6813 = vst [vmem:[%s13732_s29 + $0xe0] sm:$0xff] %v6765_v25  ;;  %v6672_v31 = vmax.f32 %v8905_v16, 0.0  ;;  %v8907_v24 = vadd.f32 %v6424_v28, %v13689_v52 }
 0x62e   : > { %v6719_v50 = vadd.f32 %v9471_v41, %v6671_v29  ;;  %v6674_v9 = vmax.f32 %v8906_v58, 0.0  ;;  %v9482_v29 = vld [vmem:[%s9698_s15 + $0x170] sm:$0xff] }
 0x62f   : > { %v6720_v30 = vadd.f32 %v9472_v35, %v6672_v31  ;;  %v6675_v60 = vmax.f32 %v8907_v24, 0.0 }
 0x630   : > { %v6767_v51 = vmax.f32 %v6719_v50, 0.0  ;;  %v6722_v37 = vadd.f32 %v9473_v44, %v6674_v9 }
 0x631   : > { %v6768_v55 = vmax.f32 %v6720_v30, 0.0  ;;  %v6723_v21 = vadd.f32 %v9474_v39, %v6675_v60  ;;  %v6428_v59 = vpop.f32.mrb[40].mxu1 }
 0x632   : > { %6815 = vst [vmem:[%s13732_s29 + $0xf0] sm:$0xff] %v6767_v51  ;;  %v6770_v7 = vmax.f32 %v6722_v37, 0.0  ;;  %v8908_v1 = vadd.f32 %v6428_v59, %v13685_v63  ;;  %v6430_v57 = vpop.f32.mrb[41].mxu1 }
 0x633   : > { %6816 = vst [vmem:[%s13732_s29 + $0xf8] sm:$0xff] %v6768_v55  ;;  %v6771_v18 = vmax.f32 %v6723_v21, 0.0  ;;  %v8909_v2 = vadd.f32 %v6430_v57, %v13689_v52  ;;  %v6432_v22 = vpop.f32.mrb[42].mxu1 }
 0x634   : > { %6818 = vst [vmem:[%s13732_s29 + $0x108] sm:$0xff] %v6770_v7  ;;  %v6677_v34 = vmax.f32 %v8908_v1, 0.0  ;;  %v8910_v56 = vadd.f32 %v6432_v22, %v13685_v63  ;;  %v6434_v61 = vpop.f32.mrb[43].mxu1 }
 0x635   : > { %6819 = vst [vmem:[%s13732_s29 + $0x110] sm:$0xff] %v6771_v18  ;;  %v6678_v62 = vmax.f32 %v8909_v2, 0.0  ;;  %v8911_v46 = vadd.f32 %v6434_v61, %v13689_v52 }
 0x636   : > { %v6725_v3 = vadd.f32 %v9475_v42, %v6677_v34  ;;  %v6680_v4 = vmax.f32 %v8910_v56, 0.0 }
 0x637   : > { %v6726_v45 = vadd.f32 %v9476_v15, %v6678_v62  ;;  %v6681_v5 = vmax.f32 %v8911_v46, 0.0 }
 0x638   : > { %v6773_v38 = vmax.f32 %v6725_v3, 0.0  ;;  %v6728_v14 = vadd.f32 %v9477_v6, %v6680_v4 }
 0x639   : > { %v6774_v47 = vmax.f32 %v6726_v45, 0.0  ;;  %v6729_v33 = vadd.f32 %v9478_v23, %v6681_v5  ;;  %v6438_v32 = vpop.f32.mrb[44].mxu1 }
 0x63a   : > { %6821 = vst [vmem:[%s13732_s29 + $0x120] sm:$0xff] %v6773_v38  ;;  %v6776_v10 = vmax.f32 %v6728_v14, 0.0  ;;  %v8912_v19 = vadd.f32 %v6438_v32, %v13685_v63  ;;  %v6440_v17 = vpop.f32.mrb[45].mxu1 }
 0x63b   : > { %6822 = vst [vmem:[%s13732_s29 + $0x128] sm:$0xff] %v6774_v47  ;;  %v6777_v54 = vmax.f32 %v6729_v33, 0.0  ;;  %v8913_v36 = vadd.f32 %v6440_v17, %v13689_v52  ;;  %v6442_v12 = vpop.f32.mrb[46].mxu1 }
 0x63c   : > { %6824 = vst [vmem:[%s13732_s29 + $0x138] sm:$0xff] %v6776_v10  ;;  %v6683_v53 = vmax.f32 %v8912_v19, 0.0  ;;  %v8914_v13 = vadd.f32 %v6442_v12, %v13685_v63  ;;  %v6444_v27 = vpop.f32.mrb[47].mxu1  ;;  %v9481_v63 = vld [vmem:[%s9698_s15 + $0x168] sm:$0xff]  ;;  %s9483_s15 = scalar_lea.vmem %s13868_s12, 6144 }
 0x63d   : > { %6825 = vst [vmem:[%s13732_s29 + $0x140] sm:$0xff] %v6777_v54  ;;  %v6684_v8 = vmax.f32 %v8913_v36, 0.0  ;;  %v8915_v11 = vadd.f32 %v6444_v27, %v13689_v52  ;;  %p9484_p11 = scmp.ne.s32.totalorder %s13868_s12, %s9483_s15  ;;  %p9491_p1 = scmp.lt.s32.totalorder %s9489_s25, %s9483_s15 }
 0x63e   : > { %v6731_v43 = vadd.f32 %v9479_v0, %v6683_v53  ;;  %v6686_v40 = vmax.f32 %v8914_v13, 0.0 }
 0x63f   : > { %v6732_v48 = vadd.f32 %v9480_v20, %v6684_v8  ;;  %v6687_v26 = vmax.f32 %v8915_v11, 0.0  ;;  %p9485_p12 = pnand %p9484_p11, %p9651_p5  ;;  %p9492_p2 = por %p9491_p1, %p9490_p0 }
 0x640   : > { %v6779_v25 = vmax.f32 %v6731_v43, 0.0  ;;  %v6734_v16 = vadd.f32 %v9481_v63, %v6686_v40 }
 0x641   : > { %v6780_v49 = vmax.f32 %v6732_v48, 0.0  ;;  %v6735_v58 = vadd.f32 %v9482_v29, %v6687_v26  ;;  %p9486_p13 = pneg %p9485_p12 }
 0x642   : > { %6827 = vst [vmem:[%s13732_s29 + $0x150] sm:$0xff] %v6779_v25  ;;  %v6782_v52 = vmax.f32 %v6734_v16, 0.0 }
 0x643   : > { %6828 = vst [vmem:[%s13732_s29 + $0x158] sm:$0xff] %v6780_v49  ;;  %v6783_v28 = vmax.f32 %v6735_v58, 0.0  ;;  %p9493_p3 = pnand %p9492_p2, %p9486_p13 }
 0x644   : > { %6830 = vst [vmem:[%s13732_s29 + $0x168] sm:$0xff] %v6782_v52 }
 0x645   : > { %6831 = vst [vmem:[%s13732_s29 + $0x170] sm:$0xff] %v6783_v28 }
 0x646   : > { %9496 = shalt.err (!%p9493_p3)
}
 0x647   : > { %s9497_s19 = scalar_lea.hbm %s13865_s21, 6144  ;;  %s9501_s30 = scalar_lea.hbm %s13926_s11, 12288 }
 0x648   : > { %p9498_p4 = scmp.ne.s32.totalorder %s13865_s21, %s9497_s19  ;;  %p9502_p9 = scmp.lt.u32.totalorder %s13865_s21, %s13926_s11 }
 0x649   : > { %p9503_p10 = scmp.lt.u32.totalorder %s9501_s30, %s9497_s19  ;;  %p9505_p12 = scmp.lt.u32.totalorder %s9497_s19, %s13865_s21 }
 0x64a   : > { %p9499_p7 = pnand %p9498_p4, %p9651_p5 }
 0x64b   : > { %p9504_p11 = por %p9503_p10, %p9502_p9 }
 0x64c   : > { %p9500_p8 = pneg %p9499_p7 }
 0x64d   : > { %p9506_p13 = por %p9505_p12, %p9504_p11 }
 0x64f   : > { %p9507_p0 = pnand %p9506_p13, %p9500_p8 }
 0x651   : > { %9510 = shalt.err (!%p9507_p0)
}
 0x652   : > { %s9551_s15 = smov 384   ;;  %s9552_s24 = smov 24  }
 0x653   : > { %8983 = dma.vmem_to_hbm [thread:$0]  (%p9651_p5), %s13868_s12, 6144, %s13865_s21, %s13874_s16, %s9551_s15, %s9551_s15, %s9552_s24  }
 0x654 PF: > { %p8989_p1 = scmp.ge.s32.totalorder %s9545_s20, 2  ;;  %s6863_s22 = sand.u32 1, %s9533_s17  }
 0x655   : > { %s6864_s25 = scalar_lea.sflag [#allocation3], %s6863_s22 }
 0x656   : > { %p8986_p2 = pnand %p8989_p1, %p9655_p6 }
 0x658   : > { %9528 = dma.done.wait (!%p8986_p2), %s6864_s25, 6144  }
 0x659   : > { %9530 = vsyncadd (!%p8986_p2), %s6864_s25, 4294961152  ;;  %s14815_s19 = sld [smem:[#allocation5_spill]]  ;;  %s14816_s26 = sld [smem:[#allocation6_spill]] }
 0x65a   : > { %p21_p3 = scmp.ge.s32.totalorder %s9638_s23, 4   ;;  %s14817_s17 = smov %s9537_s18 }
 0x65b   : > { %s14820_s20 = smov %s9638_s23 }
 0x65c   :  { %23 = sbr.rel (!%p21_p3) target bundleno = 3 (0x3), region = 99 }
 0x65f   : > { %s14818_s18 = smov %s14815_s19  ;;  %s14819_s19 = smov %s14816_s26 }
 0x663   :  { %6869 = vsyncpa [#allocation3], 1 }
 0x664   :  { %6871 = vsyncpa [#allocation3 + $0x1], 1 }

</bundles_post_ra>
